<compile_context>
chip_gen: v7x
topology: tpu7x:2x2x1
jax: 0.10.0
libtpu: 0.0.40
codegen_flags: <defaults>
</compile_context>

<pallas_src>
import math
import numpy as np
import jax
import jax.numpy as jnp
from jax import lax
from jax.experimental import pallas as pl
from jax.experimental.pallas import tpu as pltpu

EPS = float(jnp.finfo(jnp.float32).eps)   # F.rms_norm default eps for float32
NEG_INF = -1e30


def _rms(v):
    return v * lax.rsqrt(jnp.mean(v * v, axis=-1, keepdims=True) + EPS)


def _block_kernel(x_ref, wqkv_ref, wo_ref, w1_ref, w2_ref, cos_ref, sin_ref,
                  out_ref, acc_ref, xn_ref):
    h = pl.program_id(1)
    last_h = pl.num_programs(1) - 1
    T = x_ref.shape[1]
    D = cos_ref.shape[1]

    @pl.when(h == 0)
    def _init():
        acc_ref[...] = jnp.zeros_like(acc_ref)
        xn_ref[...] = _rms(x_ref[0])          # cache rms(x) once per batch element

    # ---- head h: qkv proj -> RoPE -> QK-RMSNorm -> causal softmax -> o_proj rows ----
    xn_b = xn_ref[...].astype(jnp.bfloat16)
    qkv = jnp.dot(xn_b, wqkv_ref[...], preferred_element_type=jnp.float32)   # (T, 3D) f32
    q, k, v = qkv[:, :D], qkv[:, D:2 * D], qkv[:, 2 * D:]

    cos = cos_ref[...]
    sin = sin_ref[...]

    def rope(u):   # half-split RoPE (== interleaved RoPE in the permuted weight basis)
        return u * cos + jnp.concatenate([u[:, D // 2:], u[:, :D // 2]], axis=1) * sin

    qn = _rms(rope(q))
    kn = _rms(rope(k))

    s = lax.dot_general(qn.astype(jnp.bfloat16), kn.astype(jnp.bfloat16),
                        (((1,), (1,)), ((), ())),            # contract last dims (no k.T)
                        preferred_element_type=jnp.float32) * (1.0 / math.sqrt(D))
    row = lax.broadcasted_iota(jnp.int32, (T, T), 0)
    col = lax.broadcasted_iota(jnp.int32, (T, T), 1)
    s = jnp.where(col <= row, s, NEG_INF)

    m = jnp.max(s, axis=-1, keepdims=True)                    # fp32 softmax
    p = jnp.exp(s - m)
    l = jnp.sum(p, axis=-1, keepdims=True)
    o = jnp.dot(p.astype(jnp.bfloat16), v.astype(jnp.bfloat16),
                preferred_element_type=jnp.float32) / l       # (T, D) f32

    # head h's rows of the output projection, accumulated over heads (no head concat)
    acc_ref[...] += jnp.dot(o.astype(jnp.bfloat16), wo_ref[...],
                            preferred_element_type=jnp.float32)

    # ---- after the last head: residual + ReLU^2 FFN + residual ----
    @pl.when(h == last_h)
    def _finalize():
        x1 = x_ref[0] + acc_ref[...]                          # fp32 residual (dropout=id)
        hdd = jnp.dot(_rms(x1).astype(jnp.bfloat16), w1_ref[...],
                      preferred_element_type=jnp.float32)
        hdd = jnp.maximum(hdd, 0.0)
        hdd = hdd * hdd
        ffn = jnp.dot(hdd.astype(jnp.bfloat16), w2_ref[...],
                      preferred_element_type=jnp.float32)
        out_ref[0] = x1 + ffn


def transformer_block(x, wqkv_t, wo_t, w1_t, w2_t, n_head):
    """x: (B, T, C) fp32.  Weights are passed transposed (in_features, out_features)."""
    B, T, C = x.shape
    H = n_head
    D = C // H
    assert C == H * D
    assert D % 128 == 0 and C % 128 == 0, "head_dim / n_emb must be multiples of 128"

    # RoPE tables in the permuted half-split convention; sign folded into sin.
    inv_freq = 1.0 / (10000.0 ** (jnp.arange(0, D, 2, dtype=jnp.float32) / D))
    freqs = jnp.arange(T, dtype=jnp.float32)[:, None] * inv_freq[None, :]    # (T, D/2)
    cos_h, sin_h = jnp.cos(freqs), jnp.sin(freqs)
    cos_p = jnp.concatenate([cos_h, cos_h], axis=-1)                         # (T, D)
    sin_s = jnp.concatenate([-sin_h, sin_h], axis=-1)                        # (T, D)

    # Re-group QKV weight columns per head: [q_h(even,odd) | k_h(even,odd) | v_h],
    # so grid step (b, h) grabs one contiguous (C, 3D) column block via BlockSpec.
    perm = np.concatenate([np.arange(0, D, 2), np.arange(1, D, 2)])
    cols = np.empty((H, 3 * D), dtype=np.int32)
    for hh in range(H):
        cols[hh, 0:D] = hh * D + perm
        cols[hh, D:2 * D] = C + hh * D + perm
        cols[hh, 2 * D:3 * D] = 2 * C + hh * D + np.arange(D)
    wqkv_g = jnp.take(wqkv_t, jnp.asarray(cols.reshape(-1)), axis=1)

    # bf16 operands for all matmuls (fp32 accumulation happens inside the kernel).
    wqkv_g = wqkv_g.astype(jnp.bfloat16)
    wo_b = wo_t.astype(jnp.bfloat16)
    w1_b = w1_t.astype(jnp.bfloat16)
    w2_b = w2_t.astype(jnp.bfloat16)

    return pl.pallas_call(
        _block_kernel,
        out_shape=jax.ShapeDtypeStruct((B, T, C), jnp.float32),
        grid=(B, H),
        in_specs=[
            pl.BlockSpec((1, T, C), lambda b, h: (b, 0, 0)),      # x (resident per b)
            pl.BlockSpec((C, 3 * D), lambda b, h: (0, h)),        # per-head qkv columns
            pl.BlockSpec((D, C), lambda b, h: (h, 0)),            # per-head o_proj rows
            pl.BlockSpec((C, 4 * C), lambda b, h: (0, 0)),        # w1 (resident)
            pl.BlockSpec((4 * C, C), lambda b, h: (0, 0)),        # w2 (resident)
            pl.BlockSpec((T, D), lambda b, h: (0, 0)),            # cos
            pl.BlockSpec((T, D), lambda b, h: (0, 0)),            # sin
        ],
        out_specs=pl.BlockSpec((1, T, C), lambda b, h: (b, 0, 0)),
        scratch_shapes=[pltpu.VMEM((T, C), jnp.float32),          # attn-out accumulator
                        pltpu.VMEM((T, C), jnp.float32)],         # cached rms(x)
        compiler_params=pltpu.CompilerParams(
            dimension_semantics=("parallel", "arbitrary"),
            # explicit budget: above the 16/32 MiB defaults, below v7x's 64 MiB physical
            vmem_limit_bytes=48 * 1024 * 1024),
    )(x, wqkv_g, wo_b, w1_b, w2_b, cos_p, sin_s)


def _reference(x, wqkv_t, wo_t, w1_t, w2_t, n_head):
    """Pure-JAX fp32 mirror of the PyTorch TransformerBlock forward (eval mode)."""
    B, T, C = x.shape
    D = C // n_head

    def rms(v):
        return v * lax.rsqrt(jnp.mean(v * v, axis=-1, keepdims=True) + EPS)

    xn = rms(x)
    qkv = (xn @ wqkv_t).reshape(B, T, 3, n_head, D)
    q, k, v = qkv[:, :, 0], qkv[:, :, 1], qkv[:, :, 2]
    q, k, v = (jnp.transpose(a, (0, 2, 1, 3)) for a in (q, k, v))   # (B, H, T, D)

    inv_freq = 1.0 / (10000.0 ** (jnp.arange(0, D, 2, dtype=jnp.float32) / D))
    freqs = jnp.arange(T, dtype=jnp.float32)[:, None] * inv_freq[None, :]
    sin = jnp.repeat(jnp.sin(freqs), 2, axis=-1)[None, None]
    cos = jnp.repeat(jnp.cos(freqs), 2, axis=-1)[None, None]

    def rot_half(u):
        x1, x2 = u[..., ::2], u[..., 1::2]
        return jnp.stack((-x2, x1), axis=-1).reshape(u.shape)

    q = q * cos + rot_half(q) * sin
    k = k * cos + rot_half(k) * sin
    q, k = rms(q), rms(k)

    s = jnp.einsum('bhqd,bhkd->bhqk', q, k) / math.sqrt(D)
    mask = jnp.tril(jnp.ones((T, T), dtype=bool))
    s = jnp.where(mask, s, -jnp.inf)
    prob = jax.nn.softmax(s, axis=-1)
    o = jnp.einsum('bhqk,bhkd->bhqd', prob, v)
    o = jnp.transpose(o, (0, 2, 1, 3)).reshape(B, T, C)
    x1 = x + o @ wo_t
    hdn = rms(x1) @ w1_t
    hdn = jnp.maximum(hdn, 0.0) ** 2
    return x1 + hdn @ w2_t


if __name__ == "__main__":
    # Small but tiling-friendly shapes: T = CONTEXT_LEN = 32, head_dim = 128.
    B, T, n_emb, n_head = 2, 32, 256, 2

    key = jax.random.PRNGKey(0)
    kx, k1, k2, k3, k4 = jax.random.split(key, 5)
    x = jax.random.normal(kx, (B, T, n_emb), dtype=jnp.float32)
    # Deterministic synthetic weights, transposed (in, out), matching nn.Linear(bias=False).
    wqkv_t = 0.02 * jax.random.normal(k1, (n_emb, 3 * n_emb), dtype=jnp.float32)
    wo_t = 0.02 * jax.random.normal(k2, (n_emb, n_emb), dtype=jnp.float32)
    w1_t = 0.02 * jax.random.normal(k3, (n_emb, 4 * n_emb), dtype=jnp.float32)
    w2_t = 0.02 * jax.random.normal(k4, (4 * n_emb, n_emb), dtype=jnp.float32)

    out = transformer_block(x, wqkv_t, wo_t, w1_t, w2_t, n_head)
    out = jax.block_until_ready(out)

    ref = _reference(x, wqkv_t, wo_t, w1_t, w2_t, n_head)
    assert out.shape == (B, T, n_emb)
    # Tolerance covers the intentional bf16-operand / fp32-accumulate matmuls
    # (the PyTorch flash-attn path itself runs attention in bf16).
    np.testing.assert_allclose(np.asarray(out), np.asarray(ref), rtol=2e-2, atol=2e-2)
    print("KERNEL_OK")
</pallas_src>

<mosaic_0001>
module attributes {stable_mosaic.version = 11 : i64} {
  func.func @_block_kernel(%arg0: i32, %arg1: i32, %arg2: memref<1x32x256xf32, #tpu.memory_space<vmem>>, %arg3: memref<256x384xbf16, #tpu.memory_space<vmem>>, %arg4: memref<128x256xbf16, #tpu.memory_space<vmem>>, %arg5: memref<256x1024xbf16, #tpu.memory_space<vmem>>, %arg6: memref<1024x256xbf16, #tpu.memory_space<vmem>>, %arg7: memref<32x128xf32, #tpu.memory_space<vmem>>, %arg8: memref<32x128xf32, #tpu.memory_space<vmem>>, %arg9: memref<1x32x256xf32, #tpu.memory_space<vmem>>, %arg10: memref<32x256xf32, #tpu.memory_space<vmem>>, %arg11: memref<32x256xf32, #tpu.memory_space<vmem>>) attributes {dimension_semantics = [#tpu.dimension_semantics<parallel>, #tpu.dimension_semantics<arbitrary>], iteration_bounds = array<i64: 2, 2>, scalar_prefetch = 0 : i64, scratch_operands = 2 : i64, tpu.core_type = #tpu.core_type<tc>, window_params = [{transform_indices = @transform_0, window_bounds = array<i64: 1, 32, 256>}, {transform_indices = @transform_1, window_bounds = array<i64: 256, 384>}, {transform_indices = @transform_2, window_bounds = array<i64: 128, 256>}, {pipeline_mode = #tpu.pipeline_mode<synchronous>, transform_indices = @transform_3, window_bounds = array<i64: 256, 1024>}, {pipeline_mode = #tpu.pipeline_mode<synchronous>, transform_indices = @transform_4, window_bounds = array<i64: 1024, 256>}, {pipeline_mode = #tpu.pipeline_mode<synchronous>, transform_indices = @transform_5, window_bounds = array<i64: 32, 128>}, {pipeline_mode = #tpu.pipeline_mode<synchronous>, transform_indices = @transform_6, window_bounds = array<i64: 32, 128>}, {transform_indices = @transform_7, window_bounds = array<i64: 1, 32, 256>}]} {
    %c0_i32 = arith.constant 0 : i32
    %0 = arith.cmpi eq, %arg1, %c0_i32 : i32
    %1 = arith.extui %0 : i1 to i32
    %c0_i32_0 = arith.constant 0 : i32
    %2 = arith.cmpi ne, %1, %c0_i32_0 : i32
    scf.if %2 {
      %cst_28 = arith.constant 0.000000e+00 : f32
      %75 = vector.broadcast %cst_28 : f32 to vector<32x256xf32>
      %c0_29 = arith.constant 0 : index
      %c0_30 = arith.constant 0 : index
      %76 = vector.load %arg10[%c0_29, %c0_30] : memref<32x256xf32, #tpu.memory_space<vmem>>, vector<32x256xf32>
      tpu.vector_store %arg10[%c0_29, %c0_30], %75 {strides = array<i32>} : memref<32x256xf32, #tpu.memory_space<vmem>>, vector<32x256xf32>,
      %c0_31 = arith.constant 0 : index
      %c0_32 = arith.constant 0 : index
      %c0_33 = arith.constant 0 : index
      %77 = vector.load %arg2[%c0_31, %c0_32, %c0_33] : memref<1x32x256xf32, #tpu.memory_space<vmem>>, vector<1x32x256xf32>
      %78 = vector.shape_cast %77 : vector<1x32x256xf32> to vector<32x256xf32>
      %79 = arith.mulf %78, %78 : vector<32x256xf32>
      %cst_34 = arith.constant dense<0.000000e+00> : vector<32xf32>
      %80 = vector.multi_reduction <add>, %79, %cst_34 [1] : vector<32x256xf32> to vector<32xf32>
      %81 = vector.shape_cast %80 : vector<32xf32> to vector<32x1xf32>
      %cst_35 = arith.constant 2.560000e+02 : f32
      %82 = vector.broadcast %cst_35 : f32 to vector<32x1xf32>
      %83 = arith.divf %81, %82 : vector<32x1xf32>
      %cst_36 = arith.constant 1.1920929E-7 : f32
      %84 = vector.broadcast %cst_36 : f32 to vector<32x1xf32>
      %85 = arith.addf %83, %84 : vector<32x1xf32>
      %86 = math.rsqrt %85 : vector<32x1xf32>
      %87 = vector.broadcast %86 : vector<32x1xf32> to vector<32x256xf32>
      %88 = arith.mulf %78, %87 : vector<32x256xf32>
      %c0_37 = arith.constant 0 : index
      %c0_38 = arith.constant 0 : index
      %89 = vector.load %arg11[%c0_37, %c0_38] : memref<32x256xf32, #tpu.memory_space<vmem>>, vector<32x256xf32>
      tpu.vector_store %arg11[%c0_37, %c0_38], %88 {strides = array<i32>} : memref<32x256xf32, #tpu.memory_space<vmem>>, vector<32x256xf32>,
    } else {
    }
    %c0 = arith.constant 0 : index
    %c0_1 = arith.constant 0 : index
    %3 = vector.load %arg11[%c0, %c0_1] : memref<32x256xf32, #tpu.memory_space<vmem>>, vector<32x256xf32>
    %4 = arith.truncf %3 : vector<32x256xf32> to vector<32x256xbf16>
    %c0_2 = arith.constant 0 : index
    %c0_3 = arith.constant 0 : index
    %5 = vector.load %arg3[%c0_2, %c0_3] : memref<256x384xbf16, #tpu.memory_space<vmem>>, vector<256x384xbf16>
    %cst = arith.constant dense<0.000000e+00> : vector<32x384xf32>
    %6 = tpu.matmul %4, %5, %cst {dimension_numbers = #tpu.dot_dimension_numbers<[1], [0], [0], [1], [0, 0, 1, 1], [], []>} : vector<32x256xbf16>, vector<256x384xbf16>, vector<32x384xf32> -> vector<32x384xf32>
    %7 = vector.extract_strided_slice %6 {offsets = [0, 0], sizes = [32, 128], strides = [1, 1]} : vector<32x384xf32> to vector<32x128xf32>
    %8 = vector.extract_strided_slice %6 {offsets = [0, 128], sizes = [32, 128], strides = [1, 1]} : vector<32x384xf32> to vector<32x128xf32>
    %9 = vector.extract_strided_slice %6 {offsets = [0, 256], sizes = [32, 128], strides = [1, 1]} : vector<32x384xf32> to vector<32x128xf32>
    %c0_4 = arith.constant 0 : index
    %c0_5 = arith.constant 0 : index
    %10 = vector.load %arg7[%c0_4, %c0_5] : memref<32x128xf32, #tpu.memory_space<vmem>>, vector<32x128xf32>
    %c0_6 = arith.constant 0 : index
    %c0_7 = arith.constant 0 : index
    %11 = vector.load %arg8[%c0_6, %c0_7] : memref<32x128xf32, #tpu.memory_space<vmem>>, vector<32x128xf32>
    %12 = arith.mulf %7, %10 : vector<32x128xf32>
    %13 = vector.extract_strided_slice %7 {offsets = [0, 64], sizes = [32, 64], strides = [1, 1]} : vector<32x128xf32> to vector<32x64xf32>
    %14 = vector.extract_strided_slice %7 {offsets = [0, 0], sizes = [32, 64], strides = [1, 1]} : vector<32x128xf32> to vector<32x64xf32>
    %15 = tpu.concatenate %13, %14 in 1 : vector<32x64xf32>, vector<32x64xf32> -> vector<32x128xf32>
    %16 = arith.mulf %15, %11 : vector<32x128xf32>
    %17 = arith.addf %12, %16 : vector<32x128xf32>
    %18 = arith.mulf %17, %17 : vector<32x128xf32>
    %cst_8 = arith.constant dense<0.000000e+00> : vector<32xf32>
    %19 = vector.multi_reduction <add>, %18, %cst_8 [1] : vector<32x128xf32> to vector<32xf32>
    %20 = vector.shape_cast %19 : vector<32xf32> to vector<32x1xf32>
    %cst_9 = arith.constant 1.280000e+02 : f32
    %21 = vector.broadcast %cst_9 : f32 to vector<32x1xf32>
    %22 = arith.divf %20, %21 : vector<32x1xf32>
    %cst_10 = arith.constant 1.1920929E-7 : f32
    %23 = vector.broadcast %cst_10 : f32 to vector<32x1xf32>
    %24 = arith.addf %22, %23 : vector<32x1xf32>
    %25 = math.rsqrt %24 : vector<32x1xf32>
    %26 = vector.broadcast %25 : vector<32x1xf32> to vector<32x128xf32>
    %27 = arith.mulf %17, %26 : vector<32x128xf32>
    %28 = arith.mulf %8, %10 : vector<32x128xf32>
    %29 = vector.extract_strided_slice %8 {offsets = [0, 64], sizes = [32, 64], strides = [1, 1]} : vector<32x128xf32> to vector<32x64xf32>
    %30 = vector.extract_strided_slice %8 {offsets = [0, 0], sizes = [32, 64], strides = [1, 1]} : vector<32x128xf32> to vector<32x64xf32>
    %31 = tpu.concatenate %29, %30 in 1 : vector<32x64xf32>, vector<32x64xf32> -> vector<32x128xf32>
    %32 = arith.mulf %31, %11 : vector<32x128xf32>
    %33 = arith.addf %28, %32 : vector<32x128xf32>
    %34 = arith.mulf %33, %33 : vector<32x128xf32>
    %cst_11 = arith.constant dense<0.000000e+00> : vector<32xf32>
    %35 = vector.multi_reduction <add>, %34, %cst_11 [1] : vector<32x128xf32> to vector<32xf32>
    %36 = vector.shape_cast %35 : vector<32xf32> to vector<32x1xf32>
    %cst_12 = arith.constant 1.280000e+02 : f32
    %37 = vector.broadcast %cst_12 : f32 to vector<32x1xf32>
    %38 = arith.divf %36, %37 : vector<32x1xf32>
    %cst_13 = arith.constant 1.1920929E-7 : f32
    %39 = vector.broadcast %cst_13 : f32 to vector<32x1xf32>
    %40 = arith.addf %38, %39 : vector<32x1xf32>
    %41 = math.rsqrt %40 : vector<32x1xf32>
    %42 = vector.broadcast %41 : vector<32x1xf32> to vector<32x128xf32>
    %43 = arith.mulf %33, %42 : vector<32x128xf32>
    %44 = arith.truncf %27 : vector<32x128xf32> to vector<32x128xbf16>
    %45 = arith.truncf %43 : vector<32x128xf32> to vector<32x128xbf16>
    %cst_14 = arith.constant dense<0.000000e+00> : vector<32x32xf32>
    %46 = tpu.matmul %44, %45, %cst_14 {dimension_numbers = #tpu.dot_dimension_numbers<[1], [1], [0], [0], [0, 0, 1, 0], [], []>} : vector<32x128xbf16>, vector<32x128xbf16>, vector<32x32xf32> -> vector<32x32xf32>
    %cst_15 = arith.constant 0.0883883461 : f32
    %47 = vector.broadcast %cst_15 : f32 to vector<32x32xf32>
    %48 = arith.mulf %46, %47 : vector<32x32xf32>
    %49 = tpu.iota {dimensions = array<i32: 0>} : vector<32x32xi32>
    %50 = tpu.iota {dimensions = array<i32: 1>} : vector<32x32xi32>
    %51 = arith.cmpi sle, %50, %49 : vector<32x32xi32>
    %cst_16 = arith.constant -1.000000e+30 : f32
    %52 = vector.broadcast %cst_16 : f32 to vector<32x32xf32>
    %53 = arith.select %51, %48, %52 : vector<32x32xi1>, vector<32x32xf32>
    %cst_17 = arith.constant dense<0xFF800000> : vector<32xf32>
    %54 = vector.multi_reduction <maximumf>, %53, %cst_17 [1] : vector<32x32xf32> to vector<32xf32>
    %55 = vector.shape_cast %54 : vector<32xf32> to vector<32x1xf32>
    %56 = vector.broadcast %55 : vector<32x1xf32> to vector<32x32xf32>
    %57 = arith.subf %53, %56 : vector<32x32xf32>
    %58 = math.exp %57 : vector<32x32xf32>
    %cst_18 = arith.constant dense<0.000000e+00> : vector<32xf32>
    %59 = vector.multi_reduction <add>, %58, %cst_18 [1] : vector<32x32xf32> to vector<32xf32>
    %60 = vector.shape_cast %59 : vector<32xf32> to vector<32x1xf32>
    %61 = arith.truncf %58 : vector<32x32xf32> to vector<32x32xbf16>
    %62 = arith.truncf %9 : vector<32x128xf32> to vector<32x128xbf16>
    %cst_19 = arith.constant dense<0.000000e+00> : vector<32x128xf32>
    %63 = tpu.matmul %61, %62, %cst_19 {dimension_numbers = #tpu.dot_dimension_numbers<[1], [0], [0], [1], [0, 0, 1, 1], [], []>} : vector<32x32xbf16>, vector<32x128xbf16>, vector<32x128xf32> -> vector<32x128xf32>
    %64 = vector.broadcast %60 : vector<32x1xf32> to vector<32x128xf32>
    %65 = arith.divf %63, %64 : vector<32x128xf32>
    %c0_20 = arith.constant 0 : index
    %c0_21 = arith.constant 0 : index
    %66 = vector.load %arg10[%c0_20, %c0_21] : memref<32x256xf32, #tpu.memory_space<vmem>>, vector<32x256xf32>
    %67 = arith.truncf %65 : vector<32x128xf32> to vector<32x128xbf16>
    %c0_22 = arith.constant 0 : index
    %c0_23 = arith.constant 0 : index
    %68 = vector.load %arg4[%c0_22, %c0_23] : memref<128x256xbf16, #tpu.memory_space<vmem>>, vector<128x256xbf16>
    %cst_24 = arith.constant dense<0.000000e+00> : vector<32x256xf32>
    %69 = tpu.matmul %67, %68, %cst_24 {dimension_numbers = #tpu.dot_dimension_numbers<[1], [0], [0], [1], [0, 0, 1, 1], [], []>} : vector<32x128xbf16>, vector<128x256xbf16>, vector<32x256xf32> -> vector<32x256xf32>
    %70 = arith.addf %66, %69 : vector<32x256xf32>
    %c0_25 = arith.constant 0 : index
    %c0_26 = arith.constant 0 : index
    %71 = vector.load %arg10[%c0_25, %c0_26] : memref<32x256xf32, #tpu.memory_space<vmem>>, vector<32x256xf32>
    tpu.vector_store %arg10[%c0_25, %c0_26], %70 {strides = array<i32>} : memref<32x256xf32, #tpu.memory_space<vmem>>, vector<32x256xf32>,
    %c1_i32 = arith.constant 1 : i32
    %72 = arith.cmpi eq, %arg1, %c1_i32 : i32
    %73 = arith.extui %72 : i1 to i32
    %c0_i32_27 = arith.constant 0 : i32
    %74 = arith.cmpi ne, %73, %c0_i32_27 : i32
    scf.if %74 {
      %c0_28 = arith.constant 0 : index
      %c0_29 = arith.constant 0 : index
      %c0_30 = arith.constant 0 : index
      %75 = vector.load %arg2[%c0_28, %c0_29, %c0_30] : memref<1x32x256xf32, #tpu.memory_space<vmem>>, vector<1x32x256xf32>
      %76 = vector.shape_cast %75 : vector<1x32x256xf32> to vector<32x256xf32>
      %c0_31 = arith.constant 0 : index
      %c0_32 = arith.constant 0 : index
      %77 = vector.load %arg10[%c0_31, %c0_32] : memref<32x256xf32, #tpu.memory_space<vmem>>, vector<32x256xf32>
      %78 = arith.addf %76, %77 : vector<32x256xf32>
      %79 = arith.mulf %78, %78 : vector<32x256xf32>
      %cst_33 = arith.constant dense<0.000000e+00> : vector<32xf32>
      %80 = vector.multi_reduction <add>, %79, %cst_33 [1] : vector<32x256xf32> to vector<32xf32>
      %81 = vector.shape_cast %80 : vector<32xf32> to vector<32x1xf32>
      %cst_34 = arith.constant 2.560000e+02 : f32
      %82 = vector.broadcast %cst_34 : f32 to vector<32x1xf32>
      %83 = arith.divf %81, %82 : vector<32x1xf32>
      %cst_35 = arith.constant 1.1920929E-7 : f32
      %84 = vector.broadcast %cst_35 : f32 to vector<32x1xf32>
      %85 = arith.addf %83, %84 : vector<32x1xf32>
      %86 = math.rsqrt %85 : vector<32x1xf32>
      %87 = vector.broadcast %86 : vector<32x1xf32> to vector<32x256xf32>
      %88 = arith.mulf %78, %87 : vector<32x256xf32>
      %89 = arith.truncf %88 : vector<32x256xf32> to vector<32x256xbf16>
      %c0_36 = arith.constant 0 : index
      %c0_37 = arith.constant 0 : index
      %90 = vector.load %arg5[%c0_36, %c0_37] : memref<256x1024xbf16, #tpu.memory_space<vmem>>, vector<256x1024xbf16>
      %cst_38 = arith.constant dense<0.000000e+00> : vector<32x1024xf32>
      %91 = tpu.matmul %89, %90, %cst_38 {dimension_numbers = #tpu.dot_dimension_numbers<[1], [0], [0], [1], [0, 0, 1, 1], [], []>} : vector<32x256xbf16>, vector<256x1024xbf16>, vector<32x1024xf32> -> vector<32x1024xf32>
      %cst_39 = arith.constant 0.000000e+00 : f32
      %92 = vector.broadcast %cst_39 : f32 to vector<32x1024xf32>
      %93 = arith.maximumf %91, %92 : vector<32x1024xf32>
      %94 = arith.mulf %93, %93 : vector<32x1024xf32>
      %95 = arith.truncf %94 : vector<32x1024xf32> to vector<32x1024xbf16>
      %c0_40 = arith.constant 0 : index
      %c0_41 = arith.constant 0 : index
      %96 = vector.load %arg6[%c0_40, %c0_41] : memref<1024x256xbf16, #tpu.memory_space<vmem>>, vector<1024x256xbf16>
      %cst_42 = arith.constant dense<0.000000e+00> : vector<32x256xf32>
      %97 = tpu.matmul %95, %96, %cst_42 {dimension_numbers = #tpu.dot_dimension_numbers<[1], [0], [0], [1], [0, 0, 1, 1], [], []>} : vector<32x1024xbf16>, vector<1024x256xbf16>, vector<32x256xf32> -> vector<32x256xf32>
      %98 = arith.addf %78, %97 : vector<32x256xf32>
      %c0_43 = arith.constant 0 : index
      %c0_44 = arith.constant 0 : index
      %c0_45 = arith.constant 0 : index
      %99 = vector.load %arg9[%c0_43, %c0_44, %c0_45] : memref<1x32x256xf32, #tpu.memory_space<vmem>>, vector<1x32x256xf32>
      %100 = vector.shape_cast %99 : vector<1x32x256xf32> to vector<32x256xf32>
      %101 = vector.shape_cast %98 : vector<32x256xf32> to vector<1x32x256xf32>
      tpu.vector_store %arg9[%c0_43, %c0_44, %c0_45], %101 {strides = array<i32>} : memref<1x32x256xf32, #tpu.memory_space<vmem>>, vector<1x32x256xf32>,
    } else {
    }
    return
  }
  func.func @transform_0(%arg0: i32, %arg1: i32) -> (i32, i32, i32) {
    %c0_i32 = arith.constant 0 : i32
    %c0_i32_0 = arith.constant 0 : i32
    %c0_i32_1 = arith.constant 0 : i32
    return %arg0, %c0_i32, %c0_i32_0 : i32, i32, i32
  }
  func.func @transform_1(%arg0: i32, %arg1: i32) -> (i32, i32) {
    %c0_i32 = arith.constant 0 : i32
    %c0_i32_0 = arith.constant 0 : i32
    return %c0_i32, %arg1 : i32, i32
  }
  func.func @transform_2(%arg0: i32, %arg1: i32) -> (i32, i32) {
    %c0_i32 = arith.constant 0 : i32
    %c0_i32_0 = arith.constant 0 : i32
    return %arg1, %c0_i32 : i32, i32
  }
  func.func @transform_3(%arg0: i32, %arg1: i32) -> (i32, i32) {
    %c0_i32 = arith.constant 0 : i32
    %c0_i32_0 = arith.constant 0 : i32
    %c0_i32_1 = arith.constant 0 : i32
    return %c0_i32, %c0_i32_0 : i32, i32
  }
  func.func @transform_4(%arg0: i32, %arg1: i32) -> (i32, i32) {
    %c0_i32 = arith.constant 0 : i32
    %c0_i32_0 = arith.constant 0 : i32
    %c0_i32_1 = arith.constant 0 : i32
    return %c0_i32, %c0_i32_0 : i32, i32
  }
  func.func @transform_5(%arg0: i32, %arg1: i32) -> (i32, i32) {
    %c0_i32 = arith.constant 0 : i32
    %c0_i32_0 = arith.constant 0 : i32
    %c0_i32_1 = arith.constant 0 : i32
    return %c0_i32, %c0_i32_0 : i32, i32
  }
  func.func @transform_6(%arg0: i32, %arg1: i32) -> (i32, i32) {
    %c0_i32 = arith.constant 0 : i32
    %c0_i32_0 = arith.constant 0 : i32
    %c0_i32_1 = arith.constant 0 : i32
    return %c0_i32, %c0_i32_0 : i32, i32
  }
  func.func @transform_7(%arg0: i32, %arg1: i32) -> (i32, i32, i32) {
    %c0_i32 = arith.constant 0 : i32
    %c0_i32_0 = arith.constant 0 : i32
    %c0_i32_1 = arith.constant 0 : i32
    return %arg0, %c0_i32, %c0_i32_0 : i32, i32, i32
  }
}

</mosaic_0001>

<bundles_post_ra>
// kernel: tpu_custom_call.1
= control target key start
LH: loop header
LB: loop body
LE: loop exit
PB: predicated region body
PF: predicated region fallthrough
CT: control target
= control target key end

     0   :  { %s5764_s0 = inlined_call_operand.hbm [shape: f32[2,32,256], index: 0, kind: input, shape index: {}]   ;;  %s5765_s1 = inlined_call_operand.hbm [shape: bf16[256,768], index: 1, kind: input, shape index: {}]   ;;  %s5766_s2 = inlined_call_operand.hbm [shape: bf16[256,256], index: 2, kind: input, shape index: {}]   ;;  %s5767_s3 = inlined_call_operand.hbm [shape: bf16[256,1024], index: 3, kind: input, shape index: {}]   ;;  %s5768_s4 = inlined_call_operand.hbm [shape: bf16[1024,256], index: 4, kind: input, shape index: {}]   ;;  %s5769_s5 = inlined_call_operand.hbm [shape: f32[32,128], index: 5, kind: input, shape index: {}]   ;;  %s5770_s6 = inlined_call_operand.hbm [shape: f32[32,128], index: 6, kind: input, shape index: {}]   ;;  %s5771_s7 = inlined_call_operand.hbm [shape: f32[2,32,256], index: 7, kind: output, shape index: {}]  }
   0x1   :  { %5796 = sst [smem:[#allocation30_spill]] %s5764_s0 }
   0x2   :  { %5797 = sst [smem:[#allocation31_spill]] %s5765_s1 }
   0x3   :  { %5798 = sst [smem:[#allocation32_spill]] %s5766_s2 }
   0x4   :  { %5799 = sst [smem:[#allocation33_spill]] %s5767_s3 }
   0x5   :  { %5800 = sst [smem:[#allocation34_spill]] %s5768_s4 }
   0x6   :  { %5801 = sst [smem:[#allocation35_spill]] %s5769_s5 }
   0x7   :  { %5802 = sst [smem:[#allocation36_spill]] %s5770_s6 }
   0x8   :  { %5803 = sst [smem:[#allocation37_spill]] %s5771_s7 }
   0x9   :  { %12 = vsyncpa [#allocation5], 0 }
   0xa   :  { %14 = vsyncpa [#allocation5 + $0x1], 0 }
   0xb   :  { %15 = vsyncpa [#allocation8], 0 }
   0xc   :  { %17 = vsyncpa [#allocation8 + $0x1], 0 }
   0xd   :  { %18 = vsyncpa [#allocation11], 0 }
   0xe   :  { %19 = vsyncpa [#allocation14], 0 }
   0xf   :  { %20 = vsyncpa [#allocation6], 0 }
  0x10   :  { %22 = vsyncpa [#allocation6 + $0x1], 0  ;;  %s5062_s24 = smov 0   ;;  %s5064_s25 = smov 0  }
  0x11   :  { %s5066_s26 = smov 0   ;;  %s5068_s27 = smov 0  }
  0x12   :  { %s5070_s28 = smov 0   ;;  %s5072_s29 = smov 0  }
  0x13   :  { %s5074_s30 = smov 0   ;;  %s5076_s8 = smov 0  }
  0x14   :  { %s5078_s9 = smov 0   ;;  %s5080_s10 = smov 0  }
  0x15   :  { %s5082_s11 = smov 0  }
  0x16 LB: > { %5804 = sst [smem:[#allocation22_spill]] %s4962_s25  ;;  %s5116_s12 = sadd.s32 4294967295, %s4998_s11   ;;  %s4998_s11 = sphi %s5082_s11, %s28_s11   ;;  %s4994_s10 = sphi %s5080_s10, %s5869_s10   ;;  %s4990_s9 = sphi %s5078_s9, %s5868_s9   ;;  %s4986_s8 = sphi %s5076_s8, %s5867_s8   ;;  %s4982_s30 = sphi %s5074_s30, %s5866_s30   ;;  %s4978_s29 = sphi %s5072_s29, %s5865_s29   ;;  %s4974_s28 = sphi %s5070_s28, %s5864_s28   ;;  %s4970_s27 = sphi %s5068_s27, %s5863_s27   ;;  %s4966_s26 = sphi %s5066_s26, %s5862_s26   ;;  %s4962_s25 = sphi %s5064_s25, %s5861_s25   ;;  %s4958_s24 = sphi %s5062_s24, %s5857_s24  }
  0x17   : > { %5805 = sst [smem:[#allocation23_spill]] %s4982_s30  ;;  %p86_p0 = scmp.ne.s32.totalorder %s4962_s25, %s4958_s24 }
  0x18   : > { %5806 = sst [smem:[#allocation24_spill]] %s4986_s8  ;;  %p5773_p1 = scmp.eq.s32.totalorder %s5116_s12, 0 }
  0x19   : > { %p3733_p3 = scmp.ge.s32.totalorder %s4998_s11, 1  ;;  %p233_p4 = scmp.lt.s32.totalorder %s4998_s11, 5 }
  0x1a   : > { %p5125_p5 = por %p86_p0, %p5773_p1  ;;  %s5000_s15 = smov [#allocation10]  }
  0x1b   : > { %p5129_p6 = pnand %p3733_p3, %p233_p4  ;;  %s245_s16 = sshll.u32 %s5000_s15, 4  ;;  %s246_s16 = int_to_ptr.vmem [resolvable:$true] %s245_s16 }
  0x1c   : > { %s5807_s13 = scalar_select %p5125_p5, 1, 0 }
  0x1d   : > { %s5809_s14 = scalar_select %p5129_p6, 1, 0 }
  0x1e   : > { %5808 = sst [smem:[#allocation25_spill]] %s5807_s13  ;;  %p4191_p7 = pneg %p5129_p6 }
  0x1f   : > { %5810 = sst [smem:[#allocation26_spill]] %s5809_s14  ;;  %s5001_s18 = smov [#allocation13]  }
  0x20   : > { %p5137_p8 = pnand %p4191_p7, %p5773_p1  ;;  %s271_s19 = sshll.u32 %s5001_s18, 4  ;;  %s272_s19 = int_to_ptr.vmem [resolvable:$true] %s271_s19 }
  0x21   : > { %s5812_s3 = sld [smem:[#allocation33_spill]] }
  0x22   : > { %s5811_s17 = scalar_select %p5137_p8, 1, 0 }
  0x23   : > { %p5149_p10 = pneg %p5137_p8 }
  0x27   : > { %s4662_s22 = scalar_lea.hbm %s5812_s3, 16384 }
  0x28   : > { %p4663_p9 = scmp.ne.s32.totalorder %s5812_s3, %s4662_s22  ;;  %p4669_p13 = scmp.lt.u32.totalorder %s4662_s22, %s5812_s3 }
  0x2a   : > { %p4665_p11 = pnand %p5149_p10, %p4663_p9 }
  0x2c   : > { %p4666_p12 = pneg %p4665_p11 }
  0x2e   : > { %p4671_p0 = pnand %p4669_p13, %p4666_p12 }
  0x30   : > { %4674 = shalt.err (!%p4671_p0)
}
  0x31   : > { %s4675_s18 = scalar_lea.vmem %s246_s16, 16384  ;;  %p4683_p1 = scmp.lt.s32.totalorder %s246_s16, %s246_s16 }
  0x32   : > { %p4676_p3 = scmp.ne.s32.totalorder %s246_s16, %s4675_s18  ;;  %p4684_p2 = scmp.lt.s32.totalorder %s4675_s18, %s4675_s18 }
  0x34   : > { %p4678_p4 = pnand %p4676_p3, %p5149_p10  ;;  %p4685_p5 = por %p4684_p2, %p4683_p1 }
  0x36   : > { %p4679_p7 = pneg %p4678_p4 }
  0x38   : > { %p4686_p6 = pnand %p4685_p5, %p4679_p7 }
  0x3a   : > { %4689 = shalt.err (!%p4686_p6)
}
  0x3b   : > { %s5002_s20 = smov 512   ;;  %s5003_s21 = smov 32  }
  0x3c   : > { %4194 = dma.hbm_to_vmem [thread:$0]  (!%p5137_p8), %s5812_s3, 16384, %s246_s16, [#allocation11], %s5002_s20, %s5002_s20, %s5003_s21  }
  0x3d   : > { %s5814_s5 = sld [smem:[#allocation35_spill]] }
  0x43   : > { %s4690_s24 = scalar_lea.hbm %s5814_s5, 512 }
  0x44   : > { %p4691_p1 = scmp.ne.s32.totalorder %s5814_s5, %s4690_s24  ;;  %p4697_p6 = scmp.lt.u32.totalorder %s4690_s24, %s5814_s5 }
  0x46   : > { %p4693_p2 = pnand %p4691_p1, %p5149_p10 }
  0x48   : > { %p4694_p5 = pneg %p4693_p2 }
  0x4a   : > { %p4699_p9 = pnand %p4697_p6, %p4694_p5 }
  0x4c   : > { %4702 = shalt.err (!%p4699_p9)
}
  0x4d   : > { %s4703_s7 = scalar_lea.vmem %s272_s19, 512  ;;  %p4711_p0 = scmp.lt.s32.totalorder %s272_s19, %s272_s19 }
  0x4e   : > { %p4704_p11 = scmp.ne.s32.totalorder %s272_s19, %s4703_s7  ;;  %p4712_p3 = scmp.lt.s32.totalorder %s4703_s7, %s4703_s7 }
  0x50   : > { %p4706_p12 = pnand %p4704_p11, %p5149_p10  ;;  %p4713_p4 = por %p4712_p3, %p4711_p0 }
  0x52   : > { %p4707_p13 = pneg %p4706_p12 }
  0x54   : > { %p4714_p7 = pnand %p4713_p4, %p4707_p13 }
  0x56   : > { %4717 = shalt.err (!%p4714_p7)
}
  0x57   : > { %s5779_s30 = smov 128   ;;  %s5781_s13 = smov 8  }
  0x58   : > { %4200 = dma.hbm_to_vmem [thread:$0]  (!%p5137_p8), %s5814_s5, 512, %s272_s19, [#allocation14], %s5779_s30, %s5779_s30, %s5781_s13  }
  0x59   : > { %p5786_p1 = scmp.eq.s32.totalorder %s4998_s11, 0  ;;  %s37_s20 = sadd.s32 1, %s4990_s9 }
  0x5a   : > { %s73_s21 = sadd.s32 1, %s4966_s26  ;;  %p5189_p2 = scmp.ge.s32.totalorder %s37_s20, 2 }
  0x5b   : > { %p80_p5 = scmp.ne.s32.totalorder %s4966_s26, %s4962_s25  ;;  %p5785_p6 = scmp.lt.s32.totalorder %s4998_s11, 4 }
  0x5c   : > { %s5815_s8 = scalar_select %p5189_p2, 1, 0 }
  0x5d   : > { %s319_s22 = sand.u32 1, %s4998_s11   ;;  %s5871_s20 = smov (%p5189_p2, %s37_s20), 0 }
  0x5e   : > { %5816 = sst [smem:[#allocation27_spill]] %s5871_s20  ;;  %p82_p9 = por %p80_p5, %p5786_p1 }
  0x5f   : > { %s70_s23 = ssub.s32 %s4990_s9, %s5871_s20  ;;  %s5783_s19 = sand.u32 1, %s4966_s26  }
  0x60   : > { %p71_p11 = scmp.eq.s32.totalorder %s70_s23, 0  ;;  %s4165_s24 = smul.u32 384, %s5783_s19 }
  0x61   : > { %s4085_s18 = smul.u32 192, %s4990_s9  ;;  %p5211_p12 = pnand %p5785_p6, %p82_p9 }
  0x62   : > { %s5216_s14 = scalar_select %p71_p11, %s4966_s26, %s73_s21  }
  0x63   : > { %s5819_s1 = sld [smem:[#allocation31_spill]]  ;;  %s323_s23 = scalar_lea.vmem [#allocation7], %s4165_s24 }
  0x64   : > { %5818 = sst [smem:[#allocation28_spill]] %s5216_s14  ;;  %s330_s19 = sshll.u32 %s323_s23, 4  ;;  %s5223_s19 = int_to_ptr.vmem [resolvable:$true] %s330_s19 }
  0x65   : > { %s5225_s3 = scalar_lea.sflag [#allocation8], %s319_s22  ;;  %p5792_p0 = pneg %p5211_p12 }
  0x69   : > { %s5221_s13 = scalar_lea.hbm %s5819_s1, %s4085_s18  ;;  %s4723_s18 = scalar_lea.hbm %s5819_s1, 12288 }
  0x6a   : > { %s4718_s5 = scalar_lea.hbm %s5221_s13, 6144  ;;  %p4724_p7 = scmp.lt.u32.totalorder %s5221_s13, %s5819_s1 }
  0x6b   : > { %p4719_p13 = scmp.ne.s32.totalorder %s5221_s13, %s4718_s5  ;;  %p4725_p5 = scmp.lt.u32.totalorder %s4723_s18, %s4718_s5 }
  0x6c   : > { %p4727_p11 = scmp.lt.u32.totalorder %s4718_s5, %s5221_s13 }
  0x6d   : > { %p4721_p3 = pnand %p5792_p0, %p4719_p13  ;;  %p4726_p9 = por %p4725_p5, %p4724_p7 }
  0x6f   : > { %p4722_p4 = pneg %p4721_p3  ;;  %p4728_p6 = por %p4727_p11, %p4726_p9 }
  0x71   : > { %p4729_p1 = pnand %p4728_p6, %p4722_p4 }
  0x73   : > { %4732 = shalt.err (!%p4729_p1)
}
  0x74   : > { %s4733_s22 = scalar_lea.vmem %s5223_s19, 6144  ;;  %s5006_s24 = smov [#allocation7]  }
  0x75   : > { %p4734_p13 = scmp.ne.s32.totalorder %s5223_s19, %s4733_s22  ;;  %s4738_s23 = sshll.u32 %s5006_s24, 4  ;;  %s4739_s23 = int_to_ptr.vmem [resolvable:$false] %s4738_s23 }
  0x76   : > { %s4740_s20 = scalar_lea.vmem %s4739_s23, 12288  ;;  %p4741_p8 = scmp.lt.s32.totalorder %s5223_s19, %s4739_s23 }
  0x77   : > { %p4736_p3 = pnand %p4734_p13, %p5792_p0  ;;  %p4742_p7 = scmp.lt.s32.totalorder %s4740_s20, %s4733_s22 }
  0x79   : > { %p4737_p2 = pneg %p4736_p3  ;;  %p4743_p5 = por %p4742_p7, %p4741_p8 }
  0x7b   : > { %p4744_p9 = pnand %p4743_p5, %p4737_p2 }
  0x7d   : > { %4747 = shalt.err (!%p4744_p9)
}
  0x7e   : > { %s5007_s5 = smov 384   ;;  %s5008_s30 = smov 192  }
  0x7f   : > { %s5009_s21 = smov 12   ;;  %s5010_s18 = smov [#allocation12]  }
  0x80   : > { %4210 = dma.hbm_to_vmem [thread:$0]  (!%p5211_p12), %s5221_s13, 6144, %s5223_s19, %s5225_s3, %s5007_s5, %s5008_s30, %s5009_s21  }
  0x81   : > { %s258_s16 = sshll.u32 %s5010_s18, 4  ;;  %s5011_s24 = smov [#allocation15]   ;;  %s259_s16 = int_to_ptr.vmem [resolvable:$true] %s258_s16 }
  0x82   : > { %s284_s1 = sshll.u32 %s5011_s24, 4  ;;  %s5820_s4 = sld [smem:[#allocation34_spill]]  ;;  %s5253_s1 = int_to_ptr.vmem [resolvable:$true] %s284_s1 }
  0x88   : > { %s4748_s20 = scalar_lea.hbm %s5820_s4, 16384 }
  0x89   : > { %p4749_p8 = scmp.ne.s32.totalorder %s5820_s4, %s4748_s20  ;;  %p4755_p6 = scmp.lt.u32.totalorder %s4748_s20, %s5820_s4 }
  0x8b   : > { %p4751_p1 = pnand %p4749_p8, %p5149_p10 }
  0x8d   : > { %p4752_p2 = pneg %p4751_p1 }
  0x8f   : > { %p4757_p4 = pnand %p4755_p6, %p4752_p2 }
  0x91   : > { %4760 = shalt.err (!%p4757_p4)
}
  0x92   : > { %s4761_s19 = scalar_lea.vmem %s259_s16, 16384  ;;  %p4769_p7 = scmp.lt.s32.totalorder %s259_s16, %s259_s16 }
  0x93   : > { %p4762_p11 = scmp.ne.s32.totalorder %s259_s16, %s4761_s19  ;;  %p4770_p5 = scmp.lt.s32.totalorder %s4761_s19, %s4761_s19 }
  0x95   : > { %p4764_p13 = pnand %p4762_p11, %p5149_p10  ;;  %p4771_p9 = por %p4770_p5, %p4769_p7 }
  0x97   : > { %p4765_p3 = pneg %p4764_p13 }
  0x99   : > { %p4772_p0 = pnand %p4771_p9, %p4765_p3 }
  0x9b   : > { %4775 = shalt.err (!%p4772_p0)
}
  0x9c   : > { %p5821_p8 = scmp.ne.s32.totalorder %s5811_s17, 0  ;;  %s5822_s25 = smov 8  }
  0x9d   : > { %s5823_s14 = smov 128   ;;  %s5824_s6 = sld [smem:[#allocation36_spill]] }
  0x9e   : > { %4197 = dma.hbm_to_vmem [thread:$0]  (!%p5821_p8), %s5820_s4, 16384, %s259_s16, [#allocation11], %s5823_s14, %s5823_s14, %s5822_s25  }
  0xa3   : > { %s4776_s18 = scalar_lea.hbm %s5824_s6, 512 }
  0xa4   : > { %p4777_p1 = scmp.ne.s32.totalorder %s5824_s6, %s4776_s18  ;;  %p4783_p6 = scmp.lt.u32.totalorder %s4776_s18, %s5824_s6 }
  0xa6   : > { %p4779_p0 = pnand %p4777_p1, %p5149_p10 }
  0xa8   : > { %p4780_p2 = pneg %p4779_p0 }
  0xaa   : > { %p4785_p4 = pnand %p4783_p6, %p4780_p2 }
  0xac   : > { %4788 = shalt.err (!%p4785_p4)
}
  0xad   : > { %s4789_s16 = scalar_lea.vmem %s5253_s1, 512  ;;  %p4797_p7 = scmp.lt.s32.totalorder %s5253_s1, %s5253_s1 }
  0xae   : > { %p4790_p11 = scmp.ne.s32.totalorder %s5253_s1, %s4789_s16  ;;  %p4798_p5 = scmp.lt.s32.totalorder %s4789_s16, %s4789_s16 }
  0xb0   : > { %p4792_p13 = pnand %p4790_p11, %p5149_p10  ;;  %p4799_p9 = por %p4798_p5, %p4797_p7 }
  0xb2   : > { %p4793_p3 = pneg %p4792_p13 }
  0xb4   : > { %p4800_p1 = pnand %p4799_p9, %p4793_p3 }
  0xb6   : > { %4803 = shalt.err (!%p4800_p1)
}
  0xb7   : > { %4203 = dma.hbm_to_vmem [thread:$0]  (!%p5821_p8), %s5824_s6, 512, %s5253_s1, [#allocation14], %s5823_s14, %s5823_s14, %s5822_s25  }
  0xb8   : > { %s3732_s17 = sadd.s32 4294967294, %s4998_s11   ;;  %s40_s15 = sadd.s32 1, %s4994_s10 }
  0xb9   : > { %p5825_p10 = scmp.ne.s32.totalorder %s5815_s8, 0  ;;  %s47_s2 = sadd.s32 1, %s4978_s29 }
  0xba   : > { %p54_p0 = scmp.ne.s32.totalorder %s4978_s29, %s4974_s28  ;;  %p60_p6 = scmp.ne.s32.totalorder %s4974_s28, %s4970_s27 }
  0xbb   : > { %s5873_s15 = smov (!%p5825_p10, %s40_s15), %s4994_s10  ;;  %p5826_p4 = scmp.eq.s32.totalorder %s4998_s11, 0 }
  0xbc   : > { %p42_p2 = scmp.ge.s32.totalorder %s5873_s15, 2  ;;  %p5828_p13 = scmp.eq.s32.totalorder %s5116_s12, 3 }
  0xbd   : > { %p5314_p11 = por %p5826_p4, %p54_p0  ;;  %p5831_p8 = scmp.eq.s32.totalorder %s5116_s12, 0 }
  0xbe   : > { %p5320_p3 = por %p5828_p13, %p54_p0  ;;  %s5875_s15 = smov (%p42_p2, %s5873_s15), 0 }
  0xbf   : > { %5830 = sst [smem:[#allocation29_spill]] %s5875_s15  ;;  %p5328_p7 = por %p5831_p8, %p60_p6 }
  0xc0   : > { %s5829_s1 = scalar_select %p5320_p3, 1, 0 }
  0xc1   : > { %s5832_s8 = scalar_select %p5328_p7, 1, 0 }
  0xc2   : > { %p226_p5 = scmp.eq.s32.totalorder %s3732_s17, 3  ;;  %s44_s30 = ssub.s32 %s4994_s10, %s5875_s15 }
  0xc3   : > { %s298_s21 = sand.u32 1, %s4978_s29   ;;  %p45_p9 = scmp.eq.s32.totalorder %s44_s30, 0 }
  0xc4   : > { %p5335_p1 = por %p226_p5, %p60_p6  ;;  %s3739_s24 = sshll.u32 %s298_s21, 6 }
  0xc5   : > { %s5340_s22 = scalar_select %p45_p9, %s4978_s29, %s47_s2  }
  0xc6   : > { %s5833_s18 = scalar_select %p5335_p1, 1, 0 }
  0xc7   : > { %s4084_s23 = sshll.u32 %s4994_s10, 10  ;;  %s5834_s0 = sld [smem:[#allocation30_spill]] }
  0xc8   : > { %s302_s19 = scalar_lea.vmem [#allocation4], %s3739_s24  ;;  %p5835_p10 = scmp.lt.s32.totalorder %s4998_s11, 4 }
  0xc9   : > { %s309_s17 = sshll.u32 %s302_s19, 4  ;;  %s5837_s2 = sand.u32 1, %s4966_s26   ;;  %s5348_s17 = int_to_ptr.vmem [resolvable:$true] %s309_s17 }
  0xca   : > { %p5354_p0 = pnand %p5835_p10, %p5314_p11  ;;  %s5360_s20 = sshll.u32 %s5837_s2, 7 }
  0xcc   : > { %p4806_p6 = pneg %p5354_p0 }
  0xcd   : > { %s5346_s13 = scalar_lea.hbm %s5834_s0, %s4084_s23  ;;  %s5362_s23 = scalar_lea.sflag [#allocation5], %s298_s21 }
  0xce   : > { %s4804_s16 = scalar_lea.hbm %s5346_s13, 1024  ;;  %s4809_s19 = scalar_lea.hbm %s5834_s0, 2048 }
  0xcf   : > { %p4805_p2 = scmp.ne.s32.totalorder %s5346_s13, %s4804_s16  ;;  %p4810_p11 = scmp.lt.u32.totalorder %s5346_s13, %s5834_s0 }
  0xd0   : > { %p4811_p8 = scmp.lt.u32.totalorder %s4809_s19, %s4804_s16  ;;  %p4813_p9 = scmp.lt.u32.totalorder %s4804_s16, %s5346_s13 }
  0xd1   : > { %p4807_p4 = pnand %p4806_p6, %p4805_p2 }
  0xd2   : > { %p4812_p5 = por %p4811_p8, %p4810_p11 }
  0xd3   : > { %p4808_p13 = pneg %p4807_p4 }
  0xd4   : > { %p4814_p10 = por %p4813_p9, %p4812_p5 }
  0xd6   : > { %p4815_p1 = pnand %p4814_p10, %p4808_p13 }
  0xd8   : > { %4818 = shalt.err (!%p4815_p1)
}
  0xd9   : > { %s4819_s21 = scalar_lea.vmem %s5348_s17, 1024  ;;  %s5012_s2 = smov [#allocation4]  }
  0xda   : > { %p4820_p2 = scmp.ne.s32.totalorder %s5348_s17, %s4819_s21  ;;  %s4824_s5 = sshll.u32 %s5012_s2, 4  ;;  %s4825_s5 = int_to_ptr.vmem [resolvable:$false] %s4824_s5 }
  0xdb   : > { %s4826_s4 = scalar_lea.vmem %s4825_s5, 2048  ;;  %p4827_p7 = scmp.lt.s32.totalorder %s5348_s17, %s4825_s5 }
  0xdc   : > { %p4822_p4 = pnand %p4820_p2, %p4806_p6  ;;  %p4828_p11 = scmp.lt.s32.totalorder %s4826_s4, %s4819_s21 }
  0xde   : > { %p4823_p3 = pneg %p4822_p4  ;;  %p4829_p8 = por %p4828_p11, %p4827_p7 }
  0xe0   : > { %p4830_p5 = pnand %p4829_p8, %p4823_p3 }
  0xe2   : > { %4833 = shalt.err (!%p4830_p5)
}
  0xe3   : > { %s5013_s6 = smov 256   ;;  %s5014_s16 = smov 16  }
  0xe4   : > { %4207 = dma.hbm_to_vmem [thread:$0]  (!%p5354_p0), %s5346_s13, 1024, %s5348_s17, %s5362_s23, %s5013_s6, %s5013_s6, %s5014_s16  }
  0xe5   : > { %s4087_s24 = sshll.u32 %s4990_s9, 11  ;;  %s5838_s0 = sld [smem:[#allocation32_spill]] }
  0xe6   : > { %s344_s21 = scalar_lea.vmem [#allocation9], %s5360_s20  ;;  %p5839_p7 = pneg %p5211_p12 }
  0xe7   : > { %s352_s4 = sshll.u32 %s344_s21, 4  ;;  %s5397_s4 = int_to_ptr.vmem [resolvable:$true] %s352_s4 }
  0xeb   : > { %s5394_s5 = scalar_lea.hbm %s5838_s0, %s4087_s24  ;;  %s4839_s30 = scalar_lea.hbm %s5838_s0, 4096 }
  0xec   : > { %s4834_s15 = scalar_lea.hbm %s5394_s5, 2048  ;;  %p4840_p6 = scmp.lt.u32.totalorder %s5394_s5, %s5838_s0 }
  0xed   : > { %p4835_p3 = scmp.ne.s32.totalorder %s5394_s5, %s4834_s15  ;;  %p4841_p13 = scmp.lt.u32.totalorder %s4839_s30, %s4834_s15 }
  0xee   : > { %p4843_p10 = scmp.lt.u32.totalorder %s4834_s15, %s5394_s5 }
  0xef   : > { %p4837_p1 = pnand %p4835_p3, %p5839_p7  ;;  %p4842_p9 = por %p4841_p13, %p4840_p6 }
  0xf1   : > { %p4838_p0 = pneg %p4837_p1  ;;  %p4844_p2 = por %p4843_p10, %p4842_p9 }
  0xf3   : > { %p4845_p4 = pnand %p4844_p2, %p4838_p0 }
  0xf5   : > { %4848 = shalt.err (!%p4845_p4)
}
  0xf6   : > { %s4849_s20 = scalar_lea.vmem %s5397_s4, 2048  ;;  %p5840_p8 = pmov %p5839_p7 }
  0xf7   : > { %p4850_p11 = scmp.ne.s32.totalorder %s5397_s4, %s4849_s20  ;;  %s5015_s16 = smov [#allocation9]  }
  0xf8   : > { %s4854_s24 = sshll.u32 %s5015_s16, 4  ;;  %s4855_s24 = int_to_ptr.vmem [resolvable:$false] %s4854_s24 }
  0xf9   : > { %p4852_p5 = pnand %p4850_p11, %p5840_p8  ;;  %s4856_s19 = scalar_lea.vmem %s4855_s24, 4096 }
  0xfa   : > { %p4857_p7 = scmp.lt.s32.totalorder %s5397_s4, %s4855_s24  ;;  %p4858_p1 = scmp.lt.s32.totalorder %s4856_s19, %s4849_s20 }
  0xfb   : > { %p4853_p3 = pneg %p4852_p5 }
  0xfc   : > { %p4859_p6 = por %p4858_p1, %p4857_p7 }
  0xfe   : > { %p4860_p13 = pnand %p4859_p6, %p4853_p3 }
 0x100   : > { %4863 = shalt.err (!%p4860_p13)
}
 0x101   : > { %4213 = dma.hbm_to_vmem [thread:$0]  (!%p5211_p12), %s5394_s5, 2048, %s5397_s4, %s5225_s3, %s5823_s14, %s5823_s14, %s5822_s25  }
 0x102   : > { %s5841_s15 = sld [smem:[#allocation26_spill]] }
 0x108   : > { %p5842_p0 = scmp.ne.s32.totalorder %s5841_s15, 0 }
 0x109   : > { %s5429_s2 = sand.u32 (!%p5842_p0), 1, %s4974_s28   ;;  %p5843_p9 = scmp.ne.s32.totalorder (!%p5842_p0), %s5832_s8, 0 }
 0x10a   : > { %364 = sbr.rel (%p5842_p0) target bundleno = 2718 (0xa9e), region = 48  ;;  %s3748_s21 = sshll.u32 (!%p5842_p0), %s5429_s2, 6 }
 0x10b   : > { %s367_s13 = scalar_lea.sflag (!%p5842_p0), [#allocation5], %s5429_s2  ;;  %s5433_s17 = scalar_lea.vmem (!%p5842_p0), [#allocation4], %s3748_s21 }
 0x111   : > { %4937 = dma.done.wait (%p5843_p9), %s367_s13, 1024  }
 0x112   : > { %4939 = vsyncadd (%p5843_p9), %s367_s13, 4294966272  ;;  %s5844_s3 = sld [smem:[#allocation22_spill]]  ;;  %s5845_s7 = sld [smem:[#allocation25_spill]] }
 0x113   : > { %s375_s25 = sand.u32 1, %s5116_s12  }
 0x114   : > { %s376_s4 = scalar_lea.sflag [#allocation8], %s375_s25 }
 0x118   : > { %s377_s14 = sand.u32 1, %s5844_s3   ;;  %p5846_p12 = scmp.ne.s32.totalorder %s5845_s7, 0 }
 0x119   : > { %s4166_s5 = smul.u32 384, %s377_s14 }
 0x11b   : > { %s5441_s30 = scalar_lea.vmem [#allocation7], %s4166_s5 }
 0x11c   : > { %4941 = dma.done.wait (%p5846_p12), %s376_s4, 8192  }
 0x11d   : > { %4943 = vsyncadd (%p5846_p12), %s376_s4, 4294959104  ;;  %s3749_s23 = sshll.u32 %s377_s14, 7  ;;  %p5847_p10 = scmp.eq.s32.totalorder %s5116_s12, 0 }
 0x11e   : > { %s5447_s6 = scalar_lea.vmem [#allocation9], %s3749_s23 }
 0x11f   : > { %4945 = dma.done.wait (%p5847_p10), [#allocation11], 32768   ;;  %p5848_p2 = pmov %p5847_p10 }
 0x121   : > { %4947 = vsyncadd (%p5848_p2), [#allocation11], 4294934528  ;;  %p5849_p4 = pmov %p5848_p2 }
 0x122   : > { %p5850_p11 = pmov %p5848_p2 }
 0x123   : > { %4949 = dma.done.wait (%p5849_p4), [#allocation14], 1024  }
 0x124   : > { %4951 = vsyncadd (%p5850_p11), [#allocation14], 4294966272  ;;  %s5457_s8 = scalar_lea.vmem [#allocation16], %s3748_s21  ;;  %s5851_s20 = sld [smem:[#allocation23_spill]] }
 0x12a   : > { %p3755_p8 = scmp.ne.s32.totalorder %s5851_s20, 0 }
 0x12b   : > { %v464_v0 = vld [vmem:[%s5433_s17 + $0x20] sm:$0xff] (!%p3755_p8)  ;;  %v465_v1 = vld [vmem:[%s5433_s17 + $0x28] sm:$0xff] (!%p3755_p8)  ;;  %v466_v7 = vld [vmem:[%s5433_s17 + $0x30] sm:$0xff] (!%p3755_p8)  ;;  %v5016_v20 = vmov (!%p3755_p8), 0.0  }
 0x12c   : > { %451 = sbr.rel (%p3755_p8) target bundleno = 469 (0x1d5), region = 80  ;;  %v460_v2 = vld [vmem:[%s5433_s17] sm:$0xff] (!%p3755_p8)  ;;  %v472_v3 = vmul.f32 (!%p3755_p8), %v464_v0, %v464_v0  ;;  %v473_v4 = vmul.f32 (!%p3755_p8), %v465_v1, %v465_v1  ;;  %v461_v5 = vld [vmem:[%s5433_s17 + $0x8] sm:$0xff] (!%p3755_p8)  ;;  %v467_v8 = vld [vmem:[%s5433_s17 + $0x38] sm:$0xff] (!%p3755_p8)  ;;  %v474_v10 = vmul.f32 (!%p3755_p8), %v466_v7, %v466_v7  ;;  %452 = vst [vmem:[#allocation2] sm:$0xff] (!%p3755_p8), %v5016_v20 }
 0x12d   : > { %v468_v6 = vmul.f32 (!%p3755_p8), %v460_v2, %v460_v2  ;;  %v469_v9 = vmul.f32 (!%p3755_p8), %v461_v5, %v461_v5  ;;  %v475_v11 = vmul.f32 (!%p3755_p8), %v467_v8, %v467_v8  ;;  %v462_v12 = vld [vmem:[%s5433_s17 + $0x10] sm:$0xff] (!%p3755_p8)  ;;  %v463_v13 = vld [vmem:[%s5433_s17 + $0x18] sm:$0xff] (!%p3755_p8)  ;;  %453 = vst [vmem:[#allocation2 + $0x8] sm:$0xff] (!%p3755_p8), %v5016_v20  ;;  %454 = vst [vmem:[#allocation2 + $0x10] sm:$0xff] (!%p3755_p8), %v5016_v20 }
 0x12e   : > { %v482_v14 = vadd.f32 (!%p3755_p8), %v473_v4, %v472_v3  ;;  %v470_v15 = vmul.f32 (!%p3755_p8), %v462_v12, %v462_v12  ;;  %v471_v16 = vmul.f32 (!%p3755_p8), %v463_v13, %v463_v13  ;;  %455 = vst [vmem:[#allocation2 + $0x18] sm:$0xff] (!%p3755_p8), %v5016_v20  ;;  %456 = vst [vmem:[#allocation2 + $0x20] sm:$0xff] (!%p3755_p8), %v5016_v20 }
 0x12f   : > { %v476_v17 = vadd.f32 (!%p3755_p8), %v469_v9, %v468_v6  ;;  %v485_v18 = vadd.f32 (!%p3755_p8), %v475_v11, %v474_v10  ;;  %457 = vst [vmem:[#allocation2 + $0x28] sm:$0xff] (!%p3755_p8), %v5016_v20  ;;  %458 = vst [vmem:[#allocation2 + $0x30] sm:$0xff] (!%p3755_p8), %v5016_v20 }
 0x130   : > { %483 = vadd.xlane.f32.xlu1 (!%p3755_p8), %v482_v14  ;;  %v479_v19 = vadd.f32 (!%p3755_p8), %v471_v16, %v470_v15  ;;  %459 = vst [vmem:[#allocation2 + $0x38] sm:$0xff] (!%p3755_p8), %v5016_v20 }
 0x131   : > { %477 = vadd.xlane.f32.xlu0 (!%p3755_p8), %v476_v17 }
 0x134   : > { %486 = vadd.xlane.f32.xlu1 %v485_v18 }
 0x135   : > { %480 = vadd.xlane.f32.xlu0 %v479_v19 }
 0x1bd   : > { %v484_v21 = vpop.xlane.xlu1 %483 }
 0x1be   : > { %v491_v22 = vmul.f32 0.00390625, %v484_v21  ;;  %v478_v23 = vpop.xlane.xlu0 %477 }
 0x1bf   : > { %v489_v24 = vmul.f32 0.00390625, %v478_v23 }
 0x1c0   : > { %v495_v25 = vadd.f32 1.1920929e-07, %v491_v22 }
 0x1c1   : > { %v493_v26 = vadd.f32 1.1920929e-07, %v489_v24  ;;  %v487_v27 = vpop.xlane.xlu1 %486 }
 0x1c2   : > { %4334 = vrsqrt.f32 %v495_v25  ;;  %v492_v28 = vmul.f32 0.00390625, %v487_v27  ;;  %v481_v29 = vpop.xlane.xlu0 %480 }
 0x1c3   : > { %4336 = vrsqrt.f32 %v493_v26  ;;  %v490_v30 = vmul.f32 0.00390625, %v481_v29 }
 0x1c4   : > { %v496_v31 = vadd.f32 1.1920929e-07, %v492_v28 }
 0x1c5   : > { %v494_v32 = vadd.f32 1.1920929e-07, %v490_v30 }
 0x1c6   : > { %4338 = vrsqrt.f32 %v496_v31 }
 0x1c7   : > { %4340 = vrsqrt.f32 %v494_v32 }
 0x1cc   : > { %v4335_v33 = vpop.eup %4334 }
 0x1cd   : > { %v4337_v34 = vpop.eup %4336  ;;  %v505_v35 = vmul.f32 %v4335_v33, %v464_v0  ;;  %v506_v36 = vmul.f32 %v4335_v33, %v465_v1 }
 0x1ce   : > { %v501_v37 = vmul.f32 %v4337_v34, %v460_v2  ;;  %v502_v38 = vmul.f32 %v4337_v34, %v461_v5 }
 0x1cf   : > { %513 = vst [vmem:[#allocation3 + $0x20] sm:$0xff] %v505_v35  ;;  %514 = vst [vmem:[#allocation3 + $0x28] sm:$0xff] %v506_v36 }
 0x1d0   : > { %v4339_v39 = vpop.eup %4338  ;;  %509 = vst [vmem:[#allocation3] sm:$0xff] %v501_v37  ;;  %510 = vst [vmem:[#allocation3 + $0x8] sm:$0xff] %v502_v38 }
 0x1d1   : > { %v4341_v40 = vpop.eup %4340  ;;  %v507_v41 = vmul.f32 %v4339_v39, %v466_v7  ;;  %v508_v42 = vmul.f32 %v4339_v39, %v467_v8 }
 0x1d2   : > { %v503_v43 = vmul.f32 %v4341_v40, %v462_v12  ;;  %v504_v44 = vmul.f32 %v4341_v40, %v463_v13 }
 0x1d3   : > { %515 = vst [vmem:[#allocation3 + $0x30] sm:$0xff] %v507_v41  ;;  %516 = vst [vmem:[#allocation3 + $0x38] sm:$0xff] %v508_v42 }
 0x1d4   : > { %511 = vst [vmem:[#allocation3 + $0x10] sm:$0xff] %v503_v43  ;;  %512 = vst [vmem:[#allocation3 + $0x18] sm:$0xff] %v504_v44 }
 0x1d5 PF: > { %v4342_v45 = vld [vmem:[%s5441_s30 + $0x4] ss:$12 sps:$4 sm:$0xff]   ;;  %v4344_v46 = vld [vmem:[%s5441_s30] ss:$12 sps:$4 sm:$0xff]   ;;  %v4345_v47 = vld [vmem:[%s5441_s30 + $0x1c] ss:$12 sps:$4 sm:$0xff]  }
 0x1d6   : > { %849 = vmatprep.subr.bf16.mxu0 %v4342_v45  ;;  %v4347_v48 = vld [vmem:[%s5441_s30 + $0x18] ss:$12 sps:$4 sm:$0xff]   ;;  %v4348_v49 = vld [vmem:[%s5441_s30 + $0x34] ss:$12 sps:$4 sm:$0xff]   ;;  %v4350_v50 = vld [vmem:[%s5441_s30 + $0x30] ss:$12 sps:$4 sm:$0xff]  }
 0x1d7   : > { %850 = vmatpush1.bf16.msra.mxu0 %v4344_v46  ;;  %v4351_v51 = vld [vmem:[%s5441_s30 + $0x4c] ss:$12 sps:$4 sm:$0xff]   ;;  %v4353_v52 = vld [vmem:[%s5441_s30 + $0x48] ss:$12 sps:$4 sm:$0xff]   ;;  %v4354_v53 = vld [vmem:[%s5441_s30 + $0x64] ss:$12 sps:$4 sm:$0xff]  }
 0x1d8   : > { %851 = vmatprep.subr.bf16.mxu0 %v4345_v47  ;;  %v4356_v54 = vld [vmem:[%s5441_s30 + $0x60] ss:$12 sps:$4 sm:$0xff]   ;;  %v4357_v55 = vld [vmem:[%s5441_s30 + $0x7c] ss:$12 sps:$4 sm:$0xff]   ;;  %v4359_v56 = vld [vmem:[%s5441_s30 + $0x78] ss:$12 sps:$4 sm:$0xff]  }
 0x1d9   : > { %v4360_v57 = vld [vmem:[%s5441_s30 + $0x94] ss:$12 sps:$4 sm:$0xff]   ;;  %v518_v58 = vld [vmem:[#allocation3 + $0x8] sm:$0xff]  ;;  %v4362_v61 = vld [vmem:[%s5441_s30 + $0x90] ss:$12 sps:$4 sm:$0xff]   ;;  %s5017_s12 = smov 64  }
 0x1da   : > { %v4363_v62 = vld [vmem:[%s5441_s30 + $0xac] ss:$12 sps:$4 sm:$0xff]   ;;  %v4365_v63 = vld [vmem:[%s5441_s30 + $0xa8] ss:$12 sps:$4 sm:$0xff]   ;;  %v4366_v0 = vld [vmem:[%s5441_s30 + $0xc4] ss:$12 sps:$4 sm:$0xff]  }
 0x1db   : > { %852 = vmatpush1.bf16.msra.mxu0 %v4347_v48  ;;  %v520_v59 = vld [vmem:[#allocation3 + $0x18] sm:$0xff]  ;;  %v4368_v1 = vld [vmem:[%s5441_s30 + $0xc0] ss:$12 sps:$4 sm:$0xff]   ;;  %v4377_v7 = vld [vmem:[%s5441_s30 + $0x108] ss:$12 sps:$4 sm:$0xff]   ;;  %vm1144_vm1 = vcmask 261120  }
 0x1dc   : > { %853 = vmatprep.subr.bf16.mxu0 %v4348_v49  ;;  %v526_v60 = vpack.c.bf16 %v520_v59, %v518_v58  ;;  %v4369_v2 = vld [vmem:[%s5441_s30 + $0xdc] ss:$12 sps:$4 sm:$0xff]   ;;  %v4371_v3 = vld [vmem:[%s5441_s30 + $0xd8] ss:$12 sps:$4 sm:$0xff]   ;;  %v4372_v4 = vld [vmem:[%s5441_s30 + $0xf4] ss:$12 sps:$4 sm:$0xff]  }
 0x1dd   : > { %v4374_v5 = vld [vmem:[%s5441_s30 + $0xf0] ss:$12 sps:$4 sm:$0xff]   ;;  %v4375_v6 = vld [vmem:[%s5441_s30 + $0x10c] ss:$12 sps:$4 sm:$0xff]   ;;  %v4384_v12 = vld [vmem:[%s5441_s30 + $0x154] ss:$12 sps:$4 sm:$0xff]  }
 0x1de   : > { %881 = vmatprep.mubr.bf16.mxu0 %v526_v60  ;;  %934 = vmatprep.mubr.bf16.mxu1 %v526_v60  ;;  %v4378_v8 = vld [vmem:[%s5441_s30 + $0x124] ss:$12 sps:$4 sm:$0xff]   ;;  %v4380_v9 = vld [vmem:[%s5441_s30 + $0x120] ss:$12 sps:$4 sm:$0xff]   ;;  %v4381_v10 = vld [vmem:[%s5441_s30 + $0x13c] ss:$12 sps:$4 sm:$0xff]  }
 0x1df   : > { %854 = vmatpush1.bf16.msra.mxu0 %v4350_v50  ;;  %v4383_v11 = vld [vmem:[%s5441_s30 + $0x138] ss:$12 sps:$4 sm:$0xff]   ;;  %v4386_v13 = vld [vmem:[%s5441_s30 + $0x150] ss:$12 sps:$4 sm:$0xff]   ;;  %v4389_v15 = vld [vmem:[%s5441_s30 + $0x168] ss:$12 sps:$4 sm:$0xff]  }
 0x1e0   : > { %855 = vmatprep.subr.bf16.mxu0 %v4351_v51  ;;  %v4387_v14 = vld [vmem:[%s5441_s30 + $0x16c] ss:$12 sps:$4 sm:$0xff]   ;;  %v517_v16 = vld [vmem:[#allocation3] sm:$0xff]  ;;  %v519_v17 = vld [vmem:[#allocation3 + $0x10] sm:$0xff]  ;;  %s5852_s16 = sld [smem:[#allocation23_spill]] }
 0x1e1   : > { %v522_v18 = vld [vmem:[#allocation3 + $0x28] sm:$0xff]  ;;  %v524_v19 = vld [vmem:[#allocation3 + $0x38] sm:$0xff]  ;;  %v5500_v20 = vpack.c.bf16 %v519_v17, %v517_v16  ;;  %v521_v22 = vld [vmem:[#allocation3 + $0x20] sm:$0xff] }
 0x1e2   : > { %v5502_v21 = vpack.c.bf16 %v524_v19, %v522_v18  ;;  %v523_v23 = vld [vmem:[#allocation3 + $0x30] sm:$0xff]  ;;  %v951_v33 = vld [vmem:[#allocation13] sm:$0xff]  ;;  %v952_v38 = vld [vmem:[#allocation13 + $0x8] sm:$0xff] }
 0x1e3   : > { %856 = vmatpush1.bf16.msra.mxu0 %v4353_v52  ;;  %v5506_v24 = vpack.c.bf16 %v523_v23, %v521_v22  ;;  %v955_v34 = vld [vmem:[#allocation15] sm:$0xff]  ;;  %v956_v39 = vld [vmem:[#allocation15 + $0x8] sm:$0xff]  ;;  %v953_v45 = vld [vmem:[#allocation13 + $0x10] sm:$0xff] }
 0x1e4   : > { %857 = vmatprep.subr.bf16.mxu0 %v4354_v53  ;;  %v957_v46 = vld [vmem:[#allocation15 + $0x10] sm:$0xff]  ;;  %v954_v52 = vld [vmem:[#allocation13 + $0x18] sm:$0xff]  ;;  %v4392_v19 = vld [vmem:[%s5441_s30 + $0xe0] ss:$12 sps:$4 sm:$0xff]  }
 0x1e5   : > { %v4390_v17 = vld [vmem:[%s5441_s30 + $0xc8] ss:$12 sps:$4 sm:$0xff]   ;;  %v4393_v22 = vld [vmem:[%s5441_s30 + $0x20] ss:$12 sps:$4 sm:$0xff]   ;;  %v4394_v23 = vld [vmem:[%s5441_s30 + $0xf8] ss:$12 sps:$4 sm:$0xff]  }
 0x1e6   : > { %v4391_v18 = vld [vmem:[%s5441_s30 + $0x8] ss:$12 sps:$4 sm:$0xff]   ;;  %4089 = vmatprep.subr.bf16.mxu1 %v4390_v17  ;;  %p3822_p5 = scmp.ne.s32.totalorder %s5852_s16, 1 }
 0x1e7   : > { %858 = vmatpush1.bf16.msra.mxu0 %v4356_v54  ;;  %4090 = vmatpush3.bf16.msra.mxu1 %v4391_v18 }
 0x1e8   : > { %859 = vmatprep.subr.bf16.mxu0 %v4357_v55  ;;  %4091 = vmatprep.subr.bf16.mxu1 %v4392_v19 }
 0x1eb   : > { %860 = vmatpush1.bf16.msra.mxu0 %v4359_v56  ;;  %v958_v56 = vld [vmem:[#allocation15 + $0x18] sm:$0xff]  ;;  %4092 = vmatpush3.bf16.msra.mxu1 %v4393_v22 }
 0x1ec   : > { %861 = vmatprep.subr.bf16.mxu0 %v4360_v57  ;;  %4093 = vmatprep.subr.bf16.mxu1 %v4394_v23 }
 0x1ef   : > { %862 = vmatpush1.bf16.msra.mxu0 %v4362_v61 }
 0x1f0   : > { %863 = vmatprep.subr.bf16.mxu0 %v4363_v62 }
 0x1f3   : > { %864 = vmatpush1.bf16.msra.mxu0 %v4365_v63 }
 0x1f4   : > { %865 = vmatprep.subr.bf16.mxu0 %v4366_v0 }
 0x1f7   : > { %866 = vmatpush1.bf16.msra.mxu0 %v4368_v1 }
 0x1f8   : > { %867 = vmatprep.subr.bf16.mxu0 %v4369_v2 }
 0x1fb   : > { %868 = vmatpush1.bf16.msra.mxu0 %v4371_v3 }
 0x1fc   : > { %869 = vmatprep.subr.bf16.mxu0 %v4372_v4 }
 0x1ff   : > { %870 = vmatpush1.bf16.msra.mxu0 %v4374_v5 }
 0x200   : > { %871 = vmatprep.subr.bf16.mxu0 %v4375_v6 }
 0x203   : > { %872 = vmatpush1.bf16.msra.mxu0 %v4377_v7 }
 0x204   : > { %873 = vmatprep.subr.bf16.mxu0 %v4378_v8 }
 0x207   : > { %874 = vmatpush1.bf16.msra.mxu0 %v4380_v9 }
 0x208   : > { %875 = vmatprep.subr.bf16.mxu0 %v4381_v10 }
 0x20b   : > { %876 = vmatpush1.bf16.msra.mxu0 %v4383_v11 }
 0x20c   : > { %877 = vmatprep.subr.bf16.mxu0 %v4384_v12 }
 0x20f   : > { %878 = vmatpush1.bf16.msra.mxu0 %v4386_v13 }
 0x210   : > { %879 = vmatprep.subr.bf16.mxu0 %v4387_v14 }
 0x213   : > { %880 = vmatpush1.bf16.msra.mxu0 %v4389_v15 }
 0x216   : > { %882 = vmatmul.mubr.bf16.vlgmr.msra.gmra.mrb[0].mxu0 %v5500_v20 }
 0x217   : > { %891 = vmatprep.mubr.bf16.mxu0 %v5502_v21 }
 0x21e   : > { %892 = vmatmul.mubr.bf16.gmra.mrb[4].mxu0 %v5506_v24 }
 0x2e9   : > { %v883_v25 = vpop.f32.mrb[0].mxu0 }
 0x2ea   : > { %v885_v26 = vpop.f32.mrb[1].mxu0  ;;  %v959_v48 = vmul.f32 %v951_v33, %v883_v25 }
 0x2eb   : > { %1024 = vrot.lane.b32.xlu0 %v885_v26, %s5017_s12  ;;  %v887_v27 = vpop.f32.mrb[2].mxu0  ;;  %v1016_v36 = vmul.f32 %v951_v33, %v885_v26  ;;  %v4396_v26 = vld [vmem:[%s5441_s30 + $0x110] ss:$12 sps:$4 sm:$0xff]   ;;  %v4403_v33 = vld [vmem:[%s5441_s30 + $0x98] ss:$12 sps:$4 sm:$0xff]  }
 0x2ec   : > { %v889_v28 = vpop.f32.mrb[3].mxu0  ;;  %v960_v6 = vmul.f32 %v952_v38, %v887_v27 }
 0x2ed   : > { %v1017_v42 = vmul.f32 %v952_v38, %v889_v28 }
 0x2ef   : > { %1026 = vrot.lane.b32.xlu0 %v889_v28, %s5017_s12  ;;  %v4398_v28 = vld [vmem:[%s5441_s30 + $0x128] ss:$12 sps:$4 sm:$0xff]  }
 0x2f1   : > { %v893_v29 = vpop.f32.mrb[4].mxu0 }
 0x2f2   : > { %v895_v30 = vpop.f32.mrb[5].mxu0  ;;  %v961_v59 = vmul.f32 %v953_v45, %v893_v29 }
 0x2f3   : > { %967 = vrot.lane.b32.xlu0 %v883_v25, %s5017_s12  ;;  %1028 = vrot.lane.b32.xlu1 %v895_v30, %s5017_s12  ;;  %v897_v31 = vpop.f32.mrb[6].mxu0  ;;  %v1018_v51 = vmul.f32 %v953_v45, %v895_v30  ;;  %v4395_v25 = vld [vmem:[%s5441_s30 + $0x38] ss:$12 sps:$4 sm:$0xff]   ;;  %v4400_v30 = vld [vmem:[%s5441_s30 + $0x140] ss:$12 sps:$4 sm:$0xff]  }
 0x2f4   : > { %v899_v32 = vpop.f32.mrb[7].mxu0  ;;  %v962_v12 = vmul.f32 %v954_v52, %v897_v31  ;;  %4094 = vmatpush3.bf16.msra.mxu1 %v4395_v25 }
 0x2f5   : > { %v1019_v60 = vmul.f32 %v954_v52, %v899_v32  ;;  %4095 = vmatprep.subr.bf16.mxu1 %v4396_v26 }
 0x2f7   : > { %971 = vrot.lane.b32.xlu0 %v893_v29, %s5017_s12  ;;  %1030 = vrot.lane.b32.xlu1 %v899_v32, %s5017_s12  ;;  %v4399_v29 = vld [vmem:[%s5441_s30 + $0x68] ss:$12 sps:$4 sm:$0xff]   ;;  %v4402_v32 = vld [vmem:[%s5441_s30 + $0x158] ss:$12 sps:$4 sm:$0xff]  }
 0x2fb   : > { %969 = vrot.lane.b32.xlu1 %v887_v27, %s5017_s12  ;;  %v4397_v27 = vld [vmem:[%s5441_s30 + $0x50] ss:$12 sps:$4 sm:$0xff]  }
 0x2fc   : > { %4096 = vmatpush3.bf16.msra.mxu1 %v4397_v27 }
 0x2fd   : > { %4097 = vmatprep.subr.bf16.mxu1 %v4398_v28 }
 0x2ff   : > { %973 = vrot.lane.b32.xlu1 %v897_v31, %s5017_s12  ;;  %v4401_v31 = vld [vmem:[%s5441_s30 + $0x80] ss:$12 sps:$4 sm:$0xff]  }
 0x300   : > { %4098 = vmatpush3.bf16.msra.mxu1 %v4399_v29 }
 0x301   : > { %4099 = vmatprep.subr.bf16.mxu1 %v4400_v30 }
 0x304   : > { %4100 = vmatpush3.bf16.msra.mxu1 %v4401_v31 }
 0x305   : > { %4101 = vmatprep.subr.bf16.mxu1 %v4402_v32 }
 0x308   : > { %4102 = vmatpush3.bf16.msra.mxu1 %v4403_v33 }
 0x35d   : > { %v1025_v35 = vpop.permute.xlu0 %1024 }
 0x35e   : > { %v1036_v37 = vmul.f32 %v1025_v35, %v955_v34  ;;  %v4405_v35 = vld [vmem:[%s5441_s30 + $0xb0] ss:$12 sps:$4 sm:$0xff]  }
 0x360   : > { %v5509_v40 = vadd.f32 %v1036_v37, %v1016_v36 }
 0x361   : > { %v1027_v41 = vpop.permute.xlu0 %1026 }
 0x362   : > { %v1037_v43 = vmul.f32 %v1027_v41, %v956_v39  ;;  %v1044_v44 = vmul.f32 %v5509_v40, %v5509_v40 }
 0x364   : > { %v5513_v47 = vadd.f32 %v1037_v43, %v1017_v42  ;;  %1048 = vadd.xlane.f32.xlu0 %v1044_v44 }
 0x365   : > { %v968_v49 = vpop.permute.xlu0 %967  ;;  %v1029_v50 = vpop.permute.xlu1 %1028 }
 0x366   : > { %v979_v53 = vmul.f32 %v968_v49, %v955_v34  ;;  %v1038_v54 = vmul.f32 %v1029_v50, %v957_v46  ;;  %v1045_v55 = vmul.f32 %v5513_v47, %v5513_v47  ;;  %v4404_v34 = vld [vmem:[%s5441_s30 + $0x170] ss:$12 sps:$4 sm:$0xff]  }
 0x367   : > { %4103 = vmatprep.subr.bf16.mxu1 %v4404_v34 }
 0x368   : > { %v5517_v57 = vadd.f32 %v979_v53, %v959_v48  ;;  %v5519_v58 = vadd.f32 %v1038_v54, %v1018_v51  ;;  %1050 = vadd.xlane.f32.xlu1 %v1045_v55  ;;  %4104 = vmatpush3.bf16.msra.mxu1 %v4405_v35 }
 0x369   : > { %v972_v61 = vpop.permute.xlu0 %971  ;;  %v1031_v62 = vpop.permute.xlu1 %1030 }
 0x36a   : > { %v981_v63 = vmul.f32 %v972_v61, %v957_v46  ;;  %v1039_v0 = vmul.f32 %v1031_v62, %v958_v56  ;;  %v1046_v1 = vmul.f32 %v5519_v58, %v5519_v58  ;;  %v987_v2 = vmul.f32 %v5517_v57, %v5517_v57 }
 0x36b   : > { %935 = vmatmul.mubr.bf16.vlgmr.msra.gmra.mrb[0].mxu1 %v5500_v20 }
 0x36c   : > { %v5525_v3 = vadd.f32 %v981_v63, %v961_v59  ;;  %v5527_v4 = vadd.f32 %v1039_v0, %v1019_v60  ;;  %1052 = vadd.xlane.f32.xlu0 %v1046_v1  ;;  %991 = vadd.xlane.f32.xlu1 %v987_v2 }
 0x36d   : > { %v970_v5 = vpop.permute.xlu1 %969  ;;  %942 = vmatprep.mubr.bf16.mxu1 %v5502_v21 }
 0x36e   : > { %v980_v7 = vmul.f32 %v970_v5, %v956_v39  ;;  %v989_v8 = vmul.f32 %v5525_v3, %v5525_v3  ;;  %v1047_v9 = vmul.f32 %v5527_v4, %v5527_v4 }
 0x370   : > { %v5533_v10 = vadd.f32 %v980_v7, %v960_v6  ;;  %995 = vadd.xlane.f32.xlu1 %v989_v8  ;;  %1054 = vadd.xlane.f32.xlu0 %v1047_v9 }
 0x371   : > { %v974_v11 = vpop.permute.xlu1 %973 }
 0x372   : > { %v982_v13 = vmul.f32 %v974_v11, %v958_v56  ;;  %v988_v14 = vmul.f32 %v5533_v10, %v5533_v10 }
 0x373   : > { %943 = vmatmul.mubr.bf16.gmra.mrb[4].mxu1 %v5506_v24 }
 0x374   : > { %v5537_v15 = vadd.f32 %v982_v13, %v962_v12  ;;  %993 = vadd.xlane.f32.xlu0 %v988_v14 }
 0x376   : > { %v990_v16 = vmul.f32 %v5537_v15, %v5537_v15 }
 0x378   : > { %997 = vadd.xlane.f32.xlu0 %v990_v16 }
 0x3f1   : > { %v1049_v36 = vpop.xlane.xlu0 %1048 }
 0x3f2   : > { %v1056_v37 = vmul.f32 0.0078125, %v1049_v36 }
 0x3f4   : > { %v1060_v38 = vadd.f32 1.1920929e-07, %v1056_v37 }
 0x3f5   : > { %v1051_v39 = vpop.xlane.xlu1 %1050 }
 0x3f6   : > { %v1057_v41 = vmul.f32 0.0078125, %v1051_v39  ;;  %4430 = vrsqrt.f32 %v1060_v38 }
 0x3f8   : > { %v1061_v42 = vadd.f32 1.1920929e-07, %v1057_v41 }
 0x3f9   : > { %v1053_v43 = vpop.xlane.xlu0 %1052  ;;  %v992_v44 = vpop.xlane.xlu1 %991 }
 0x3fa   : > { %4432 = vrsqrt.f32 %v1061_v42  ;;  %v1058_v45 = vmul.f32 0.0078125, %v1053_v43  ;;  %v1000_v46 = vmul.f32 0.0078125, %v992_v44 }
 0x3fc   : > { %v1062_v48 = vadd.f32 1.1920929e-07, %v1058_v45  ;;  %v1004_v51 = vadd.f32 1.1920929e-07, %v1000_v46 }
 0x3fd   : > { %v996_v49 = vpop.xlane.xlu1 %995  ;;  %v1055_v50 = vpop.xlane.xlu0 %1054 }
 0x3fe   : > { %v1059_v20 = vmul.f32 0.0078125, %v1055_v50  ;;  %v1002_v21 = vmul.f32 0.0078125, %v996_v49  ;;  %4434 = vrsqrt.f32 %v1062_v48 }
 0x400   : > { %v1063_v52 = vadd.f32 1.1920929e-07, %v1059_v20  ;;  %v4431_v53 = vpop.eup %4430  ;;  %v1006_v56 = vadd.f32 1.1920929e-07, %v1002_v21 }
 0x401   : > { %v994_v24 = vpop.xlane.xlu0 %993  ;;  %v1068_v61 = vmul.f32 %v4431_v53, %v5509_v40 }
 0x402   : > { %v1001_v54 = vmul.f32 0.0078125, %v994_v24  ;;  %4436 = vrsqrt.f32 %v1063_v52 }
 0x403   : > { %4438 = vrsqrt.f32 %v1004_v51 }
 0x404   : > { %v4433_v55 = vpop.eup %4432  ;;  %v1005_v59 = vadd.f32 1.1920929e-07, %v1001_v54 }
 0x405   : > { %v998_v60 = vpop.xlane.xlu0 %997  ;;  %v1069_v62 = vmul.f32 %v4433_v55, %v5513_v47 }
 0x406   : > { %4440 = vrsqrt.f32 %v1005_v59  ;;  %v1003_v63 = vmul.f32 0.0078125, %v998_v60 }
 0x407   : > { %v1074_v0 = vpack.c.bf16 %v1069_v62, %v1068_v61  ;;  %4442 = vrsqrt.f32 %v1006_v56 }
 0x408   : > { %v1007_v1 = vadd.f32 1.1920929e-07, %v1003_v63  ;;  %v4435_v2 = vpop.eup %4434 }
 0x409   : > { %4125 = vmatprep.subr.bf16.mxu0 %v1074_v0  ;;  %v1070_v7 = vmul.f32 %v4435_v2, %v5519_v58 }
 0x40a   : > { %4444 = vrsqrt.f32 %v1007_v1  ;;  %4126 = vmatpush3.bf16.xpose.msra.mxu0 %v1074_v0 }
 0x40c   : > { %v4437_v5 = vpop.eup %4436 }
 0x40d   : > { %v4439_v6 = vpop.eup %4438  ;;  %v1071_v8 = vmul.f32 %v4437_v5, %v5527_v4 }
 0x40e   : > { %v1012_v40 = vmul.f32 %v4439_v6, %v5517_v57 }
 0x40f   : > { %v1075_v11 = vpack.c.bf16 %v1071_v8, %v1070_v7 }
 0x410   : > { %v4441_v9 = vpop.eup %4440 }
 0x411   : > { %v1013_v47 = vmul.f32 %v4441_v9, %v5533_v10  ;;  %v4443_v12 = vpop.eup %4442  ;;  %4127 = vmatprep.subr.bf16.mxu0 %v1075_v11  ;;  %v1129_v10 = vlaneseq }
 0x412   : > { %4128 = vmatpush3.bf16.xpose.msra.mxu0 %v1075_v11  ;;  %v1014_v16 = vmul.f32 %v4443_v12, %v5525_v3  ;;  %v4406_v12 = vld [vmem:[%s5447_s6] ss:$8 sps:$4 sm:$0xff]  }
 0x413   : > { %v1072_v13 = vpack.c.bf16 %v1013_v47, %v1012_v40  ;;  %v1130_v26 = vshrl.u32 %v1129_v10, 7  ;;  %v1135_v27 = vand.u32 127, %v1129_v10  ;;  %v4424_v10 = vld [vmem:[%s5447_s6 + $0x60] ss:$8 sps:$4 sm:$0xff]  }
 0x414   : > { %v4445_v14 = vpop.eup %4444 }
 0x415   : > { %v1015_v17 = vmul.f32 %v4445_v14, %v5537_v15  ;;  %4129 = vmatprep.mubr.bf16.mxu0 %v1072_v13  ;;  %v1131_v28 = vadd.s32 8, %v1130_v26  ;;  %v1132_v29 = vadd.s32 16, %v1130_v26  ;;  %vm1136_vm0 = vcmp.le.s32.totalorder %v1135_v27, %v1130_v26  ;;  %v4408_v13 = vld [vmem:[%s5447_s6 + $0x4] ss:$8 sps:$4 sm:$0xff]   ;;  %v4411_v14 = vld [vmem:[%s5447_s6 + $0x14] ss:$8 sps:$4 sm:$0xff]  }
 0x416   : > { %v1133_v15 = vadd.s32 24, %v1130_v26  ;;  %v4429_v26 = vld [vmem:[%s5447_s6 + $0x74] ss:$8 sps:$4 sm:$0xff]  }
 0x417   : > { %v1073_v18 = vpack.c.bf16 %v1015_v17, %v1014_v16  ;;  %vm1137_vm2 = vcmp.le.s32.totalorder %v1135_v27, %v1131_v28  ;;  %vm1138_vm3 = vcmp.le.s32.totalorder %v1135_v27, %v1132_v29  ;;  %v4409_v16 = vld [vmem:[%s5447_s6 + $0x10] ss:$8 sps:$4 sm:$0xff]   ;;  %v4414_v17 = vld [vmem:[%s5447_s6 + $0x24] ss:$8 sps:$4 sm:$0xff]   ;;  %v5018_v28 = vmov 0  }
 0x418   : > { %vm1139_vm4 = vcmp.le.s32.totalorder %v1135_v27, %v1133_v15  ;;  %v4427_v27 = vld [vmem:[%s5447_s6 + $0x70] ss:$8 sps:$4 sm:$0xff]  }
 0x419   : > { %4130 = vmatmul.mubr.bf16.vlgmr.msra.gmra.mrb[8].mxu0 %v1073_v18  ;;  %v4412_v18 = vld [vmem:[%s5447_s6 + $0x20] ss:$8 sps:$4 sm:$0xff]  }
 0x43e   : > { %v4105_v58 = vpop.f32.mrb[0].mxu1 }
 0x43f   : > { %v4106_v4 = vpop.f32.mrb[1].mxu1 }
 0x440   : > { %v4107_v19 = vadd.f32 %v4106_v4, %v4105_v58  ;;  %v4108_v22 = vpop.f32.mrb[2].mxu1  ;;  %v4417_v58 = vld [vmem:[%s5447_s6 + $0x34] ss:$8 sps:$4 sm:$0xff]   ;;  %v4415_v4 = vld [vmem:[%s5447_s6 + $0x30] ss:$8 sps:$4 sm:$0xff]  }
 0x441   : > { %v4109_v23 = vpop.f32.mrb[3].mxu1 }
 0x442   : > { %v4110_v57 = vadd.f32 %v4109_v23, %v4108_v22  ;;  %v4418_v22 = vld [vmem:[%s5447_s6 + $0x40] ss:$8 sps:$4 sm:$0xff]   ;;  %v4423_v23 = vld [vmem:[%s5447_s6 + $0x54] ss:$8 sps:$4 sm:$0xff]  }
 0x444   : > { %v1183_v25 = vpack.c.bf16 %v4110_v57, %v4107_v19  ;;  %v4420_v19 = vld [vmem:[%s5447_s6 + $0x44] ss:$8 sps:$4 sm:$0xff]   ;;  %v4421_v57 = vld [vmem:[%s5447_s6 + $0x50] ss:$8 sps:$4 sm:$0xff]  }
 0x446   : > { %4133 = vmatprep.subr.bf16.mxu1 %v1183_v25  ;;  %v4111_v46 = vpop.f32.mrb[4].mxu1 }
 0x447   : > { %4134 = vmatpush3.bf16.msra.mxu1 %v1183_v25  ;;  %v4112_v48 = vpop.f32.mrb[5].mxu1  ;;  %v4426_v25 = vld [vmem:[%s5447_s6 + $0x64] ss:$8 sps:$4 sm:$0xff]  }
 0x448   : > { %v4113_v49 = vadd.f32 %v4112_v48, %v4111_v46  ;;  %v4114_v50 = vpop.f32.mrb[6].mxu1  ;;  %v1248_v46 = vld [vmem:[#allocation2] sm:$0xff]  ;;  %v1249_v48 = vld [vmem:[#allocation2 + $0x8] sm:$0xff] }
 0x449   : > { %v4115_v20 = vpop.f32.mrb[7].mxu1 }
 0x44a   : > { %v4116_v51 = vadd.f32 %v4115_v20, %v4114_v50  ;;  %v1250_v50 = vld [vmem:[#allocation2 + $0x10] sm:$0xff] }
 0x44c   : > { %v1184_v21 = vpack.c.bf16 %v4116_v51, %v4113_v49 }
 0x44e   : > { %4135 = vmatprep.subr.bf16.mxu1 %v1184_v21 }
 0x44f   : > { %4136 = vmatpush3.bf16.msra.mxu1 %v1184_v21  ;;  %v1251_v21 = vld [vmem:[#allocation2 + $0x18] sm:$0xff] }
 0x450   : > { %1354 = vmatprep.subr.bf16.mxu1 %v4408_v13  ;;  %v1430_v13 = vld [vmem:[%s5433_s17 + $0x18] sm:$0xff] (!%p3822_p5) }
 0x4ec   : > { %v4131_v3 = vpop.f32.mrb[8].mxu0 }
 0x4ed   : > { %v1110_v30 = vpop.f32.mrb[9].mxu0  ;;  %v1127_v31 = vmul.f32 0.088388346, %v4131_v3 }
 0x4ee   : > { %v1125_v32 = vmul.f32 0.088388346, %v1110_v30  ;;  %v4132_v33 = vpop.f32.mrb[10].mxu0 }
 0x4ef   : > { %v1113_v34 = vpop.f32.mrb[11].mxu0  ;;  %v1128_v35 = vmul.f32 0.088388346, %v4132_v33  ;;  %v1142_v41 = vsel %vm1138_vm3, %v1127_v31, -1e+30 }
 0x4f0   : > { %v1126_v36 = vmul.f32 0.088388346, %v1113_v34  ;;  %v1140_v37 = vsel %vm1136_vm0, %v1125_v32, -1e+30  ;;  %v1151_v44 = vsel %vm1144_vm1, %v1142_v41, -inf }
 0x4f1   : > { %v1145_v38 = vsel %vm1144_vm1, %v1140_v37, -inf  ;;  %v1143_v43 = vsel %vm1139_vm4, %v1128_v35, -1e+30 }
 0x4f2   : > { %1146 = vmax.xlane.f32.xlu1 %v1145_v38  ;;  %v1141_v39 = vsel %vm1137_vm2, %v1126_v36, -1e+30  ;;  %v1154_v45 = vsel %vm1144_vm1, %v1143_v43, -inf }
 0x4f3   : > { %v1148_v42 = vsel %vm1144_vm1, %v1141_v39, -inf }
 0x4f4   : > { %1149 = vmax.xlane.f32.xlu0 %v1148_v42 }
 0x4f6   : > { %1152 = vmax.xlane.f32.xlu1 %v1151_v44 }
 0x4f8   : > { %1155 = vmax.xlane.f32.xlu0 %v1154_v45 }
 0x57f   : > { %v1147_v52 = vpop.xlane.xlu1 %1146 }
 0x580   : > { %v1157_v24 = vsub.f32 %v1140_v37, %v1147_v52 }
 0x581   : > { %v1150_v53 = vpop.xlane.xlu0 %1149 }
 0x582   : > { %v1161_v54 = vmul.f32 1.442695, %v1157_v24  ;;  %v1158_v55 = vsub.f32 %v1141_v39, %v1150_v53 }
 0x583   : > { %v1153_v56 = vpop.xlane.xlu1 %1152 }
 0x584   : > { %4446 = vpow2.f32 %v1161_v54  ;;  %v1163_v59 = vmul.f32 1.442695, %v1158_v55  ;;  %v1159_v60 = vsub.f32 %v1142_v41, %v1153_v56  ;;  %v1252_v56 = vld [vmem:[#allocation2 + $0x20] sm:$0xff] }
 0x585   : > { %v1156_v61 = vpop.xlane.xlu0 %1155 }
 0x586   : > { %4448 = vpow2.f32 %v1163_v59  ;;  %v1165_v62 = vmul.f32 1.442695, %v1159_v60  ;;  %v1160_v63 = vsub.f32 %v1143_v43, %v1156_v61  ;;  %v1253_v59 = vld [vmem:[#allocation2 + $0x28] sm:$0xff]  ;;  %v1254_v61 = vld [vmem:[#allocation2 + $0x30] sm:$0xff] }
 0x588   : > { %4450 = vpow2.f32 %v1165_v62  ;;  %v1167_v0 = vmul.f32 1.442695, %v1160_v63 }
 0x58a   : > { %4452 = vpow2.f32 %v1167_v0  ;;  %v1255_v0 = vld [vmem:[#allocation2 + $0x38] sm:$0xff] }
 0x58e   : > { %v4447_v1 = vpop.eup %4446 }
 0x58f   : > { %v1169_v2 = vsel %vm1144_vm1, %v4447_v1, 0.0 }
 0x590   : > { %v4449_v5 = vpop.eup %4448  ;;  %1170 = vadd.xlane.f32.xlu1 %v1169_v2 }
 0x591   : > { %v1172_v6 = vsel %vm1144_vm1, %v4449_v5, 0.0  ;;  %v1181_v7 = vpack.c.bf16 %v4449_v5, %v4447_v1 }
 0x592   : > { %v4451_v8 = vpop.eup %4450  ;;  %1173 = vadd.xlane.f32.xlu0 %v1172_v6 }
 0x593   : > { %4137 = vmatprep.mubr.msk.bf16.mxu1 %vm1144_vm1, %v1181_v7  ;;  %v1175_v9 = vsel %vm1144_vm1, %v4451_v8, 0.0 }
 0x594   : > { %v4453_v11 = vpop.eup %4452  ;;  %1176 = vadd.xlane.f32.xlu1 %v1175_v9  ;;  %v1428_v9 = vld [vmem:[%s5433_s17 + $0x8] sm:$0xff] (!%p3822_p5) }
 0x595   : > { %v1182_v40 = vpack.c.bf16 %v4453_v11, %v4451_v8  ;;  %v1178_v47 = vsel %vm1144_vm1, %v4453_v11, 0.0  ;;  %v1427_v8 = vld [vmem:[%s5433_s17] sm:$0xff] (!%p3822_p5) }
 0x596   : > { %1179 = vadd.xlane.f32.xlu0 %v1178_v47 }
 0x597   : > { %4138 = vmatmul.mubr.msk.bf16.vlgmr.msra.gmra.mrb[8].mxu1 %vm1144_vm1, %v1182_v40 }
 0x598   : > { %1355 = vmatpush1.bf16.msra.mxu1 %v4406_v12  ;;  %1386 = vmatprep.mubr.bf16.mxu1 %v5018_v28  ;;  %v1429_v12 = vld [vmem:[%s5433_s17 + $0x10] sm:$0xff] (!%p3822_p5) }
 0x599   : > { %1356 = vmatprep.subr.bf16.mxu1 %v4411_v14 }
 0x59c   : > { %1357 = vmatpush1.bf16.msra.mxu1 %v4409_v16 }
 0x59d   : > { %1358 = vmatprep.subr.bf16.mxu1 %v4414_v17 }
 0x5a0   : > { %1359 = vmatpush1.bf16.msra.mxu1 %v4412_v18  ;;  %v1431_v18 = vld [vmem:[%s5433_s17 + $0x20] sm:$0xff] (!%p3822_p5) }
 0x5a1   : > { %1360 = vmatprep.subr.bf16.mxu1 %v4417_v58 }
 0x5a4   : > { %1361 = vmatpush1.bf16.msra.mxu1 %v4415_v4 }
 0x5a5   : > { %1362 = vmatprep.subr.bf16.mxu1 %v4420_v19 }
 0x5a8   : > { %1363 = vmatpush1.bf16.msra.mxu1 %v4418_v22  ;;  %v1432_v22 = vld [vmem:[%s5433_s17 + $0x28] sm:$0xff] (!%p3822_p5) }
 0x5a9   : > { %1364 = vmatprep.subr.bf16.mxu1 %v4423_v23 }
 0x5ac   : > { %1365 = vmatpush1.bf16.msra.mxu1 %v4421_v57 }
 0x5ad   : > { %1366 = vmatprep.subr.bf16.mxu1 %v4426_v25 }
 0x5b0   : > { %1367 = vmatpush1.bf16.msra.mxu1 %v4424_v10 }
 0x5b1   : > { %1368 = vmatprep.subr.bf16.mxu1 %v4429_v26 }
 0x5b4   : > { %1369 = vmatpush1.bf16.msra.mxu1 %v4427_v27  ;;  %v1433_v27 = vld [vmem:[%s5433_s17 + $0x30] sm:$0xff] (!%p3822_p5) }
 0x61d   : > { %v1171_v29 = vpop.xlane.xlu1 %1170 }
 0x61e   : > { %4454 = vrcp.f32 %v1171_v29 }
 0x61f   : > { %v1174_v3 = vpop.xlane.xlu0 %1173 }
 0x621   : > { %v1177_v30 = vpop.xlane.xlu1 %1176 }
 0x622   : > { %4456 = vrcp.f32 %v1177_v30 }
 0x623   : > { %v1180_v15 = vpop.xlane.xlu0 %1179 }
 0x624   : > { %4458 = vrcp.f32 %v1180_v15 }
 0x625   : > { %4460 = vrcp.f32 %v1174_v3 }
 0x628   : > { %v4455_v31 = vpop.eup %4454 }
 0x62c   : > { %v4457_v33 = vpop.eup %4456 }
 0x62e   : > { %v4459_v35 = vpop.eup %4458 }
 0x62f   : > { %v4461_v37 = vpop.eup %4460 }
 0x66a   : > { %v4139_v32 = vpop.f32.mrb[8].mxu1 }
 0x66b   : > { %v1225_v34 = vpop.f32.mrb[9].mxu1  ;;  %v1245_v38 = vmul.f32 %v4457_v33, %v4139_v32  ;;  %v1496_v32 = vld [vmem:[#allocation10] sm:$0xff] (!%p3822_p5) }
 0x66c   : > { %v4140_v36 = vpop.f32.mrb[10].mxu1  ;;  %v1241_v42 = vmul.f32 %v4455_v31, %v1225_v34  ;;  %v1500_v33 = vld [vmem:[#allocation10 + $0x20] sm:$0xff] (!%p3822_p5) }
 0x66d   : > { %v1247_v39 = vmul.f32 %v4459_v35, %v4140_v36  ;;  %v1228_v41 = vpop.f32.mrb[11].mxu1 }
 0x66e   : > { %v1243_v43 = vmul.f32 %v4461_v37, %v1228_v41 }
 0x66f   : > { %v1257_v44 = vpack.c.bf16 %v1247_v39, %v1245_v38  ;;  %v1504_v38 = vld [vmem:[#allocation10 + $0x40] sm:$0xff] (!%p3822_p5) }
 0x670   : > { %v1256_v45 = vpack.c.bf16 %v1243_v43, %v1241_v42  ;;  %v1508_v39 = vld [vmem:[#allocation10 + $0x60] sm:$0xff] (!%p3822_p5)  ;;  %v3824_v42 = vcombine.high (!%p3822_p5), %v1496_v32, %v1500_v33  ;;  %v3823_v43 = vcombine.low (!%p3822_p5), %v1496_v32, %v1500_v33 }
 0x672   : > { %1387 = vmatmul.mubr.bf16.vlgmr.msra.gmra.mrb[12].mxu1 %v1256_v45  ;;  %2264 = vmatprep.subr.bf16.mxu1 (!%p3822_p5), %v3824_v42 }
 0x673   : > { %1396 = vmatprep.mubr.bf16.mxu1 %v5018_v28  ;;  %v1434_v28 = vld [vmem:[%s5433_s17 + $0x38] sm:$0xff] (!%p3822_p5)  ;;  %2265 = vmatpush1.bf16.msra.mxu1 (!%p3822_p5), %v3823_v43 }
 0x67a   : > { %1397 = vmatmul.mubr.bf16.gmra.mrb[16].mxu1 %v1257_v44 }
 0x745   : > { %v1388_v49 = vpop.f32.mrb[12].mxu1 }
 0x746   : > { %v1407_v20 = vadd.f32 %v1388_v49, %v1248_v46  ;;  %v1390_v51 = vpop.f32.mrb[13].mxu1  ;;  %v1512_v49 = vld [vmem:[#allocation10 + $0x80] sm:$0xff] (!%p3822_p5) }
 0x747   : > { %v1408_v52 = vadd.f32 %v1390_v51, %v1249_v48  ;;  %v1392_v24 = vpop.f32.mrb[14].mxu1  ;;  %v3832_v48 = vcombine.high (!%p3822_p5), %v1504_v38, %v1508_v39  ;;  %v3831_v51 = vcombine.low (!%p3822_p5), %v1504_v38, %v1508_v39  ;;  %v1600_v39 = vld [vmem:[#allocation10 + $0x340] sm:$0xff] (!%p3822_p5) }
 0x748   : > { %1415 = vst [vmem:[#allocation2] sm:$0xff] %v1407_v20  ;;  %v1409_v53 = vadd.f32 %v1392_v24, %v1250_v50  ;;  %v1394_v54 = vpop.f32.mrb[15].mxu1  ;;  %v1516_v50 = vld [vmem:[#allocation10 + $0xa0] sm:$0xff] (!%p3822_p5) }
 0x749   : > { %1416 = vst [vmem:[#allocation2 + $0x8] sm:$0xff] %v1408_v52  ;;  %v1410_v55 = vadd.f32 %v1394_v54, %v1251_v21  ;;  %2266 = vmatprep.subr.bf16.mxu1 (!%p3822_p5), %v3832_v48  ;;  %v3840_v21 = vcombine.high (!%p3822_p5), %v1512_v49, %v1516_v50  ;;  %v1520_v52 = vld [vmem:[#allocation10 + $0xc0] sm:$0xff] (!%p3822_p5) }
 0x74a   : > { %1417 = vst [vmem:[#allocation2 + $0x10] sm:$0xff] %v1409_v53  ;;  %v1524_v24 = vld [vmem:[#allocation10 + $0xe0] sm:$0xff] (!%p3822_p5)  ;;  %2267 = vmatpush1.bf16.msra.mxu1 (!%p3822_p5), %v3831_v51  ;;  %v3839_v53 = vcombine.low (!%p3822_p5), %v1512_v49, %v1516_v50 }
 0x74b   : > { %1418 = vst [vmem:[#allocation2 + $0x18] sm:$0xff] %v1410_v55  ;;  %v1528_v54 = vld [vmem:[#allocation10 + $0x100] sm:$0xff] (!%p3822_p5)  ;;  %2268 = vmatprep.subr.bf16.mxu1 (!%p3822_p5), %v3840_v21 }
 0x74c   : > { %v1532_v55 = vld [vmem:[#allocation10 + $0x120] sm:$0xff] (!%p3822_p5) }
 0x74d   : > { %v1398_v60 = vpop.f32.mrb[16].mxu1  ;;  %1426 = sbr.rel (%p3822_p5) target bundleno = 2690 (0xa82), region = 84  ;;  %v1616_v49 = vld [vmem:[#allocation10 + $0x3c0] sm:$0xff] (!%p3822_p5) }
 0x74e   : > { %v1411_v62 = vadd.f32 %v1398_v60, %v1252_v56  ;;  %v1400_v63 = vpop.f32.mrb[17].mxu1  ;;  %v3848_v56 = vcombine.high (!%p3822_p5), %v1520_v52, %v1524_v24  ;;  %2269 = vmatpush1.bf16.msra.mxu1 (!%p3822_p5), %v3839_v53  ;;  %v1536_v60 = vld [vmem:[#allocation10 + $0x140] sm:$0xff] (!%p3822_p5) }
 0x74f   : > { %v1412_v1 = vadd.f32 %v1400_v63, %v1253_v59  ;;  %v1402_v2 = vpop.f32.mrb[18].mxu1  ;;  %v1435_v11 = vld [vmem:[#allocation2] sm:$0xff] (!%p3822_p5)  ;;  %v3847_v59 = vcombine.low (!%p3822_p5), %v1520_v52, %v1524_v24  ;;  %v3855_v63 = vcombine.low (!%p3822_p5), %v1528_v54, %v1532_v55 }
 0x750   : > { %1419 = vst [vmem:[#allocation2 + $0x20] sm:$0xff] %v1411_v62  ;;  %v1413_v5 = vadd.f32 %v1402_v2, %v1254_v61  ;;  %v1404_v6 = vpop.f32.mrb[19].mxu1  ;;  %v1436_v40 = vld [vmem:[#allocation2 + $0x8] sm:$0xff] (!%p3822_p5)  ;;  %v5597_v47 = vadd.f32 (!%p3822_p5), %v1435_v11, %v1427_v8  ;;  %v1540_v61 = vld [vmem:[#allocation10 + $0x160] sm:$0xff] (!%p3822_p5)  ;;  %2270 = vmatprep.subr.bf16.mxu1 (!%p3822_p5), %v3848_v56  ;;  %v3856_v62 = vcombine.high (!%p3822_p5), %v1528_v54, %v1532_v55 }
 0x751   : > { %1420 = vst [vmem:[#allocation2 + $0x28] sm:$0xff] %v1412_v1  ;;  %v1414_v7 = vadd.f32 %v1404_v6, %v1255_v0  ;;  %v5601_v14 = vadd.f32 (!%p3822_p5), %v1436_v40, %v1428_v9  ;;  %v1437_v16 = vld [vmem:[#allocation2 + $0x10] sm:$0xff] (!%p3822_p5)  ;;  %v1544_v0 = vld [vmem:[#allocation10 + $0x180] sm:$0xff] (!%p3822_p5)  ;;  %v3864_v2 = vcombine.high (!%p3822_p5), %v1536_v60, %v1540_v61 }
 0x752   : > { %1421 = vst [vmem:[#allocation2 + $0x30] sm:$0xff] %v1413_v5  ;;  %v1438_v17 = vld [vmem:[#allocation2 + $0x18] sm:$0xff] (!%p3822_p5)  ;;  %v1451_v58 = vmul.f32 (!%p3822_p5), %v5597_v47, %v5597_v47  ;;  %v5606_v4 = vadd.f32 (!%p3822_p5), %v1437_v16, %v1429_v12  ;;  %2271 = vmatpush1.bf16.msra.mxu1 (!%p3822_p5), %v3847_v59  ;;  %v1548_v1 = vld [vmem:[#allocation10 + $0x1a0] sm:$0xff] (!%p3822_p5)  ;;  %v3863_v5 = vcombine.low (!%p3822_p5), %v1536_v60, %v1540_v61 }
 0x753   : > { %1422 = vst [vmem:[#allocation2 + $0x38] sm:$0xff] %v1414_v7  ;;  %v5608_v19 = vadd.f32 (!%p3822_p5), %v1438_v17, %v1430_v13  ;;  %v1452_v25 = vmul.f32 (!%p3822_p5), %v5601_v14, %v5601_v14  ;;  %2272 = vmatprep.subr.bf16.mxu1 (!%p3822_p5), %v3856_v62  ;;  %v1552_v6 = vld [vmem:[#allocation10 + $0x1c0] sm:$0xff] (!%p3822_p5)  ;;  %v3872_v8 = vcombine.high (!%p3822_p5), %v1544_v0, %v1548_v1 }
 0x754   : > { %v1453_v3 = vmul.f32 %v5606_v4, %v5606_v4  ;;  %v1556_v7 = vld [vmem:[#allocation10 + $0x1e0] sm:$0xff]  ;;  %v3871_v9 = vcombine.low %v1544_v0, %v1548_v1 }
 0x755   : > { %v1454_v30 = vmul.f32 %v5608_v19, %v5608_v19  ;;  %v1459_v34 = vadd.f32 %v1452_v25, %v1451_v58  ;;  %v3880_v11 = vcombine.high %v1552_v6, %v1556_v7  ;;  %v1560_v40 = vld [vmem:[#allocation10 + $0x200] sm:$0xff]  ;;  %v3879_v13 = vcombine.low %v1552_v6, %v1556_v7 }
 0x756   : > { %2273 = vmatpush1.bf16.msra.mxu1 %v3855_v63  ;;  %v1564_v12 = vld [vmem:[#allocation10 + $0x220] sm:$0xff] }
 0x757   : > { %v1439_v23 = vld [vmem:[#allocation2 + $0x20] sm:$0xff]  ;;  %1460 = vadd.xlane.f32.xlu0 %v1459_v34  ;;  %v1462_v44 = vadd.f32 %v1454_v30, %v1453_v3  ;;  %2274 = vmatprep.subr.bf16.mxu1 %v3864_v2  ;;  %v3887_v58 = vcombine.low %v1560_v40, %v1564_v12  ;;  %v5637_v3 = vld [vmem:[#allocation10 + $0x28] sm:$0xff] }
 0x758   : > { %v1440_v57 = vld [vmem:[#allocation2 + $0x28] sm:$0xff]  ;;  %v5613_v10 = vadd.f32 %v1439_v23, %v1431_v18  ;;  %v1568_v16 = vld [vmem:[#allocation10 + $0x240] sm:$0xff]  ;;  %v3888_v18 = vcombine.high %v1560_v40, %v1564_v12 }
 0x759   : > { %v5615_v26 = vadd.f32 %v1440_v57, %v1432_v22  ;;  %v1441_v29 = vld [vmem:[#allocation2 + $0x30] sm:$0xff]  ;;  %v1572_v17 = vld [vmem:[#allocation10 + $0x260] sm:$0xff]  ;;  %v1505_v40 = vld [vmem:[#allocation10 + $0x48] sm:$0xff] }
 0x75a   : > { %v1442_v15 = vld [vmem:[#allocation2 + $0x38] sm:$0xff]  ;;  %v5623_v31 = vadd.f32 %v1441_v29, %v1433_v27  ;;  %v1455_v35 = vmul.f32 %v5613_v10, %v5613_v10  ;;  %2275 = vmatpush1.bf16.msra.mxu1 %v3863_v5  ;;  %v1576_v22 = vld [vmem:[#allocation10 + $0x280] sm:$0xff]  ;;  %v3896_v57 = vcombine.high %v1568_v16, %v1572_v17  ;;  %v3895_v25 = vcombine.low %v1568_v16, %v1572_v17  ;;  %v5635_v29 = vld [vmem:[#allocation10 + $0x8] sm:$0xff] }
 0x75b   : > { %v1456_v36 = vmul.f32 %v5615_v26, %v5615_v26  ;;  %v5629_v37 = vadd.f32 %v1442_v15, %v1434_v28  ;;  %1463 = vadd.xlane.f32.xlu0 %v1462_v44  ;;  %2276 = vmatprep.subr.bf16.mxu1 %v3872_v8  ;;  %v1580_v23 = vld [vmem:[#allocation10 + $0x2a0] sm:$0xff]  ;;  %v3825_v15 = vcombine.low %v5635_v29, %v5637_v3  ;;  %v1509_v12 = vld [vmem:[#allocation10 + $0x68] sm:$0xff] }
 0x75c   : > { %v1457_v41 = vmul.f32 %v5623_v31, %v5623_v31  ;;  %v1584_v27 = vld [vmem:[#allocation10 + $0x2c0] sm:$0xff]  ;;  %v3904_v30 = vcombine.high %v1576_v22, %v1580_v23  ;;  %v3903_v32 = vcombine.low %v1576_v22, %v1580_v23  ;;  %v3826_v52 = vcombine.high %v5635_v29, %v5637_v3 }
 0x75d   : > { %v1465_v45 = vadd.f32 %v1456_v36, %v1455_v35  ;;  %v1458_v46 = vmul.f32 %v5629_v37, %v5629_v37  ;;  %v1588_v28 = vld [vmem:[#allocation10 + $0x2e0] sm:$0xff]  ;;  %v3834_v22 = vcombine.high %v1505_v40, %v1509_v12 }
 0x75e   : > { %2277 = vmatpush1.bf16.msra.mxu1 %v3871_v9  ;;  %v3912_v33 = vcombine.high %v1584_v27, %v1588_v28  ;;  %v1592_v34 = vld [vmem:[#allocation10 + $0x300] sm:$0xff]  ;;  %v3911_v36 = vcombine.low %v1584_v27, %v1588_v28 }
 0x75f   : > { %1466 = vadd.xlane.f32.xlu1 %v1465_v45  ;;  %v1468_v20 = vadd.f32 %v1458_v46, %v1457_v41  ;;  %2278 = vmatprep.subr.bf16.mxu1 %v3880_v11  ;;  %v1596_v35 = vld [vmem:[#allocation10 + $0x320] sm:$0xff] }
 0x760   : > { %v3920_v38 = vcombine.high %v1592_v34, %v1596_v35  ;;  %v1604_v41 = vld [vmem:[#allocation10 + $0x360] sm:$0xff]  ;;  %v3919_v42 = vcombine.low %v1592_v34, %v1596_v35  ;;  %v1525_v34 = vld [vmem:[#allocation10 + $0xe8] sm:$0xff] }
 0x761   : > { %v3928_v43 = vcombine.high %v1600_v39, %v1604_v41  ;;  %v1608_v44 = vld [vmem:[#allocation10 + $0x380] sm:$0xff]  ;;  %v3927_v46 = vcombine.low %v1600_v39, %v1604_v41  ;;  %v1529_v39 = vld [vmem:[#allocation10 + $0x108] sm:$0xff] }
 0x762   : > { %2279 = vmatpush1.bf16.msra.mxu1 %v3879_v13  ;;  %v1612_v45 = vld [vmem:[#allocation10 + $0x3a0] sm:$0xff]  ;;  %v1533_v41 = vld [vmem:[#allocation10 + $0x128] sm:$0xff] }
 0x763   : > { %1469 = vadd.xlane.f32.xlu1 %v1468_v20  ;;  %2280 = vmatprep.subr.bf16.mxu1 %v3888_v18  ;;  %v3936_v48 = vcombine.high %v1608_v44, %v1612_v45  ;;  %v1620_v50 = vld [vmem:[#allocation10 + $0x3e0] sm:$0xff]  ;;  %v3935_v20 = vcombine.low %v1608_v44, %v1612_v45  ;;  %v3858_v3 = vcombine.high %v1529_v39, %v1533_v41  ;;  %v1545_v45 = vld [vmem:[#allocation10 + $0x188] sm:$0xff] }
 0x764   : > { %v3944_v51 = vcombine.high %v1616_v49, %v1620_v50  ;;  %v3943_v21 = vcombine.low %v1616_v49, %v1620_v50  ;;  %v1553_v50 = vld [vmem:[#allocation10 + $0x1c8] sm:$0xff] }
 0x766   : > { %2281 = vmatpush1.bf16.msra.mxu1 %v3887_v58 }
 0x767   : > { %2282 = vmatprep.subr.bf16.mxu1 %v3896_v57  ;;  %v1513_v57 = vld [vmem:[#allocation10 + $0x88] sm:$0xff] }
 0x76a   : > { %2283 = vmatpush1.bf16.msra.mxu1 %v3895_v25  ;;  %v1517_v25 = vld [vmem:[#allocation10 + $0xa8] sm:$0xff] }
 0x76b   : > { %2284 = vmatprep.subr.bf16.mxu1 %v3904_v30  ;;  %v3833_v30 = vcombine.low %v1505_v40, %v1509_v12  ;;  %v4470_v40 = vld [vmem:[#allocation12 + $0x20] ss:$8 sps:$4 sm:$0xff]  }
 0x76e   : > { %2285 = vmatpush1.bf16.msra.mxu1 %v3903_v32  ;;  %v3842_v32 = vcombine.high %v1513_v57, %v1517_v25 }
 0x76f   : > { %2286 = vmatprep.subr.bf16.mxu1 %v3912_v33  ;;  %v1521_v33 = vld [vmem:[#allocation10 + $0xc8] sm:$0xff] }
 0x770   : > { %v3849_v29 = vcombine.low %v1521_v33, %v1525_v34 }
 0x772   : > { %2287 = vmatpush1.bf16.msra.mxu1 %v3911_v36  ;;  %v3841_v36 = vcombine.low %v1513_v57, %v1517_v25  ;;  %v4473_v57 = vld [vmem:[#allocation12 + $0x30] ss:$8 sps:$4 sm:$0xff]  }
 0x773   : > { %2288 = vmatprep.subr.bf16.mxu1 %v3920_v38  ;;  %v3850_v38 = vcombine.high %v1521_v33, %v1525_v34  ;;  %v4476_v33 = vld [vmem:[#allocation12 + $0x40] ss:$8 sps:$4 sm:$0xff]  }
 0x776   : > { %2289 = vmatpush1.bf16.msra.mxu1 %v3919_v42  ;;  %v1541_v42 = vld [vmem:[#allocation10 + $0x168] sm:$0xff] }
 0x777   : > { %2290 = vmatprep.subr.bf16.mxu1 %v3928_v43  ;;  %v3857_v43 = vcombine.low %v1529_v39, %v1533_v41  ;;  %v4477_v39 = vld [vmem:[#allocation12 + $0x54] ss:$8 sps:$4 sm:$0xff]  }
 0x77a   : > { %2291 = vmatpush1.bf16.msra.mxu1 %v3927_v46  ;;  %v1549_v46 = vld [vmem:[#allocation10 + $0x1a8] sm:$0xff] }
 0x77b   : > { %2292 = vmatprep.subr.bf16.mxu1 %v3936_v48  ;;  %v3874_v49 = vcombine.high %v1545_v45, %v1549_v46 }
 0x77e   : > { %2293 = vmatpush1.bf16.msra.mxu1 %v3935_v20  ;;  %v1557_v20 = vld [vmem:[#allocation10 + $0x1e8] sm:$0xff] }
 0x77f   : > { %2294 = vmatprep.subr.bf16.mxu1 %v3944_v51  ;;  %v3873_v51 = vcombine.low %v1545_v45, %v1549_v46  ;;  %v4482_v45 = vld [vmem:[#allocation12 + $0x60] ss:$8 sps:$4 sm:$0xff]  }
 0x782   : > { %2295 = vmatpush1.bf16.msra.mxu1 %v3943_v21  ;;  %v3882_v21 = vcombine.high %v1553_v50, %v1557_v20 }
 0x783   : > { %2317 = vmatprep.subr.bf16.mxu1 %v3826_v52  ;;  %v1561_v52 = vld [vmem:[#allocation10 + $0x208] sm:$0xff] }
 0x7e4   : > { %v1461_v24 = vpop.xlane.xlu0 %1460 }
 0x7e5   : > { %v1472_v53 = vmul.f32 0.00390625, %v1461_v24  ;;  %v1565_v24 = vld [vmem:[#allocation10 + $0x228] sm:$0xff] }
 0x7e7   : > { %v1476_v55 = vadd.f32 1.1920929e-07, %v1472_v53  ;;  %v3881_v53 = vcombine.low %v1553_v50, %v1557_v20  ;;  %v4483_v50 = vld [vmem:[#allocation12 + $0x74] ss:$8 sps:$4 sm:$0xff]  }
 0x7e8   : > { %v1464_v59 = vpop.xlane.xlu0 %1463 }
 0x7e9   : > { %v1473_v60 = vmul.f32 0.00390625, %v1464_v59  ;;  %4654 = vrsqrt.f32 %v1476_v55  ;;  %v1569_v55 = vld [vmem:[#allocation10 + $0x248] sm:$0xff] }
 0x7ea   : > { %v4462_v59 = vld [vmem:[#allocation12 + $0x4] ss:$8 sps:$4 sm:$0xff]  }
 0x7eb   : > { %v1477_v63 = vadd.f32 1.1920929e-07, %v1473_v60  ;;  %v3889_v60 = vcombine.low %v1561_v52, %v1565_v24  ;;  %3324 = vmatprep.subr.bf16.mxu0 %v4462_v59  ;;  %v1514_v59 = vld [vmem:[#allocation10 + $0x90] sm:$0xff] }
 0x7ec   : > { %v1467_v54 = vpop.xlane.xlu1 %1466 }
 0x7ed   : > { %v1474_v56 = vmul.f32 0.00390625, %v1467_v54  ;;  %v3890_v54 = vcombine.high %v1561_v52, %v1565_v24  ;;  %v1506_v52 = vld [vmem:[#allocation10 + $0x50] sm:$0xff] }
 0x7ee   : > { %v1510_v24 = vld [vmem:[#allocation10 + $0x70] sm:$0xff] }
 0x7ef   : > { %v1478_v61 = vadd.f32 1.1920929e-07, %v1474_v56  ;;  %v1573_v56 = vld [vmem:[#allocation10 + $0x268] sm:$0xff] }
 0x7f0   : > { %v1470_v62 = vpop.xlane.xlu1 %1469 }
 0x7f1   : > { %4656 = vrsqrt.f32 %v1478_v61  ;;  %v1475_v0 = vmul.f32 0.00390625, %v1470_v62  ;;  %v4464_v61 = vld [vmem:[#allocation12] ss:$8 sps:$4 sm:$0xff]   ;;  %v3898_v62 = vcombine.high %v1569_v55, %v1573_v56 }
 0x7f2   : > { %4658 = vrsqrt.f32 %v1477_v63  ;;  %v1577_v63 = vld [vmem:[#allocation10 + $0x288] sm:$0xff]  ;;  %3325 = vmatpush1.bf16.msra.mxu0 %v4464_v61  ;;  %v4489_v61 = vld [vmem:[#allocation12 + $0x94] ss:$8 sps:$4 sm:$0xff]  }
 0x7f3   : > { %v1479_v1 = vadd.f32 1.1920929e-07, %v1475_v0  ;;  %v4655_v2 = vpop.eup %4654  ;;  %v1581_v0 = vld [vmem:[#allocation10 + $0x2a8] sm:$0xff] }
 0x7f4   : > { %v1485_v7 = vmul.f32 %v4655_v2, %v5601_v14  ;;  %v1484_v9 = vmul.f32 %v4655_v2, %v5597_v47  ;;  %v3897_v2 = vcombine.low %v1569_v55, %v1573_v56  ;;  %v4488_v55 = vld [vmem:[#allocation12 + $0x80] ss:$8 sps:$4 sm:$0xff]   ;;  %v3836_v56 = vcombine.high %v1506_v52, %v1510_v24 }
 0x7f5   : > { %4660 = vrsqrt.f32 %v1479_v1  ;;  %v4465_v1 = vld [vmem:[#allocation12 + $0x14] ss:$8 sps:$4 sm:$0xff]  }
 0x7f6   : > { %3326 = vmatprep.subr.bf16.mxu0 %v4465_v1 }
 0x7fb   : > { %v4657_v5 = vpop.eup %4656 }
 0x7fc   : > { %v4659_v6 = vpop.eup %4658  ;;  %v1489_v13 = vmul.f32 %v4657_v5, %v5615_v26  ;;  %v1488_v27 = vmul.f32 %v4657_v5, %v5613_v10  ;;  %v4467_v5 = vld [vmem:[#allocation12 + $0x10] ss:$8 sps:$4 sm:$0xff]  }
 0x7fd   : > { %v1487_v8 = vmul.f32 %v4659_v6, %v5608_v19  ;;  %v1486_v11 = vmul.f32 %v4659_v6, %v5606_v4  ;;  %v3906_v6 = vcombine.high %v1577_v63, %v1581_v0  ;;  %3327 = vmatpush1.bf16.msra.mxu0 %v4467_v5  ;;  %v1526_v5 = vld [vmem:[#allocation10 + $0xf0] sm:$0xff] }
 0x7ff   : > { %v4661_v16 = vpop.eup %4660  ;;  %v5648_v17 = vpack.c.bf16 %v1487_v8, %v1485_v7  ;;  %v5650_v18 = vpack.c.bf16 %v1486_v11, %v1484_v9  ;;  %v1585_v7 = vld [vmem:[#allocation10 + $0x2c8] sm:$0xff]  ;;  %v3905_v11 = vcombine.low %v1577_v63, %v1581_v0  ;;  %v4491_v63 = vld [vmem:[#allocation12 + $0x90] ss:$8 sps:$4 sm:$0xff]  }
 0x800   : > { %v1491_v58 = vmul.f32 %v4661_v16, %v5629_v37  ;;  %v1490_v28 = vmul.f32 %v4661_v16, %v5623_v31  ;;  %v1589_v8 = vld [vmem:[#allocation10 + $0x2e8] sm:$0xff] }
 0x801   : > { %2296 = vmatprep.mubr.bf16.mxu1 %v5648_v17  ;;  %v4468_v9 = vld [vmem:[#allocation12 + $0x24] ss:$8 sps:$4 sm:$0xff]   ;;  %v3914_v12 = vcombine.high %v1585_v7, %v1589_v8 }
 0x802   : > { %v5654_v23 = vpack.c.bf16 %v1491_v58, %v1489_v13  ;;  %2297 = vmatmul.mubr.bf16.vlgmr.msra.gmra.mrb[0].mxu1 %v5650_v18  ;;  %v5663_v35 = vpack.c.bf16 %v1490_v28, %v1488_v27  ;;  %3328 = vmatprep.subr.bf16.mxu0 %v4468_v9  ;;  %v1593_v13 = vld [vmem:[#allocation10 + $0x308] sm:$0xff]  ;;  %v4471_v58 = vld [vmem:[#allocation12 + $0x34] ss:$8 sps:$4 sm:$0xff]  }
 0x803   : > { %2318 = vmatpush1.bf16.msra.mxu1 %v3825_v15  ;;  %v1537_v15 = vld [vmem:[#allocation10 + $0x148] sm:$0xff]  ;;  %3329 = vmatpush1.bf16.msra.mxu0 %v4470_v40  ;;  %v1530_v9 = vld [vmem:[#allocation10 + $0x110] sm:$0xff] }
 0x804   : > { %2306 = vmatprep.mubr.bf16.mxu1 %v5654_v23  ;;  %2319 = vmatprep.subr.bf16.mxu1 %v3834_v22  ;;  %v3866_v44 = vcombine.high %v1537_v15, %v1541_v42  ;;  %v3865_v48 = vcombine.low %v1537_v15, %v1541_v42  ;;  %v1597_v16 = vld [vmem:[#allocation10 + $0x328] sm:$0xff]  ;;  %v3913_v22 = vcombine.low %v1585_v7, %v1589_v8  ;;  %v4495_v40 = vld [vmem:[#allocation12 + $0xb4] ss:$8 sps:$4 sm:$0xff]  }
 0x805   : > { %v3922_v25 = vcombine.high %v1593_v13, %v1597_v16  ;;  %3330 = vmatprep.subr.bf16.mxu0 %v4471_v58  ;;  %v1601_v27 = vld [vmem:[#allocation10 + $0x348] sm:$0xff] }
 0x806   : > { %v1605_v28 = vld [vmem:[#allocation10 + $0x368] sm:$0xff] }
 0x807   : > { %2320 = vmatpush1.bf16.msra.mxu1 %v3833_v30  ;;  %3331 = vmatpush1.bf16.msra.mxu0 %v4473_v57  ;;  %v4474_v30 = vld [vmem:[#allocation12 + $0x44] ss:$8 sps:$4 sm:$0xff]   ;;  %v3930_v34 = vcombine.high %v1601_v27, %v1605_v28  ;;  %v3929_v41 = vcombine.low %v1601_v27, %v1605_v28  ;;  %v1542_v57 = vld [vmem:[#allocation10 + $0x170] sm:$0xff] }
 0x808   : > { %2321 = vmatprep.subr.bf16.mxu1 %v3842_v32  ;;  %v3921_v32 = vcombine.low %v1593_v13, %v1597_v16  ;;  %3332 = vmatprep.subr.bf16.mxu0 %v4474_v30  ;;  %v1617_v15 = vld [vmem:[#allocation10 + $0x3c8] sm:$0xff]  ;;  %v4501_v27 = vld [vmem:[#allocation12 + $0xd4] ss:$8 sps:$4 sm:$0xff]  }
 0x809   : > { %v1621_v42 = vld [vmem:[#allocation10 + $0x3e8] sm:$0xff] }
 0x80a   : > { %2307 = vmatmul.mubr.bf16.gmra.mrb[4].mxu1 %v5663_v35  ;;  %v3946_v46 = vcombine.high %v1617_v15, %v1621_v42  ;;  %v3945_v20 = vcombine.low %v1617_v15, %v1621_v42  ;;  %v4492_v0 = vld [vmem:[#allocation12 + $0xa4] ss:$8 sps:$4 sm:$0xff]   ;;  %v4506_v15 = vld [vmem:[#allocation12 + $0xe0] ss:$8 sps:$4 sm:$0xff]  }
 0x80b   : > { %2322 = vmatpush1.bf16.msra.mxu1 %v3841_v36  ;;  %2349 = vmatprep.mubr.bf16.mxu1 %v5648_v17  ;;  %v1609_v36 = vld [vmem:[#allocation10 + $0x388] sm:$0xff] }
 0x80c   : > { %2323 = vmatprep.subr.bf16.mxu1 %v3850_v38  ;;  %v1613_v38 = vld [vmem:[#allocation10 + $0x3a8] sm:$0xff]  ;;  %3333 = vmatpush1.bf16.msra.mxu0 %v4476_v33  ;;  %v1550_v33 = vld [vmem:[#allocation10 + $0x1b0] sm:$0xff] }
 0x80d   : > { %3334 = vmatprep.subr.bf16.mxu0 %v4477_v39  ;;  %v4498_v13 = vld [vmem:[#allocation12 + $0xc4] ss:$8 sps:$4 sm:$0xff]   ;;  %v1554_v39 = vld [vmem:[#allocation10 + $0x1d0] sm:$0xff] }
 0x80f   : > { %2324 = vmatpush1.bf16.msra.mxu1 %v3849_v29  ;;  %v4479_v29 = vld [vmem:[#allocation12 + $0x50] ss:$8 sps:$4 sm:$0xff]  }
 0x810   : > { %2325 = vmatprep.subr.bf16.mxu1 %v3858_v3  ;;  %v3938_v3 = vcombine.high %v1609_v36, %v1613_v38  ;;  %3335 = vmatpush1.bf16.msra.mxu0 %v4479_v29  ;;  %v4504_v29 = vld [vmem:[#allocation12 + $0xe4] ss:$8 sps:$4 sm:$0xff]  }
 0x813   : > { %2326 = vmatpush1.bf16.msra.mxu1 %v3857_v43  ;;  %v4480_v43 = vld [vmem:[#allocation12 + $0x64] ss:$8 sps:$4 sm:$0xff]  }
 0x814   : > { %2327 = vmatprep.subr.bf16.mxu1 %v3866_v44  ;;  %v3937_v44 = vcombine.low %v1609_v36, %v1613_v38  ;;  %3336 = vmatprep.subr.bf16.mxu0 %v4480_v43  ;;  %v1562_v43 = vld [vmem:[#allocation10 + $0x210] sm:$0xff] }
 0x815   : > { %3337 = vmatpush1.bf16.msra.mxu0 %v4482_v45  ;;  %v4507_v45 = vld [vmem:[#allocation12 + $0xf4] ss:$8 sps:$4 sm:$0xff]  }
 0x816   : > { %3338 = vmatprep.subr.bf16.mxu0 %v4483_v50  ;;  %v1570_v50 = vld [vmem:[#allocation10 + $0x250] sm:$0xff] }
 0x817   : > { %2328 = vmatpush1.bf16.msra.mxu1 %v3865_v48  ;;  %v1498_v48 = vld [vmem:[#allocation10 + $0x10] sm:$0xff] }
 0x818   : > { %2329 = vmatprep.subr.bf16.mxu1 %v3874_v49  ;;  %v1502_v49 = vld [vmem:[#allocation10 + $0x30] sm:$0xff] }
 0x81b   : > { %2330 = vmatpush1.bf16.msra.mxu1 %v3873_v51  ;;  %v4485_v51 = vld [vmem:[#allocation12 + $0x70] ss:$8 sps:$4 sm:$0xff]  }
 0x81c   : > { %2331 = vmatprep.subr.bf16.mxu1 %v3882_v21  ;;  %v3828_v21 = vcombine.high %v1498_v48, %v1502_v49  ;;  %3339 = vmatpush1.bf16.msra.mxu0 %v4485_v51  ;;  %v4512_v51 = vld [vmem:[#allocation12 + $0x104] ss:$8 sps:$4 sm:$0xff]  }
 0x81f   : > { %2332 = vmatpush1.bf16.msra.mxu1 %v3881_v53  ;;  %v4486_v53 = vld [vmem:[#allocation12 + $0x84] ss:$8 sps:$4 sm:$0xff]  }
 0x820   : > { %2333 = vmatprep.subr.bf16.mxu1 %v3890_v54  ;;  %v3827_v54 = vcombine.low %v1498_v48, %v1502_v49  ;;  %3340 = vmatprep.subr.bf16.mxu0 %v4486_v53  ;;  %v4509_v48 = vld [vmem:[#allocation12 + $0xf0] ss:$8 sps:$4 sm:$0xff]  }
 0x821   : > { %3341 = vmatpush1.bf16.msra.mxu0 %v4488_v55  ;;  %v1582_v53 = vld [vmem:[#allocation10 + $0x2b0] sm:$0xff] }
 0x822   : > { %3342 = vmatprep.subr.bf16.mxu0 %v4489_v61 }
 0x823   : > { %2334 = vmatpush1.bf16.msra.mxu1 %v3889_v60  ;;  %v1518_v60 = vld [vmem:[#allocation10 + $0xb0] sm:$0xff] }
 0x824   : > { %2335 = vmatprep.subr.bf16.mxu1 %v3898_v62  ;;  %v3835_v62 = vcombine.low %v1506_v52, %v1510_v24  ;;  %v3844_v1 = vcombine.high %v1514_v59, %v1518_v60  ;;  %v3843_v7 = vcombine.low %v1514_v59, %v1518_v60  ;;  %v1578_v24 = vld [vmem:[#allocation10 + $0x290] sm:$0xff] }
 0x825   : > { %3343 = vmatpush1.bf16.msra.mxu0 %v4491_v63  ;;  %v3908_v55 = vcombine.high %v1578_v24, %v1582_v53  ;;  %v1590_v59 = vld [vmem:[#allocation10 + $0x2f0] sm:$0xff]  ;;  %v3907_v60 = vcombine.low %v1578_v24, %v1582_v53  ;;  %v1555_v24 = vld [vmem:[#allocation10 + $0x1d8] sm:$0xff] }
 0x826   : > { %3344 = vmatprep.subr.bf16.mxu0 %v4492_v0  ;;  %v1598_v63 = vld [vmem:[#allocation10 + $0x330] sm:$0xff]  ;;  %v1559_v53 = vld [vmem:[#allocation10 + $0x1f8] sm:$0xff] }
 0x827   : > { %2336 = vmatpush1.bf16.msra.mxu1 %v3897_v2  ;;  %v1522_v2 = vld [vmem:[#allocation10 + $0xd0] sm:$0xff] }
 0x828   : > { %2337 = vmatprep.subr.bf16.mxu1 %v3906_v6  ;;  %v4494_v6 = vld [vmem:[#allocation12 + $0xa0] ss:$8 sps:$4 sm:$0xff]   ;;  %v3852_v8 = vcombine.high %v1522_v2, %v1526_v5  ;;  %v3851_v16 = vcombine.low %v1522_v2, %v1526_v5  ;;  %v1602_v2 = vld [vmem:[#allocation10 + $0x350] sm:$0xff] }
 0x829   : > { %3345 = vmatpush1.bf16.msra.mxu0 %v4494_v6  ;;  %v1606_v5 = vld [vmem:[#allocation10 + $0x370] sm:$0xff] }
 0x82a   : > { %3346 = vmatprep.subr.bf16.mxu0 %v4495_v40 }
 0x82b   : > { %2338 = vmatpush1.bf16.msra.mxu1 %v3905_v11  ;;  %v1534_v11 = vld [vmem:[#allocation10 + $0x130] sm:$0xff] }
 0x82c   : > { %2339 = vmatprep.subr.bf16.mxu1 %v3914_v12  ;;  %v4497_v12 = vld [vmem:[#allocation12 + $0xb0] ss:$8 sps:$4 sm:$0xff]   ;;  %v3860_v58 = vcombine.high %v1530_v9, %v1534_v11  ;;  %v3859_v28 = vcombine.low %v1530_v9, %v1534_v11  ;;  %v3931_v11 = vcombine.low %v1602_v2, %v1606_v5 }
 0x82d   : > { %3347 = vmatpush1.bf16.msra.mxu0 %v4497_v12  ;;  %v1614_v9 = vld [vmem:[#allocation10 + $0x3b0] sm:$0xff] }
 0x82e   : > { %3348 = vmatprep.subr.bf16.mxu0 %v4498_v13  ;;  %v1618_v12 = vld [vmem:[#allocation10 + $0x3d0] sm:$0xff] }
 0x82f   : > { %2340 = vmatpush1.bf16.msra.mxu1 %v3913_v22  ;;  %v1538_v22 = vld [vmem:[#allocation10 + $0x150] sm:$0xff] }
 0x830   : > { %2341 = vmatprep.subr.bf16.mxu1 %v3922_v25  ;;  %v4500_v25 = vld [vmem:[#allocation12 + $0xc0] ss:$8 sps:$4 sm:$0xff]   ;;  %v3868_v30 = vcombine.high %v1538_v22, %v1542_v57  ;;  %v3867_v36 = vcombine.low %v1538_v22, %v1542_v57  ;;  %v1622_v13 = vld [vmem:[#allocation10 + $0x3f0] sm:$0xff]  ;;  %v1499_v22 = vld [vmem:[#allocation10 + $0x18] sm:$0xff] }
 0x831   : > { %3349 = vmatpush1.bf16.msra.mxu0 %v4500_v25  ;;  %v1503_v57 = vld [vmem:[#allocation10 + $0x38] sm:$0xff]  ;;  %v3947_v25 = vcombine.low %v1618_v12, %v1622_v13 }
 0x832   : > { %3350 = vmatprep.subr.bf16.mxu0 %v4501_v27  ;;  %v3830_v27 = vcombine.high %v1499_v22, %v1503_v57 }
 0x833   : > { %2342 = vmatpush1.bf16.msra.mxu1 %v3921_v32  ;;  %v1546_v32 = vld [vmem:[#allocation10 + $0x190] sm:$0xff] }
 0x834   : > { %2343 = vmatprep.subr.bf16.mxu1 %v3930_v34  ;;  %v4503_v34 = vld [vmem:[#allocation12 + $0xd0] ss:$8 sps:$4 sm:$0xff]   ;;  %v3876_v38 = vcombine.high %v1546_v32, %v1550_v33 }
 0x835   : > { %3351 = vmatpush1.bf16.msra.mxu0 %v4503_v34  ;;  %v1515_v34 = vld [vmem:[#allocation10 + $0x98] sm:$0xff] }
 0x836   : > { %3352 = vmatprep.subr.bf16.mxu0 %v4504_v29  ;;  %v1527_v29 = vld [vmem:[#allocation10 + $0xf8] sm:$0xff] }
 0x837   : > { %2344 = vmatpush1.bf16.msra.mxu1 %v3929_v41  ;;  %v1558_v41 = vld [vmem:[#allocation10 + $0x1f0] sm:$0xff] }
 0x838   : > { %2345 = vmatprep.subr.bf16.mxu1 %v3938_v3  ;;  %v3875_v3 = vcombine.low %v1546_v32, %v1550_v33  ;;  %v3884_v42 = vcombine.high %v1554_v39, %v1558_v41  ;;  %v3829_v32 = vcombine.low %v1499_v22, %v1503_v57  ;;  %v1607_v22 = vld [vmem:[#allocation10 + $0x378] sm:$0xff] }
 0x839   : > { %3353 = vmatpush1.bf16.msra.mxu0 %v4506_v15 }
 0x83a   : > { %3354 = vmatprep.subr.bf16.mxu0 %v4507_v45 }
 0x83b   : > { %2346 = vmatpush1.bf16.msra.mxu1 %v3937_v44  ;;  %v1566_v44 = vld [vmem:[#allocation10 + $0x230] sm:$0xff] }
 0x83c   : > { %2347 = vmatprep.subr.bf16.mxu1 %v3946_v46  ;;  %v3883_v46 = vcombine.low %v1554_v39, %v1558_v41  ;;  %v3892_v49 = vcombine.high %v1562_v43, %v1566_v44  ;;  %v1523_v41 = vld [vmem:[#allocation10 + $0xd8] sm:$0xff] }
 0x83d   : > { %3355 = vmatpush1.bf16.msra.mxu0 %v4509_v48  ;;  %v3854_v15 = vcombine.high %v1523_v41, %v1527_v29  ;;  %v1543_v48 = vld [vmem:[#allocation10 + $0x178] sm:$0xff] }
 0x83e   : > { %3377 = vmatprep.subr.bf16.mxu0 %v4512_v51  ;;  %v1551_v51 = vld [vmem:[#allocation10 + $0x1b8] sm:$0xff] }
 0x83f   : > { %2348 = vmatpush1.bf16.msra.mxu1 %v3945_v20  ;;  %v1574_v20 = vld [vmem:[#allocation10 + $0x270] sm:$0xff] }
 0x840   : > { %2370 = vmatprep.subr.bf16.mxu1 %v3828_v21  ;;  %v3891_v21 = vcombine.low %v1562_v43, %v1566_v44  ;;  %v3900_v52 = vcombine.high %v1570_v50, %v1574_v20  ;;  %v1535_v43 = vld [vmem:[#allocation10 + $0x138] sm:$0xff]  ;;  %v3853_v44 = vcombine.low %v1523_v41, %v1527_v29 }
 0x842   : > { %2350 = vmatmul.mubr.bf16.vlgmr.msra.gmra.mrb[8].mxu1 %v5650_v18 }
 0x843   : > { %2359 = vmatprep.mubr.bf16.mxu1 %v5654_v23  ;;  %2371 = vmatpush1.bf16.msra.mxu1 %v3827_v54  ;;  %v3899_v54 = vcombine.low %v1570_v50, %v1574_v20  ;;  %v1547_v20 = vld [vmem:[#allocation10 + $0x198] sm:$0xff] }
 0x844   : > { %2372 = vmatprep.subr.bf16.mxu1 %v3836_v56  ;;  %v1586_v56 = vld [vmem:[#allocation10 + $0x2d0] sm:$0xff] }
 0x845   : > { %v3916_v61 = vcombine.high %v1586_v56, %v1590_v59  ;;  %v3915_v0 = vcombine.low %v1586_v56, %v1590_v59  ;;  %v1567_v56 = vld [vmem:[#allocation10 + $0x238] sm:$0xff]  ;;  %v3885_v59 = vcombine.low %v1555_v24, %v1559_v53 }
 0x847   : > { %2373 = vmatpush1.bf16.msra.mxu1 %v3835_v62  ;;  %v1594_v62 = vld [vmem:[#allocation10 + $0x310] sm:$0xff] }
 0x848   : > { %2374 = vmatprep.subr.bf16.mxu1 %v3844_v1  ;;  %v3924_v1 = vcombine.high %v1594_v62, %v1598_v63  ;;  %v3923_v6 = vcombine.low %v1594_v62, %v1598_v63  ;;  %v1575_v62 = vld [vmem:[#allocation10 + $0x278] sm:$0xff] }
 0x84a   : > { %2360 = vmatmul.mubr.bf16.gmra.mrb[12].mxu1 %v5663_v35 }
 0x84b   : > { %2375 = vmatpush1.bf16.msra.mxu1 %v3843_v7  ;;  %2402 = vmatprep.mubr.bf16.mxu1 %v5648_v17  ;;  %v3932_v7 = vcombine.high %v1602_v2, %v1606_v5  ;;  %v1583_v2 = vld [vmem:[#allocation10 + $0x2b8] sm:$0xff] }
 0x84c   : > { %2376 = vmatprep.subr.bf16.mxu1 %v3852_v8  ;;  %v1610_v8 = vld [vmem:[#allocation10 + $0x390] sm:$0xff] }
 0x84d   : > { %v3940_v40 = vcombine.high %v1610_v8, %v1614_v9 }
 0x84f   : > { %2377 = vmatpush1.bf16.msra.mxu1 %v3851_v16  ;;  %v3939_v16 = vcombine.low %v1610_v8, %v1614_v9  ;;  %v1591_v8 = vld [vmem:[#allocation10 + $0x2f8] sm:$0xff] }
 0x850   : > { %2378 = vmatprep.subr.bf16.mxu1 %v3860_v58  ;;  %v3948_v58 = vcombine.high %v1618_v12, %v1622_v13  ;;  %v1599_v12 = vld [vmem:[#allocation10 + $0x338] sm:$0xff] }
 0x853   : > { %2379 = vmatpush1.bf16.msra.mxu1 %v3859_v28  ;;  %v1507_v28 = vld [vmem:[#allocation10 + $0x58] sm:$0xff] }
 0x854   : > { %2380 = vmatprep.subr.bf16.mxu1 %v3868_v30  ;;  %v1511_v30 = vld [vmem:[#allocation10 + $0x78] sm:$0xff] }
 0x855   : > { %v3838_v33 = vcombine.high %v1507_v28, %v1511_v30 }
 0x857   : > { %2381 = vmatpush1.bf16.msra.mxu1 %v3867_v36  ;;  %v1519_v36 = vld [vmem:[#allocation10 + $0xb8] sm:$0xff] }
 0x858   : > { %2382 = vmatprep.subr.bf16.mxu1 %v3876_v38  ;;  %v3837_v38 = vcombine.low %v1507_v28, %v1511_v30  ;;  %v3846_v39 = vcombine.high %v1515_v34, %v1519_v36  ;;  %v1615_v28 = vld [vmem:[#allocation10 + $0x3b8] sm:$0xff] }
 0x85b   : > { %2383 = vmatpush1.bf16.msra.mxu1 %v3875_v3  ;;  %v3845_v3 = vcombine.low %v1515_v34, %v1519_v36  ;;  %v1623_v34 = vld [vmem:[#allocation10 + $0x3f8] sm:$0xff] }
 0x85c   : > { %2384 = vmatprep.subr.bf16.mxu1 %v3884_v42  ;;  %v1531_v42 = vld [vmem:[#allocation10 + $0x118] sm:$0xff] }
 0x85d   : > { %v3862_v45 = vcombine.high %v1531_v42, %v1535_v43 }
 0x85f   : > { %2385 = vmatpush1.bf16.msra.mxu1 %v3883_v46  ;;  %v1539_v46 = vld [vmem:[#allocation10 + $0x158] sm:$0xff] }
 0x860   : > { %2386 = vmatprep.subr.bf16.mxu1 %v3892_v49  ;;  %v3861_v49 = vcombine.low %v1531_v42, %v1535_v43  ;;  %v3870_v50 = vcombine.high %v1539_v46, %v1543_v48 }
 0x863   : > { %2387 = vmatpush1.bf16.msra.mxu1 %v3891_v21  ;;  %v3869_v21 = vcombine.low %v1539_v46, %v1543_v48 }
 0x864   : > { %2388 = vmatprep.subr.bf16.mxu1 %v3900_v52  ;;  %v3878_v52 = vcombine.high %v1547_v20, %v1551_v51 }
 0x867   : > { %2389 = vmatpush1.bf16.msra.mxu1 %v3899_v54  ;;  %v3877_v54 = vcombine.low %v1547_v20, %v1551_v51 }
 0x868   : > { %2390 = vmatprep.subr.bf16.mxu1 %v3908_v55  ;;  %v1563_v55 = vld [vmem:[#allocation10 + $0x218] sm:$0xff] }
 0x869   : > { %v3893_v63 = vcombine.low %v1563_v55, %v1567_v56 }
 0x86b   : > { %2391 = vmatpush1.bf16.msra.mxu1 %v3907_v60  ;;  %v3894_v60 = vcombine.high %v1563_v55, %v1567_v56  ;;  %v4513_v56 = vld [vmem:[#allocation12 + $0x110] ss:$8 sps:$4 sm:$0xff]  }
 0x86c   : > { %2392 = vmatprep.subr.bf16.mxu1 %v3916_v61  ;;  %v1571_v61 = vld [vmem:[#allocation10 + $0x258] sm:$0xff] }
 0x86d   : > { %v3901_v5 = vcombine.low %v1571_v61, %v1575_v62 }
 0x86f   : > { %2393 = vmatpush1.bf16.msra.mxu1 %v3915_v0  ;;  %v3902_v0 = vcombine.high %v1571_v61, %v1575_v62  ;;  %v4518_v61 = vld [vmem:[#allocation12 + $0x124] ss:$8 sps:$4 sm:$0xff]  }
 0x870   : > { %2394 = vmatprep.subr.bf16.mxu1 %v3924_v1  ;;  %v1579_v1 = vld [vmem:[#allocation10 + $0x298] sm:$0xff] }
 0x871   : > { %v3909_v9 = vcombine.low %v1579_v1, %v1583_v2 }
 0x873   : > { %2395 = vmatpush1.bf16.msra.mxu1 %v3923_v6  ;;  %v3910_v6 = vcombine.high %v1579_v1, %v1583_v2  ;;  %v4516_v1 = vld [vmem:[#allocation12 + $0x120] ss:$8 sps:$4 sm:$0xff]  }
 0x874   : > { %2396 = vmatprep.subr.bf16.mxu1 %v3932_v7  ;;  %v1587_v7 = vld [vmem:[#allocation10 + $0x2d8] sm:$0xff] }
 0x875   : > { %v3917_v13 = vcombine.low %v1587_v7, %v1591_v8 }
 0x877   : > { %2397 = vmatpush1.bf16.msra.mxu1 %v3931_v11  ;;  %v3918_v11 = vcombine.high %v1587_v7, %v1591_v8  ;;  %v4524_v7 = vld [vmem:[#allocation12 + $0x144] ss:$8 sps:$4 sm:$0xff]   ;;  %v4522_v8 = vld [vmem:[#allocation12 + $0x140] ss:$8 sps:$4 sm:$0xff]  }
 0x878   : > { %2398 = vmatprep.subr.bf16.mxu1 %v3940_v40  ;;  %v1595_v40 = vld [vmem:[#allocation10 + $0x318] sm:$0xff] }
 0x879   : > { %v3925_v57 = vcombine.low %v1595_v40, %v1599_v12 }
 0x87b   : > { %2399 = vmatpush1.bf16.msra.mxu1 %v3939_v16  ;;  %v3926_v16 = vcombine.high %v1595_v40, %v1599_v12  ;;  %v4530_v40 = vld [vmem:[#allocation12 + $0x164] ss:$8 sps:$4 sm:$0xff]   ;;  %v4528_v12 = vld [vmem:[#allocation12 + $0x160] ss:$8 sps:$4 sm:$0xff]  }
 0x87c   : > { %2400 = vmatprep.subr.bf16.mxu1 %v3948_v58  ;;  %v1603_v58 = vld [vmem:[#allocation10 + $0x358] sm:$0xff] }
 0x87d   : > { %v3933_v30 = vcombine.low %v1603_v58, %v1607_v22 }
 0x87f   : > { %2401 = vmatpush1.bf16.msra.mxu1 %v3947_v25  ;;  %v3934_v25 = vcombine.high %v1603_v58, %v1607_v22  ;;  %v4536_v58 = vld [vmem:[#allocation12 + $0x184] ss:$8 sps:$4 sm:$0xff]   ;;  %v4534_v22 = vld [vmem:[#allocation12 + $0x180] ss:$8 sps:$4 sm:$0xff]  }
 0x880   : > { %2423 = vmatprep.subr.bf16.mxu1 %v3830_v27  ;;  %v1611_v27 = vld [vmem:[#allocation10 + $0x398] sm:$0xff] }
 0x881   : > { %v3941_v36 = vcombine.low %v1611_v27, %v1615_v28 }
 0x882   : > { %2403 = vmatmul.mubr.bf16.vlgmr.msra.gmra.mrb[16].mxu1 %v5650_v18 }
 0x883   : > { %2412 = vmatprep.mubr.bf16.mxu1 %v5654_v23  ;;  %2424 = vmatpush1.bf16.msra.mxu1 %v3829_v32  ;;  %v3942_v32 = vcombine.high %v1611_v27, %v1615_v28  ;;  %v4542_v27 = vld [vmem:[#allocation12 + $0x1a4] ss:$8 sps:$4 sm:$0xff]   ;;  %v4540_v28 = vld [vmem:[#allocation12 + $0x1a0] ss:$8 sps:$4 sm:$0xff]  }
 0x884   : > { %2425 = vmatprep.subr.bf16.mxu1 %v3838_v33  ;;  %v1619_v33 = vld [vmem:[#allocation10 + $0x3d8] sm:$0xff] }
 0x887   : > { %2426 = vmatpush1.bf16.msra.mxu1 %v3837_v38  ;;  %v3950_v38 = vcombine.high %v1619_v33, %v1623_v34 }
 0x888   : > { %2427 = vmatprep.subr.bf16.mxu1 %v3846_v39  ;;  %v3949_v39 = vcombine.low %v1619_v33, %v1623_v34  ;;  %v4548_v33 = vld [vmem:[#allocation12 + $0x1c4] ss:$8 sps:$4 sm:$0xff]   ;;  %v4546_v34 = vld [vmem:[#allocation12 + $0x1c0] ss:$8 sps:$4 sm:$0xff]  }
 0x88a   : > { %2413 = vmatmul.mubr.bf16.gmra.mrb[20].mxu1 %v5663_v35 }
 0x88b   : > { %2428 = vmatpush1.bf16.msra.mxu1 %v3845_v3  ;;  %2455 = vmatprep.mubr.bf16.mxu1 %v5648_v17  ;;  %v3886_v17 = vcombine.high %v1555_v24, %v1559_v53 }
 0x88c   : > { %2429 = vmatprep.subr.bf16.mxu1 %v3854_v15 }
 0x88f   : > { %2430 = vmatpush1.bf16.msra.mxu1 %v3853_v44 }
 0x890   : > { %2431 = vmatprep.subr.bf16.mxu1 %v3862_v45 }
 0x893   : > { %2432 = vmatpush1.bf16.msra.mxu1 %v3861_v49 }
 0x894   : > { %2433 = vmatprep.subr.bf16.mxu1 %v3870_v50 }
 0x897   : > { %2434 = vmatpush1.bf16.msra.mxu1 %v3869_v21  ;;  %v4510_v21 = vld [vmem:[#allocation12 + $0x100] ss:$8 sps:$4 sm:$0xff]  }
 0x898   : > { %2435 = vmatprep.subr.bf16.mxu1 %v3878_v52  ;;  %v4515_v52 = vld [vmem:[#allocation12 + $0x114] ss:$8 sps:$4 sm:$0xff]  }
 0x89b   : > { %2436 = vmatpush1.bf16.msra.mxu1 %v3877_v54 }
 0x89c   : > { %2437 = vmatprep.subr.bf16.mxu1 %v3886_v17 }
 0x89f   : > { %2438 = vmatpush1.bf16.msra.mxu1 %v3885_v59 }
 0x8a0   : > { %2439 = vmatprep.subr.bf16.mxu1 %v3894_v60 }
 0x8a3   : > { %2440 = vmatpush1.bf16.msra.mxu1 %v3893_v63 }
 0x8a4   : > { %2441 = vmatprep.subr.bf16.mxu1 %v3902_v0 }
 0x8a7   : > { %2442 = vmatpush1.bf16.msra.mxu1 %v3901_v5  ;;  %v4521_v5 = vld [vmem:[#allocation12 + $0x134] ss:$8 sps:$4 sm:$0xff]  }
 0x8a8   : > { %2443 = vmatprep.subr.bf16.mxu1 %v3910_v6  ;;  %v4519_v6 = vld [vmem:[#allocation12 + $0x130] ss:$8 sps:$4 sm:$0xff]  }
 0x8ab   : > { %2444 = vmatpush1.bf16.msra.mxu1 %v3909_v9  ;;  %v4527_v9 = vld [vmem:[#allocation12 + $0x154] ss:$8 sps:$4 sm:$0xff]  }
 0x8ac   : > { %2445 = vmatprep.subr.bf16.mxu1 %v3918_v11  ;;  %v4525_v11 = vld [vmem:[#allocation12 + $0x150] ss:$8 sps:$4 sm:$0xff]  }
 0x8af   : > { %2446 = vmatpush1.bf16.msra.mxu1 %v3917_v13  ;;  %v4533_v13 = vld [vmem:[#allocation12 + $0x174] ss:$8 sps:$4 sm:$0xff]  }
 0x8b0   : > { %2447 = vmatprep.subr.bf16.mxu1 %v3926_v16  ;;  %v4531_v16 = vld [vmem:[#allocation12 + $0x170] ss:$8 sps:$4 sm:$0xff]  }
 0x8b3   : > { %2448 = vmatpush1.bf16.msra.mxu1 %v3925_v57  ;;  %v4539_v57 = vld [vmem:[#allocation12 + $0x194] ss:$8 sps:$4 sm:$0xff]  }
 0x8b4   : > { %2449 = vmatprep.subr.bf16.mxu1 %v3934_v25  ;;  %v4537_v25 = vld [vmem:[#allocation12 + $0x190] ss:$8 sps:$4 sm:$0xff]  }
 0x8b7   : > { %2450 = vmatpush1.bf16.msra.mxu1 %v3933_v30  ;;  %v4545_v30 = vld [vmem:[#allocation12 + $0x1b4] ss:$8 sps:$4 sm:$0xff]  }
 0x8b8   : > { %2451 = vmatprep.subr.bf16.mxu1 %v3942_v32  ;;  %v4543_v32 = vld [vmem:[#allocation12 + $0x1b0] ss:$8 sps:$4 sm:$0xff]  }
 0x8bb   : > { %2452 = vmatpush1.bf16.msra.mxu1 %v3941_v36  ;;  %v4551_v36 = vld [vmem:[#allocation12 + $0x1d4] ss:$8 sps:$4 sm:$0xff]  }
 0x8bc   : > { %2453 = vmatprep.subr.bf16.mxu1 %v3950_v38  ;;  %v4549_v38 = vld [vmem:[#allocation12 + $0x1d0] ss:$8 sps:$4 sm:$0xff]  }
 0x8bf   : > { %2454 = vmatpush1.bf16.msra.mxu1 %v3949_v39  ;;  %v4554_v39 = vld [vmem:[#allocation12 + $0x1e4] ss:$8 sps:$4 sm:$0xff]  }
 0x8c2   : > { %2456 = vmatmul.mubr.bf16.vlgmr.msra.gmra.mrb[24].mxu1 %v5650_v18 }
 0x8c3   : > { %2465 = vmatprep.mubr.bf16.mxu1 %v5654_v23 }
 0x8ca   : > { %2466 = vmatmul.mubr.bf16.gmra.mrb[28].mxu1 %v5663_v35 }
 0x8d5   : > { %v2298_v41 = vpop.f32.mrb[0].mxu1 }
 0x8d6   : > { %v2476_v29 = vmax.f32 %v2298_v41, 0.0  ;;  %v2300_v3 = vpop.f32.mrb[1].mxu1 }
 0x8d7   : > { %v2477_v15 = vmax.f32 %v2300_v3, 0.0  ;;  %v2302_v42 = vpop.f32.mrb[2].mxu1 }
 0x8d8   : > { %v2484_v43 = vmax.f32 %v2302_v42, 0.0  ;;  %v2304_v44 = vpop.f32.mrb[3].mxu1  ;;  %v2508_v46 = vmul.f32 %v2476_v29, %v2476_v29  ;;  %v4552_v29 = vld [vmem:[#allocation12 + $0x1e0] ss:$8 sps:$4 sm:$0xff]   ;;  %v4557_v42 = vld [vmem:[#allocation12 + $0x1f4] ss:$8 sps:$4 sm:$0xff]  }
 0x8d9   : > { %v2485_v45 = vmax.f32 %v2304_v44, 0.0  ;;  %v2509_v49 = vmul.f32 %v2477_v15, %v2477_v15 }
 0x8da   : > { %v2516_v48 = vmul.f32 %v2484_v43, %v2484_v43 }
 0x8db   : > { %v2517_v50 = vmul.f32 %v2485_v45, %v2485_v45 }
 0x8dc   : > { %v2540_v20 = vpack.c.bf16 %v2516_v48, %v2508_v46 }
 0x8dd   : > { %v2541_v51 = vpack.c.bf16 %v2517_v50, %v2509_v49  ;;  %v2308_v18 = vpop.f32.mrb[4].mxu1  ;;  %v4555_v49 = vld [vmem:[#allocation12 + $0x1f0] ss:$8 sps:$4 sm:$0xff]  }
 0x8de   : > { %v2492_v23 = vmax.f32 %v2308_v18, 0.0  ;;  %v2310_v24 = vpop.f32.mrb[5].mxu1 }
 0x8df   : > { %3356 = vmatprep.mubr.bf16.mxu0 %v2541_v51  ;;  %v2493_v35 = vmax.f32 %v2310_v24, 0.0  ;;  %v2312_v53 = vpop.f32.mrb[6].mxu1  ;;  %v4560_v51 = vld [vmem:[#allocation12 + $0x204] ss:$8 sps:$4 sm:$0xff]  }
 0x8e0   : > { %3357 = vmatmul.mubr.bf16.vlgmr.msra.gmra.mrb[0].mxu0 %v2540_v20  ;;  %v2524_v54 = vmul.f32 %v2492_v23, %v2492_v23  ;;  %v2500_v17 = vmax.f32 %v2312_v53, 0.0  ;;  %v2314_v55 = vpop.f32.mrb[7].mxu1 }
 0x8e1   : > { %3378 = vmatpush1.bf16.msra.mxu0 %v4510_v21  ;;  %v2525_v59 = vmul.f32 %v2493_v35, %v2493_v35  ;;  %v2501_v60 = vmax.f32 %v2314_v55, 0.0  ;;  %v4558_v35 = vld [vmem:[#allocation12 + $0x200] ss:$8 sps:$4 sm:$0xff]  }
 0x8e2   : > { %3379 = vmatprep.subr.bf16.mxu0 %v4515_v52  ;;  %v2532_v62 = vmul.f32 %v2500_v17, %v2500_v17  ;;  %v4563_v17 = vld [vmem:[#allocation12 + $0x214] ss:$8 sps:$4 sm:$0xff]  }
 0x8e3   : > { %v2533_v63 = vmul.f32 %v2501_v60, %v2501_v60 }
 0x8e4   : > { %v2548_v0 = vpack.c.bf16 %v2532_v62, %v2524_v54  ;;  %v4561_v62 = vld [vmem:[#allocation12 + $0x210] ss:$8 sps:$4 sm:$0xff]  }
 0x8e5   : > { %3380 = vmatpush1.bf16.msra.mxu0 %v4513_v56  ;;  %v2549_v2 = vpack.c.bf16 %v2533_v63, %v2525_v59 }
 0x8e6   : > { %3381 = vmatprep.subr.bf16.mxu0 %v4518_v61 }
 0x8e7   : > { %3366 = vmatprep.mubr.bf16.mxu0 %v2549_v2 }
 0x8e8   : > { %3367 = vmatmul.mubr.bf16.gmra.mrb[4].mxu0 %v2548_v0 }
 0x8e9   : > { %3382 = vmatpush1.bf16.msra.mxu0 %v4516_v1  ;;  %v4566_v1 = vld [vmem:[#allocation12 + $0x224] ss:$8 sps:$4 sm:$0xff]  }
 0x8ea   : > { %3383 = vmatprep.subr.bf16.mxu0 %v4521_v5 }
 0x8ed   : > { %3384 = vmatpush1.bf16.msra.mxu0 %v4519_v6 }
 0x8ee   : > { %3385 = vmatprep.subr.bf16.mxu0 %v4524_v7 }
 0x8f1   : > { %3386 = vmatpush1.bf16.msra.mxu0 %v4522_v8  ;;  %v4564_v8 = vld [vmem:[#allocation12 + $0x220] ss:$8 sps:$4 sm:$0xff]  }
 0x8f2   : > { %3387 = vmatprep.subr.bf16.mxu0 %v4527_v9  ;;  %v4569_v9 = vld [vmem:[#allocation12 + $0x234] ss:$8 sps:$4 sm:$0xff]  }
 0x8f5   : > { %3388 = vmatpush1.bf16.msra.mxu0 %v4525_v11  ;;  %v4567_v11 = vld [vmem:[#allocation12 + $0x230] ss:$8 sps:$4 sm:$0xff]  }
 0x8f6   : > { %3389 = vmatprep.subr.bf16.mxu0 %v4530_v40  ;;  %v4572_v40 = vld [vmem:[#allocation12 + $0x244] ss:$8 sps:$4 sm:$0xff]  }
 0x8f9   : > { %3390 = vmatpush1.bf16.msra.mxu0 %v4528_v12  ;;  %v4570_v12 = vld [vmem:[#allocation12 + $0x240] ss:$8 sps:$4 sm:$0xff]  }
 0x8fa   : > { %3391 = vmatprep.subr.bf16.mxu0 %v4533_v13  ;;  %v4575_v13 = vld [vmem:[#allocation12 + $0x254] ss:$8 sps:$4 sm:$0xff]  }
 0x8fd   : > { %3392 = vmatpush1.bf16.msra.mxu0 %v4531_v16  ;;  %v4573_v16 = vld [vmem:[#allocation12 + $0x250] ss:$8 sps:$4 sm:$0xff]  }
 0x8fe   : > { %3393 = vmatprep.subr.bf16.mxu0 %v4536_v58  ;;  %v4578_v58 = vld [vmem:[#allocation12 + $0x264] ss:$8 sps:$4 sm:$0xff]  }
 0x901   : > { %3394 = vmatpush1.bf16.msra.mxu0 %v4534_v22  ;;  %v4576_v22 = vld [vmem:[#allocation12 + $0x260] ss:$8 sps:$4 sm:$0xff]  }
 0x902   : > { %3395 = vmatprep.subr.bf16.mxu0 %v4539_v57  ;;  %v4581_v57 = vld [vmem:[#allocation12 + $0x274] ss:$8 sps:$4 sm:$0xff]  }
 0x905   : > { %3396 = vmatpush1.bf16.msra.mxu0 %v4537_v25  ;;  %v4579_v25 = vld [vmem:[#allocation12 + $0x270] ss:$8 sps:$4 sm:$0xff]  }
 0x906   : > { %3397 = vmatprep.subr.bf16.mxu0 %v4542_v27  ;;  %v4584_v27 = vld [vmem:[#allocation12 + $0x284] ss:$8 sps:$4 sm:$0xff]  }
 0x909   : > { %3398 = vmatpush1.bf16.msra.mxu0 %v4540_v28  ;;  %v4582_v28 = vld [vmem:[#allocation12 + $0x280] ss:$8 sps:$4 sm:$0xff]  }
 0x90a   : > { %3399 = vmatprep.subr.bf16.mxu0 %v4545_v30  ;;  %v4587_v30 = vld [vmem:[#allocation12 + $0x294] ss:$8 sps:$4 sm:$0xff]  }
 0x90d   : > { %3400 = vmatpush1.bf16.msra.mxu0 %v4543_v32  ;;  %v4585_v32 = vld [vmem:[#allocation12 + $0x290] ss:$8 sps:$4 sm:$0xff]  }
 0x90e   : > { %3401 = vmatprep.subr.bf16.mxu0 %v4548_v33  ;;  %v4590_v33 = vld [vmem:[#allocation12 + $0x2a4] ss:$8 sps:$4 sm:$0xff]  }
 0x911   : > { %3402 = vmatpush1.bf16.msra.mxu0 %v4546_v34  ;;  %v4588_v34 = vld [vmem:[#allocation12 + $0x2a0] ss:$8 sps:$4 sm:$0xff]  }
 0x912   : > { %3403 = vmatprep.subr.bf16.mxu0 %v4551_v36  ;;  %v4593_v36 = vld [vmem:[#allocation12 + $0x2b4] ss:$8 sps:$4 sm:$0xff]  }
 0x915   : > { %v2351_v41 = vpop.f32.mrb[8].mxu1  ;;  %3404 = vmatpush1.bf16.msra.mxu0 %v4549_v38  ;;  %v4591_v38 = vld [vmem:[#allocation12 + $0x2b0] ss:$8 sps:$4 sm:$0xff]  }
 0x916   : > { %v2478_v3 = vmax.f32 %v2351_v41, 0.0  ;;  %v2353_v15 = vpop.f32.mrb[9].mxu1  ;;  %3405 = vmatprep.subr.bf16.mxu0 %v4554_v39  ;;  %v4596_v39 = vld [vmem:[#allocation12 + $0x2c4] ss:$8 sps:$4 sm:$0xff]   ;;  %v4594_v41 = vld [vmem:[#allocation12 + $0x2c0] ss:$8 sps:$4 sm:$0xff]  }
 0x917   : > { %v2479_v43 = vmax.f32 %v2353_v15, 0.0  ;;  %v2355_v44 = vpop.f32.mrb[10].mxu1  ;;  %v4602_v15 = vld [vmem:[#allocation12 + $0x2e4] ss:$8 sps:$4 sm:$0xff]  }
 0x918   : > { %v2486_v45 = vmax.f32 %v2355_v44, 0.0  ;;  %v2357_v46 = vpop.f32.mrb[11].mxu1  ;;  %v2510_v50 = vmul.f32 %v2478_v3, %v2478_v3  ;;  %v4597_v3 = vld [vmem:[#allocation12 + $0x2d0] ss:$8 sps:$4 sm:$0xff]  }
 0x919   : > { %v2487_v48 = vmax.f32 %v2357_v46, 0.0  ;;  %3406 = vmatpush1.bf16.msra.mxu0 %v4552_v29  ;;  %v2511_v21 = vmul.f32 %v2479_v43, %v2479_v43  ;;  %v4599_v29 = vld [vmem:[#allocation12 + $0x2d4] ss:$8 sps:$4 sm:$0xff]   ;;  %v4600_v43 = vld [vmem:[#allocation12 + $0x2e0] ss:$8 sps:$4 sm:$0xff]  }
 0x91a   : > { %v2518_v20 = vmul.f32 %v2486_v45, %v2486_v45  ;;  %3407 = vmatprep.subr.bf16.mxu0 %v4557_v42  ;;  %v4605_v46 = vld [vmem:[#allocation12 + $0x2f4] ss:$8 sps:$4 sm:$0xff]  }
 0x91b   : > { %v2519_v18 = vmul.f32 %v2487_v48, %v2487_v48 }
 0x91c   : > { %v2542_v52 = vpack.c.bf16 %v2518_v20, %v2510_v50 }
 0x91d   : > { %v2543_v23 = vpack.c.bf16 %v2519_v18, %v2511_v21  ;;  %v2361_v24 = vpop.f32.mrb[12].mxu1  ;;  %3408 = vmatpush1.bf16.msra.mxu0 %v4555_v49  ;;  %v4603_v21 = vld [vmem:[#allocation12 + $0x2f0] ss:$8 sps:$4 sm:$0xff]  }
 0x91e   : > { %v2494_v53 = vmax.f32 %v2361_v24, 0.0  ;;  %v2363_v54 = vpop.f32.mrb[13].mxu1  ;;  %3430 = vmatprep.subr.bf16.mxu0 %v4560_v51 }
 0x91f   : > { %v2495_v55 = vmax.f32 %v2363_v54, 0.0  ;;  %v2365_v56 = vpop.f32.mrb[14].mxu1  ;;  %3409 = vmatprep.mubr.bf16.mxu0 %v2543_v23  ;;  %v4608_v23 = vld [vmem:[#allocation12 + $0x304] ss:$8 sps:$4 sm:$0xff]  }
 0x920   : > { %v2502_v59 = vmax.f32 %v2365_v56, 0.0  ;;  %v2367_v60 = vpop.f32.mrb[15].mxu1  ;;  %3410 = vmatmul.mubr.bf16.vlgmr.msra.gmra.mrb[0].mxu0 %v2542_v52  ;;  %v2526_v63 = vmul.f32 %v2494_v53, %v2494_v53 }
 0x921   : > { %v2503_v61 = vmax.f32 %v2367_v60, 0.0  ;;  %3431 = vmatpush1.bf16.msra.mxu0 %v4558_v35  ;;  %v2527_v2 = vmul.f32 %v2495_v55, %v2495_v55  ;;  %v4606_v55 = vld [vmem:[#allocation12 + $0x300] ss:$8 sps:$4 sm:$0xff]   ;;  %v4611_v60 = vld [vmem:[#allocation12 + $0x314] ss:$8 sps:$4 sm:$0xff]  }
 0x922   : > { %v2534_v0 = vmul.f32 %v2502_v59, %v2502_v59  ;;  %3432 = vmatprep.subr.bf16.mxu0 %v4563_v17 }
 0x923   : > { %v2535_v5 = vmul.f32 %v2503_v61, %v2503_v61 }
 0x924   : > { %v2550_v6 = vpack.c.bf16 %v2534_v0, %v2526_v63 }
 0x925   : > { %v2551_v7 = vpack.c.bf16 %v2535_v5, %v2527_v2  ;;  %3433 = vmatpush1.bf16.msra.mxu0 %v4561_v62  ;;  %v4609_v2 = vld [vmem:[#allocation12 + $0x310] ss:$8 sps:$4 sm:$0xff]  }
 0x926   : > { %3434 = vmatprep.subr.bf16.mxu0 %v4566_v1 }
 0x927   : > { %3419 = vmatprep.mubr.bf16.mxu0 %v2551_v7  ;;  %v4614_v7 = vld [vmem:[#allocation12 + $0x324] ss:$8 sps:$4 sm:$0xff]  }
 0x928   : > { %3420 = vmatmul.mubr.bf16.gmra.mrb[4].mxu0 %v2550_v6 }
 0x929   : > { %3435 = vmatpush1.bf16.msra.mxu0 %v4564_v8 }
 0x92a   : > { %3436 = vmatprep.subr.bf16.mxu0 %v4569_v9 }
 0x92d   : > { %3437 = vmatpush1.bf16.msra.mxu0 %v4567_v11 }
 0x92e   : > { %3438 = vmatprep.subr.bf16.mxu0 %v4572_v40 }
 0x931   : > { %3439 = vmatpush1.bf16.msra.mxu0 %v4570_v12  ;;  %v4612_v12 = vld [vmem:[#allocation12 + $0x320] ss:$8 sps:$4 sm:$0xff]  }
 0x932   : > { %3440 = vmatprep.subr.bf16.mxu0 %v4575_v13  ;;  %v4617_v13 = vld [vmem:[#allocation12 + $0x334] ss:$8 sps:$4 sm:$0xff]  }
 0x935   : > { %3441 = vmatpush1.bf16.msra.mxu0 %v4573_v16  ;;  %v4615_v16 = vld [vmem:[#allocation12 + $0x330] ss:$8 sps:$4 sm:$0xff]  }
 0x936   : > { %3442 = vmatprep.subr.bf16.mxu0 %v4578_v58  ;;  %v4620_v58 = vld [vmem:[#allocation12 + $0x344] ss:$8 sps:$4 sm:$0xff]  }
 0x939   : > { %3443 = vmatpush1.bf16.msra.mxu0 %v4576_v22  ;;  %v4618_v22 = vld [vmem:[#allocation12 + $0x340] ss:$8 sps:$4 sm:$0xff]  }
 0x93a   : > { %3444 = vmatprep.subr.bf16.mxu0 %v4581_v57  ;;  %v4623_v57 = vld [vmem:[#allocation12 + $0x354] ss:$8 sps:$4 sm:$0xff]  }
 0x93d   : > { %3445 = vmatpush1.bf16.msra.mxu0 %v4579_v25  ;;  %v4621_v25 = vld [vmem:[#allocation12 + $0x350] ss:$8 sps:$4 sm:$0xff]  }
 0x93e   : > { %3446 = vmatprep.subr.bf16.mxu0 %v4584_v27  ;;  %v4626_v27 = vld [vmem:[#allocation12 + $0x364] ss:$8 sps:$4 sm:$0xff]  }
 0x941   : > { %3447 = vmatpush1.bf16.msra.mxu0 %v4582_v28  ;;  %v4624_v28 = vld [vmem:[#allocation12 + $0x360] ss:$8 sps:$4 sm:$0xff]  }
 0x942   : > { %3448 = vmatprep.subr.bf16.mxu0 %v4587_v30  ;;  %v4629_v30 = vld [vmem:[#allocation12 + $0x374] ss:$8 sps:$4 sm:$0xff]  }
 0x945   : > { %3449 = vmatpush1.bf16.msra.mxu0 %v4585_v32  ;;  %v4627_v32 = vld [vmem:[#allocation12 + $0x370] ss:$8 sps:$4 sm:$0xff]  }
 0x946   : > { %3450 = vmatprep.subr.bf16.mxu0 %v4590_v33  ;;  %v4632_v33 = vld [vmem:[#allocation12 + $0x384] ss:$8 sps:$4 sm:$0xff]  }
 0x949   : > { %3451 = vmatpush1.bf16.msra.mxu0 %v4588_v34  ;;  %v4630_v34 = vld [vmem:[#allocation12 + $0x380] ss:$8 sps:$4 sm:$0xff]  }
 0x94a   : > { %3452 = vmatprep.subr.bf16.mxu0 %v4593_v36  ;;  %v4635_v36 = vld [vmem:[#allocation12 + $0x394] ss:$8 sps:$4 sm:$0xff]  }
 0x94d   : > { %3453 = vmatpush1.bf16.msra.mxu0 %v4591_v38  ;;  %v4633_v38 = vld [vmem:[#allocation12 + $0x390] ss:$8 sps:$4 sm:$0xff]  }
 0x94e   : > { %3454 = vmatprep.subr.bf16.mxu0 %v4596_v39  ;;  %v4638_v39 = vld [vmem:[#allocation12 + $0x3a4] ss:$8 sps:$4 sm:$0xff]  }
 0x951   : > { %3455 = vmatpush1.bf16.msra.mxu0 %v4594_v41  ;;  %v4636_v41 = vld [vmem:[#allocation12 + $0x3a0] ss:$8 sps:$4 sm:$0xff]  }
 0x952   : > { %3456 = vmatprep.subr.bf16.mxu0 %v4599_v29  ;;  %v4641_v29 = vld [vmem:[#allocation12 + $0x3b4] ss:$8 sps:$4 sm:$0xff]  }
 0x955   : > { %v2404_v42 = vpop.f32.mrb[16].mxu1  ;;  %3457 = vmatpush1.bf16.msra.mxu0 %v4597_v3  ;;  %v4639_v3 = vld [vmem:[#allocation12 + $0x3b0] ss:$8 sps:$4 sm:$0xff]  }
 0x956   : > { %v2480_v44 = vmax.f32 %v2404_v42, 0.0  ;;  %v2406_v45 = vpop.f32.mrb[17].mxu1  ;;  %3458 = vmatprep.subr.bf16.mxu0 %v4602_v15  ;;  %v4644_v15 = vld [vmem:[#allocation12 + $0x3c4] ss:$8 sps:$4 sm:$0xff]   ;;  %v4642_v42 = vld [vmem:[#allocation12 + $0x3c0] ss:$8 sps:$4 sm:$0xff]  }
 0x957   : > { %v2481_v48 = vmax.f32 %v2406_v45, 0.0  ;;  %v2408_v49 = vpop.f32.mrb[18].mxu1  ;;  %v4650_v45 = vld [vmem:[#allocation12 + $0x3e4] ss:$8 sps:$4 sm:$0xff]  }
 0x958   : > { %v2488_v50 = vmax.f32 %v2408_v49, 0.0  ;;  %v2410_v20 = vpop.f32.mrb[19].mxu1  ;;  %v2512_v18 = vmul.f32 %v2480_v44, %v2480_v44  ;;  %v4645_v44 = vld [vmem:[#allocation12 + $0x3d0] ss:$8 sps:$4 sm:$0xff]  }
 0x959   : > { %v2489_v51 = vmax.f32 %v2410_v20, 0.0  ;;  %3459 = vmatpush1.bf16.msra.mxu0 %v4600_v43  ;;  %v2513_v24 = vmul.f32 %v2481_v48, %v2481_v48  ;;  %v4647_v43 = vld [vmem:[#allocation12 + $0x3d4] ss:$8 sps:$4 sm:$0xff]   ;;  %v4648_v48 = vld [vmem:[#allocation12 + $0x3e0] ss:$8 sps:$4 sm:$0xff]  }
 0x95a   : > { %v2520_v52 = vmul.f32 %v2488_v50, %v2488_v50  ;;  %3460 = vmatprep.subr.bf16.mxu0 %v4605_v46  ;;  %v4653_v20 = vld [vmem:[#allocation12 + $0x3f4] ss:$8 sps:$4 sm:$0xff]  }
 0x95b   : > { %v2521_v35 = vmul.f32 %v2489_v51, %v2489_v51 }
 0x95c   : > { %v2544_v53 = vpack.c.bf16 %v2520_v52, %v2512_v18 }
 0x95d   : > { %v2545_v54 = vpack.c.bf16 %v2521_v35, %v2513_v24  ;;  %v2414_v17 = vpop.f32.mrb[20].mxu1  ;;  %3461 = vmatpush1.bf16.msra.mxu0 %v4603_v21  ;;  %v4651_v24 = vld [vmem:[#allocation12 + $0x3f0] ss:$8 sps:$4 sm:$0xff]  }
 0x95e   : > { %v2496_v56 = vmax.f32 %v2414_v17, 0.0  ;;  %v2416_v59 = vpop.f32.mrb[21].mxu1  ;;  %3483 = vmatprep.subr.bf16.mxu0 %v4608_v23 }
 0x95f   : > { %v2497_v61 = vmax.f32 %v2416_v59, 0.0  ;;  %v2418_v62 = vpop.f32.mrb[22].mxu1  ;;  %3462 = vmatprep.mubr.bf16.mxu0 %v2545_v54 }
 0x960   : > { %v2504_v63 = vmax.f32 %v2418_v62, 0.0  ;;  %v2420_v0 = vpop.f32.mrb[23].mxu1  ;;  %3463 = vmatmul.mubr.bf16.vlgmr.msra.gmra.mrb[0].mxu0 %v2544_v53  ;;  %v2528_v5 = vmul.f32 %v2496_v56, %v2496_v56 }
 0x961   : > { %v2505_v1 = vmax.f32 %v2420_v0, 0.0  ;;  %3484 = vmatpush1.bf16.msra.mxu0 %v4606_v55  ;;  %v2529_v8 = vmul.f32 %v2497_v61, %v2497_v61 }
 0x962   : > { %v2536_v6 = vmul.f32 %v2504_v63, %v2504_v63  ;;  %3485 = vmatprep.subr.bf16.mxu0 %v4611_v60 }
 0x963   : > { %v2537_v9 = vmul.f32 %v2505_v1, %v2505_v1 }
 0x964   : > { %v2552_v11 = vpack.c.bf16 %v2536_v6, %v2528_v5 }
 0x965   : > { %v2553_v40 = vpack.c.bf16 %v2537_v9, %v2529_v8  ;;  %3486 = vmatpush1.bf16.msra.mxu0 %v4609_v2 }
 0x966   : > { %3487 = vmatprep.subr.bf16.mxu0 %v4614_v7 }
 0x967   : > { %3472 = vmatprep.mubr.bf16.mxu0 %v2553_v40 }
 0x968   : > { %3473 = vmatmul.mubr.bf16.gmra.mrb[4].mxu0 %v2552_v11 }
 0x969   : > { %3488 = vmatpush1.bf16.msra.mxu0 %v4612_v12 }
 0x96a   : > { %3489 = vmatprep.subr.bf16.mxu0 %v4617_v13 }
 0x96d   : > { %3490 = vmatpush1.bf16.msra.mxu0 %v4615_v16 }
 0x96e   : > { %3491 = vmatprep.subr.bf16.mxu0 %v4620_v58 }
 0x971   : > { %3492 = vmatpush1.bf16.msra.mxu0 %v4618_v22 }
 0x972   : > { %3493 = vmatprep.subr.bf16.mxu0 %v4623_v57 }
 0x975   : > { %3494 = vmatpush1.bf16.msra.mxu0 %v4621_v25 }
 0x976   : > { %3495 = vmatprep.subr.bf16.mxu0 %v4626_v27 }
 0x979   : > { %3496 = vmatpush1.bf16.msra.mxu0 %v4624_v28 }
 0x97a   : > { %3497 = vmatprep.subr.bf16.mxu0 %v4629_v30 }
 0x97d   : > { %3498 = vmatpush1.bf16.msra.mxu0 %v4627_v32 }
 0x97e   : > { %3499 = vmatprep.subr.bf16.mxu0 %v4632_v33 }
 0x981   : > { %3500 = vmatpush1.bf16.msra.mxu0 %v4630_v34 }
 0x982   : > { %3501 = vmatprep.subr.bf16.mxu0 %v4635_v36 }
 0x985   : > { %3502 = vmatpush1.bf16.msra.mxu0 %v4633_v38 }
 0x986   : > { %3503 = vmatprep.subr.bf16.mxu0 %v4638_v39 }
 0x989   : > { %3504 = vmatpush1.bf16.msra.mxu0 %v4636_v41 }
 0x98a   : > { %3505 = vmatprep.subr.bf16.mxu0 %v4641_v29 }
 0x98d   : > { %3506 = vmatpush1.bf16.msra.mxu0 %v4639_v3 }
 0x98e   : > { %3507 = vmatprep.subr.bf16.mxu0 %v4644_v15 }
 0x991   : > { %3508 = vmatpush1.bf16.msra.mxu0 %v4642_v42 }
 0x992   : > { %3509 = vmatprep.subr.bf16.mxu0 %v4647_v43 }
 0x995   : > { %v2457_v46 = vpop.f32.mrb[24].mxu1  ;;  %3510 = vmatpush1.bf16.msra.mxu0 %v4645_v44 }
 0x996   : > { %v2482_v49 = vmax.f32 %v2457_v46, 0.0  ;;  %v2459_v50 = vpop.f32.mrb[25].mxu1  ;;  %3511 = vmatprep.subr.bf16.mxu0 %v4650_v45 }
 0x997   : > { %v2483_v51 = vmax.f32 %v2459_v50, 0.0  ;;  %v2461_v21 = vpop.f32.mrb[26].mxu1 }
 0x998   : > { %v2490_v18 = vmax.f32 %v2461_v21, 0.0  ;;  %v2463_v52 = vpop.f32.mrb[27].mxu1  ;;  %v2514_v35 = vmul.f32 %v2482_v49, %v2482_v49 }
 0x999   : > { %v2491_v23 = vmax.f32 %v2463_v52, 0.0  ;;  %3512 = vmatpush1.bf16.msra.mxu0 %v4648_v48  ;;  %v2515_v54 = vmul.f32 %v2483_v51, %v2483_v51 }
 0x99a   : > { %v2522_v53 = vmul.f32 %v2490_v18, %v2490_v18  ;;  %3513 = vmatprep.subr.bf16.mxu0 %v4653_v20 }
 0x99b   : > { %v2523_v17 = vmul.f32 %v2491_v23, %v2491_v23 }
 0x99c   : > { %v2546_v55 = vpack.c.bf16 %v2522_v53, %v2514_v35 }
 0x99d   : > { %v2547_v56 = vpack.c.bf16 %v2523_v17, %v2515_v54  ;;  %v2467_v59 = vpop.f32.mrb[28].mxu1  ;;  %3514 = vmatpush1.bf16.msra.mxu0 %v4651_v24 }
 0x99e   : > { %v2498_v60 = vmax.f32 %v2467_v59, 0.0  ;;  %v2469_v61 = vpop.f32.mrb[29].mxu1 }
 0x99f   : > { %v2499_v62 = vmax.f32 %v2469_v61, 0.0  ;;  %v2471_v63 = vpop.f32.mrb[30].mxu1  ;;  %3515 = vmatprep.mubr.bf16.mxu0 %v2547_v56 }
 0x9a0   : > { %v2506_v0 = vmax.f32 %v2471_v63, 0.0  ;;  %v2473_v1 = vpop.f32.mrb[31].mxu1  ;;  %3516 = vmatmul.mubr.bf16.vlgmr.msra.gmra.mrb[0].mxu0 %v2546_v55  ;;  %v2530_v5 = vmul.f32 %v2498_v60, %v2498_v60 }
 0x9a1   : > { %v2507_v2 = vmax.f32 %v2473_v1, 0.0  ;;  %v2531_v7 = vmul.f32 %v2499_v62, %v2499_v62 }
 0x9a2   : > { %v2538_v6 = vmul.f32 %v2506_v0, %v2506_v0 }
 0x9a3   : > { %v2539_v8 = vmul.f32 %v2507_v2, %v2507_v2 }
 0x9a4   : > { %v2554_v9 = vpack.c.bf16 %v2538_v6, %v2530_v5 }
 0x9a5   : > { %v2555_v11 = vpack.c.bf16 %v2539_v8, %v2531_v7 }
 0x9a7   : > { %3525 = vmatprep.mubr.bf16.mxu0 %v2555_v11 }
 0x9a8   : > { %3526 = vmatmul.mubr.bf16.gmra.mrb[4].mxu0 %v2554_v9 }
 0xa73   : > { %v3517_v40 = vpop.f32.mrb[0].mxu0 }
 0xa74   : > { %v3536_v12 = vadd.f32 %v3517_v40, %v5597_v47  ;;  %v3519_v13 = vpop.f32.mrb[1].mxu0 }
 0xa75   : > { %v3537_v16 = vadd.f32 %v3519_v13, %v5601_v14  ;;  %v3521_v58 = vpop.f32.mrb[2].mxu0 }
 0xa76   : > { %3544 = vst [vmem:[%s5457_s8] sm:$0xff] %v3536_v12  ;;  %v3538_v22 = vadd.f32 %v3521_v58, %v5606_v4  ;;  %v3523_v57 = vpop.f32.mrb[3].mxu0 }
 0xa77   : > { %3545 = vst [vmem:[%s5457_s8 + $0x8] sm:$0xff] %v3537_v16  ;;  %v3539_v25 = vadd.f32 %v3523_v57, %v5608_v19 }
 0xa78   : > { %3546 = vst [vmem:[%s5457_s8 + $0x10] sm:$0xff] %v3538_v22 }
 0xa79   : > { %3547 = vst [vmem:[%s5457_s8 + $0x18] sm:$0xff] %v3539_v25 }
 0xa7b   : > { %v3527_v27 = vpop.f32.mrb[4].mxu0 }
 0xa7c   : > { %v3540_v47 = vadd.f32 %v3527_v27, %v5613_v10  ;;  %v3529_v28 = vpop.f32.mrb[5].mxu0 }
 0xa7d   : > { %v3541_v30 = vadd.f32 %v3529_v28, %v5615_v26  ;;  %v3531_v14 = vpop.f32.mrb[6].mxu0 }
 0xa7e   : > { %3548 = vst [vmem:[%s5457_s8 + $0x20] sm:$0xff] %v3540_v47  ;;  %v3542_v32 = vadd.f32 %v3531_v14, %v5623_v31  ;;  %v3533_v33 = vpop.f32.mrb[7].mxu0 }
 0xa7f   : > { %3549 = vst [vmem:[%s5457_s8 + $0x28] sm:$0xff] %v3541_v30  ;;  %v3543_v4 = vadd.f32 %v3533_v33, %v5629_v37 }
 0xa80   : > { %3550 = vst [vmem:[%s5457_s8 + $0x30] sm:$0xff] %v3542_v32 }
 0xa81   : > { %3551 = vst [vmem:[%s5457_s8 + $0x38] sm:$0xff] %v3543_v4 }
 0xa82 PF: > { %s5853_s24 = sld [smem:[#allocation24_spill]]  ;;  %s5854_s13 = sld [smem:[#allocation37_spill]] }
 0xa83   : > { %s3566_s3 = sshll.u32 %s5457_s8, 4  ;;  %s3553_s7 = scalar_lea.sflag [#allocation6], %s5429_s2  ;;  %s5701_s3 = int_to_ptr.vmem [resolvable:$true] %s3566_s3 }
 0xa84   : > { %s4864_s25 = scalar_lea.vmem %s5701_s3, 1024  ;;  %p5855_p7 = scmp.ne.s32.totalorder %s5829_s1, 0 }
 0xa85   : > { %p4865_p3 = scmp.ne.s32.totalorder %s5701_s3, %s4864_s25  ;;  %s5019_s14 = smov [#allocation16]  }
 0xa86   : > { %s4868_s5 = sshll.u32 %s5019_s14, 4  ;;  %s4869_s5 = int_to_ptr.vmem [resolvable:$false] %s4868_s5 }
 0xa87   : > { %p4866_p1 = pnand %p4865_p3, %p5855_p7  ;;  %s4870_s4 = scalar_lea.vmem %s4869_s5, 2048 }
 0xa88   : > { %s4088_s19 = sshll.u32 %s5853_s24, 10  ;;  %p4871_p13 = scmp.lt.s32.totalorder %s5701_s3, %s4869_s5 }
 0xa89   : > { %s5698_s17 = scalar_lea.hbm %s5854_s13, %s4088_s19  ;;  %p4867_p6 = pneg %p4866_p1 }
 0xa8a   : > { %p4872_p0 = scmp.lt.s32.totalorder %s4870_s4, %s4864_s25 }
 0xa8c   : > { %p4873_p9 = por %p4872_p0, %p4871_p13 }
 0xa8e   : > { %p4874_p12 = pnand %p4873_p9, %p4867_p6 }
 0xa90   : > { %4877 = shalt.err (!%p4874_p12)
}
 0xa91   : > { %s4878_s30 = scalar_lea.hbm %s5698_s17, 1024  ;;  %s4882_s8 = scalar_lea.hbm %s5854_s13, 2048 }
 0xa92   : > { %p4879_p10 = scmp.ne.s32.totalorder %s5698_s17, %s4878_s30  ;;  %p4883_p11 = scmp.lt.u32.totalorder %s5698_s17, %s5854_s13 }
 0xa93   : > { %p4884_p8 = scmp.lt.u32.totalorder %s4882_s8, %s4878_s30  ;;  %p4886_p3 = scmp.lt.u32.totalorder %s4878_s30, %s5698_s17 }
 0xa94   : > { %p4880_p2 = pnand %p4879_p10, %p5855_p7 }
 0xa95   : > { %p4885_p5 = por %p4884_p8, %p4883_p11 }
 0xa96   : > { %p4881_p4 = pneg %p4880_p2 }
 0xa97   : > { %p4887_p1 = por %p4886_p3, %p4885_p5 }
 0xa99   : > { %p4888_p6 = pnand %p4887_p1, %p4881_p4 }
 0xa9b   : > { %4891 = shalt.err (!%p4888_p6)
}
 0xa9c   : > { %s5020_s16 = smov 256   ;;  %s5021_s24 = smov 16  }
 0xa9d   : > { %4189 = dma.vmem_to_hbm [thread:$0]  (%p5855_p7), %s5701_s3, 1024, %s5698_s17, %s3553_s7, %s5020_s16, %s5020_s16, %s5021_s24  }
 0xa9e PF: > { %p4227_p13 = scmp.ge.s32.totalorder %s4998_s11, 2  ;;  %s3581_s19 = sand.u32 1, %s4970_s27  }
 0xa9f   : > { %p5856_p0 = scmp.ne.s32.totalorder %s5833_s18, 0  ;;  %s3582_s15 = scalar_lea.sflag [#allocation6], %s3581_s19 }
 0xaa1   : > { %p4215_p9 = pnand %p4227_p13, %p5856_p0 }
 0xaa3   : > { %4953 = dma.done.wait (!%p4215_p9), %s3582_s15, 1024  }
 0xaa4   : > { %4955 = vsyncadd (!%p4215_p9), %s3582_s15, 4294966272  ;;  %s28_s11 = sadd.s32 1, %s4998_s11   ;;  %s5857_s24 = sld [smem:[#allocation22_spill]] }
 0xaa5   : > { %p25_p12 = scmp.ge.s32.totalorder %s28_s11, 6   ;;  %s5858_s21 = sld [smem:[#allocation28_spill]] }
 0xaa6   : > { %s5859_s1 = sld [smem:[#allocation27_spill]]  ;;  %s5860_s2 = sld [smem:[#allocation29_spill]] }
 0xaa7   : > { %s5861_s25 = smov %s4966_s26  ;;  %s5863_s27 = smov %s4974_s28 }
 0xaa8   : > { %s5864_s28 = smov %s4978_s29  ;;  %s5865_s29 = smov %s5340_s22 }
 0xaa9   : > { %s5866_s30 = smov %s4990_s9  ;;  %s5867_s8 = smov %s4994_s10 }
 0xaaa   :  { %27 = sbr.rel (!%p25_p12) target bundleno = 22 (0x16), region = 141 }
 0xaab   : > { %s5862_s26 = smov %s5858_s21 }
 0xaac   : > { %s5868_s9 = smov %s5859_s1  ;;  %s5869_s10 = smov %s5860_s2 }
 0xab1   :  { %3587 = vsyncpa [#allocation5], 1 }
 0xab2   :  { %3589 = vsyncpa [#allocation5 + $0x1], 1 }
 0xab3   :  { %3590 = vsyncpa [#allocation8], 1 }
 0xab4   :  { %3592 = vsyncpa [#allocation8 + $0x1], 1 }
 0xab5   :  { %3593 = vsyncpa [#allocation11], 1 }
 0xab6   :  { %3594 = vsyncpa [#allocation14], 1 }
 0xab7   :  { %3595 = vsyncpa [#allocation6], 1 }
 0xab8   :  { %3597 = vsyncpa [#allocation6 + $0x1], 1 }

</bundles_post_ra>
